<compile_context>
chip_gen: v5e
topology: v5e:2x2
jax: 0.10.0
libtpu: 0.0.40
codegen_flags: <defaults>
</compile_context>

<pallas_src>
import numpy as np
import jax
import jax.numpy as jnp
from jax.experimental import pallas as pl
from jax.experimental.pallas import tpu as pltpu

# ---------------------------------------------------------------- constants
IMG_H, IMG_W, IMG_C = 7, 7, 3          # MiniGrid observation
CONV_OUT_C, CONV_OUT_HW = 16, 5        # after 3x3 stride-1 VALID conv
CONV_FLAT = CONV_OUT_C * CONV_OUT_HW * CONV_OUT_HW   # 400
IMG_FLAT = IMG_H * IMG_W * IMG_C                     # 147
FC1_DIM = 256
LSTM_DIM = 128
N_ACT = 7
N_HEADS = N_ACT + 1                    # fused [pi logits | v]


# ---------------------------------------------------------------- kernel
def make_actor_critic_kernel(T, Bp):
    """Whole forward pass in one kernel (everything fits in VMEM at these sizes)."""
    N = T * Bp

    def kernel(x_ref, wconv_ref, bconv_ref, w1_ref, b1_ref,
               wih_ref, whh_ref, blstm_ref, h0_ref, c0_ref,
               wheads_ref, bheads_ref,
               pv_ref, hid_ref, lstm_out_ref):
        # --- conv (as matmul, 1/255 folded into wconv) + relu ----------------
        x = x_ref[...].astype(jnp.bfloat16)                            # (N, 147)
        h1 = jnp.maximum(
            jnp.dot(x, wconv_ref[...], preferred_element_type=jnp.float32)
            + bconv_ref[...], 0.0)                                     # (N, 400) f32

        # --- fc1 + relu -------------------------------------------------------
        feat = jnp.maximum(
            jnp.dot(h1.astype(jnp.bfloat16), w1_ref[...],
                    preferred_element_type=jnp.float32) + b1_ref[...], 0.0)  # (N, 256)

        # --- LSTM input projection hoisted out of the time loop ---------------
        gates_x = (jnp.dot(feat.astype(jnp.bfloat16), wih_ref[...],
                           preferred_element_type=jnp.float32)
                   + blstm_ref[...])                                   # (N, 512)

        # --- LSTM recurrence over T steps (statically unrolled) ---------------
        whh = whh_ref[...]                                             # (128, 512) bf16
        h = h0_ref[...]                                                # (Bp, 128) f32
        c = c0_ref[...]                                                # (Bp, 128) f32
        H = LSTM_DIM
        for t in range(T):
            gates = (gates_x[t * Bp:(t + 1) * Bp, :]
                     + jnp.dot(h.astype(jnp.bfloat16), whh,
                               preferred_element_type=jnp.float32))    # (Bp, 512)
            i_g = jax.nn.sigmoid(gates[:, 0 * H:1 * H])
            f_g = jax.nn.sigmoid(gates[:, 1 * H:2 * H])
            g_g = jnp.tanh(gates[:, 2 * H:3 * H])
            o_g = jax.nn.sigmoid(gates[:, 3 * H:4 * H])
            c = f_g * c + i_g * g_g
            h = o_g * jnp.tanh(c)
            lstm_out_ref[t * Bp:(t + 1) * Bp, :] = h.astype(jnp.bfloat16)

        # --- fused policy + value heads: cols 0..6 = pi logits, col 7 = v ------
        heads = (jnp.dot(lstm_out_ref[...], wheads_ref[...],
                         preferred_element_type=jnp.float32)
                 + bheads_ref[...])                                    # (N, 8)
        col = jax.lax.broadcasted_iota(jnp.int32, heads.shape, 1)
        is_pi = col < N_ACT
        m = jnp.max(jnp.where(is_pi, heads, -1e30), axis=-1, keepdims=True)
        e = jnp.where(is_pi, jnp.exp(heads - m), 0.0)
        denom = jnp.sum(e, axis=-1, keepdims=True)
        prob = e * pl.reciprocal(denom, approx=True)
        pv_ref[...] = jnp.where(is_pi, prob, heads)                    # [prob | v]

        # --- returned recurrent state: cat(h_n, c_n) ---------------------------
        hid_ref[...] = jnp.concatenate([h, c], axis=-1)                # (Bp, 256)

    return kernel


# ---------------------------------------------------------------- wrapper
def actor_critic_pi_v(x, hidden, kparams):
    """x: (T, B, 7, 7, 3) uint8-range floats; hidden: (B, 256).
    Returns (prob (T,B,7), v (T,B,1), lstm_hidden (B,256))."""
    T, B = x.shape[0], x.shape[1]
    Bp = max(8, ((B + 7) // 8) * 8)            # pad batch to a full sublane group
    N = T * Bp

    x_f = x.astype(jnp.float32).reshape(T, B, IMG_FLAT)
    if Bp != B:
        x_f = jnp.pad(x_f, ((0, 0), (0, Bp - B), (0, 0)))
    x_flat = x_f.reshape(N, IMG_FLAT)

    hid_f = hidden.astype(jnp.float32)
    if Bp != B:
        hid_f = jnp.pad(hid_f, ((0, Bp - B), (0, 0)))
    h0, c0 = jnp.split(hid_f, 2, axis=1)

    inputs = (x_flat,
              kparams["wconv"], kparams["bconv"],
              kparams["w1"], kparams["b1"],
              kparams["wih"], kparams["whh"], kparams["blstm"],
              h0, c0,
              kparams["wheads"], kparams["bheads"])

    vmem = pl.BlockSpec(memory_space=pltpu.MemorySpace.VMEM)
    pv, hid_out = pl.pallas_call(
        make_actor_critic_kernel(T, Bp),
        out_shape=(jax.ShapeDtypeStruct((N, N_HEADS), jnp.float32),
                   jax.ShapeDtypeStruct((Bp, 2 * LSTM_DIM), jnp.float32)),
        in_specs=[vmem] * len(inputs),
        out_specs=(vmem, vmem),
        scratch_shapes=[pltpu.VMEM((N, LSTM_DIM), jnp.bfloat16)],
    )(*inputs)

    pv = pv.reshape(T, Bp, N_HEADS)[:, :B]
    prob = pv[..., :N_ACT]
    v = pv[..., N_ACT:]
    return prob, v, hid_out[:B]


# ---------------------------------------------------------------- params
def init_torch_style_params(key):
    """Deterministic synthetic parameters with the PyTorch module's shapes."""
    ks = jax.random.split(key, 12)
    s = 0.05
    p = {
        "conv_w": jax.random.normal(ks[0], (16, 3, 3, 3), jnp.float32) * s,   # OIHW
        "conv_b": jax.random.normal(ks[1], (16,), jnp.float32) * s,
        "fc1_w": jax.random.normal(ks[2], (256, 400), jnp.float32) * s,
        "fc1_b": jax.random.normal(ks[3], (256,), jnp.float32) * s,
        "w_ih": jax.random.normal(ks[4], (512, 256), jnp.float32) * s,         # i,f,g,o
        "w_hh": jax.random.normal(ks[5], (512, 128), jnp.float32) * s,
        "b_ih": jax.random.normal(ks[6], (512,), jnp.float32) * s,
        "b_hh": jax.random.normal(ks[7], (512,), jnp.float32) * s,
        "pi_w": jax.random.normal(ks[8], (7, 128), jnp.float32) * s,
        "pi_b": jax.random.normal(ks[9], (7,), jnp.float32) * s,
        "v_w": jax.random.normal(ks[10], (1, 128), jnp.float32) * s,
        "v_b": jax.random.normal(ks[11], (1,), jnp.float32) * s,
    }
    return p


def pack_kernel_params(p):
    """Repack torch-style params into the kernel's matmul-only layout.

    - 1/255 scale is folded into the conv matrix.
    - Matmul weights are stored in bf16 (MXU-native); biases stay f32.
    - pi/v heads are fused into a single (128, 8) weight / (1, 8) bias.
    """
    conv_w = np.asarray(p["conv_w"])
    conv_b = np.asarray(p["conv_b"])
    # Dense (147, 400) matrix implementing the 3x3 stride-1 VALID conv on a
    # HWC-flattened 7x7x3 image; output column order = co*25 + oh*5 + ow
    # (matches PyTorch's NCHW flatten of the conv output).
    M = np.zeros((IMG_FLAT, CONV_FLAT), np.float32)
    bconv = np.zeros((1, CONV_FLAT), np.float32)
    inv255 = 1.0 / 255.0
    for co in range(CONV_OUT_C):
        for oh in range(CONV_OUT_HW):
            for ow in range(CONV_OUT_HW):
                col = co * 25 + oh * 5 + ow
                bconv[0, col] = conv_b[co]
                for ci in range(IMG_C):
                    for kh in range(3):
                        for kw in range(3):
                            row = (oh + kh) * (IMG_W * IMG_C) + (ow + kw) * IMG_C + ci
                            M[row, col] = conv_w[co, ci, kh, kw] * inv255
    wheads = np.concatenate([np.asarray(p["pi_w"]).T,
                             np.asarray(p["v_w"]).T], axis=1)          # (128, 8)
    bheads = np.concatenate([np.asarray(p["pi_b"]),
                             np.asarray(p["v_b"])])[None, :]           # (1, 8)
    return {
        "wconv": jnp.asarray(M, dtype=jnp.bfloat16),
        "bconv": jnp.asarray(bconv, dtype=jnp.float32),
        "w1": jnp.asarray(p["fc1_w"]).T.astype(jnp.bfloat16),          # (400, 256)
        "b1": jnp.asarray(p["fc1_b"])[None, :].astype(jnp.float32),    # (1, 256)
        "wih": jnp.asarray(p["w_ih"]).T.astype(jnp.bfloat16),          # (256, 512)
        "whh": jnp.asarray(p["w_hh"]).T.astype(jnp.bfloat16),          # (128, 512)
        "blstm": (jnp.asarray(p["b_ih"]) + jnp.asarray(p["b_hh"]))[None, :].astype(jnp.float32),
        "wheads": jnp.asarray(wheads, dtype=jnp.bfloat16),             # (128, 8)
        "bheads": jnp.asarray(bheads, dtype=jnp.float32),              # (1, 8)
    }


# ---------------------------------------------------------------- pure-JAX reference
def reference_pi_v(x, hidden, p):
    T, B = x.shape[0], x.shape[1]
    xx = x.astype(jnp.float32) / 255.0
    xx = xx.reshape(T * B, IMG_H, IMG_W, IMG_C).transpose(0, 3, 1, 2)   # NCHW
    y = jax.lax.conv_general_dilated(
        xx, p["conv_w"], (1, 1), "VALID",
        dimension_numbers=("NCHW", "OIHW", "NCHW"))
    y = jax.nn.relu(y + p["conv_b"][None, :, None, None])
    y = y.reshape(T * B, -1)                                            # (N, 400)
    y = jax.nn.relu(y @ p["fc1_w"].T + p["fc1_b"])                      # (N, 256)
    y = y.reshape(T, B, FC1_DIM)

    h, c = jnp.split(hidden.astype(jnp.float32), 2, axis=1)
    H = LSTM_DIM
    outs = []
    for t in range(T):
        gates = y[t] @ p["w_ih"].T + h @ p["w_hh"].T + p["b_ih"] + p["b_hh"]
        i_g = jax.nn.sigmoid(gates[:, 0 * H:1 * H])
        f_g = jax.nn.sigmoid(gates[:, 1 * H:2 * H])
        g_g = jnp.tanh(gates[:, 2 * H:3 * H])
        o_g = jax.nn.sigmoid(gates[:, 3 * H:4 * H])
        c = f_g * c + i_g * g_g
        h = o_g * jnp.tanh(c)
        outs.append(h)
    lstm_out = jnp.stack(outs, axis=0).reshape(T * B, H)

    logits = lstm_out @ p["pi_w"].T + p["pi_b"]
    prob = jax.nn.softmax(logits, axis=1).reshape(T, B, N_ACT)
    v = (lstm_out @ p["v_w"].T + p["v_b"]).reshape(T, B, 1)
    hid = jnp.concatenate([h, c], axis=1)
    return prob, v, hid


# ---------------------------------------------------------------- main
if __name__ == "__main__":
    T, B = 8, 2                                   # seq_len, batch_size
    key = jax.random.PRNGKey(0)
    k_x, k_h, k_p = jax.random.split(key, 3)

    x = jax.random.uniform(k_x, (T, B, IMG_H, IMG_W, IMG_C),
                           minval=0.0, maxval=255.0, dtype=jnp.float32)
    hidden = jax.random.normal(k_h, (B, 2 * LSTM_DIM), jnp.float32) * 0.1

    torch_params = init_torch_style_params(k_p)
    kparams = pack_kernel_params(torch_params)

    prob, v, hid = actor_critic_pi_v(x, hidden, kparams)
    jax.block_until_ready((prob, v, hid))

    # sanity check against a pure-JAX (f32) mirror of the PyTorch forward pass;
    # bf16 matmul weights + approx softmax reciprocal stay well inside tolerance.
    prob_r, v_r, hid_r = reference_pi_v(x, hidden, torch_params)
    np.testing.assert_allclose(np.asarray(prob), np.asarray(prob_r), rtol=2e-2, atol=2e-2)
    np.testing.assert_allclose(np.asarray(v), np.asarray(v_r), rtol=2e-2, atol=2e-2)
    np.testing.assert_allclose(np.asarray(hid), np.asarray(hid_r), rtol=2e-2, atol=2e-2)

    print("KERNEL_OK")
</pallas_src>

<mosaic_0001>
module attributes {stable_mosaic.version = 11 : i64} {
  func.func @kernel(%arg0: memref<64x147xf32, #tpu.memory_space<vmem>>, %arg1: memref<147x400xbf16, #tpu.memory_space<vmem>>, %arg2: memref<1x400xf32, #tpu.memory_space<vmem>>, %arg3: memref<400x256xbf16, #tpu.memory_space<vmem>>, %arg4: memref<1x256xf32, #tpu.memory_space<vmem>>, %arg5: memref<256x512xbf16, #tpu.memory_space<vmem>>, %arg6: memref<128x512xbf16, #tpu.memory_space<vmem>>, %arg7: memref<1x512xf32, #tpu.memory_space<vmem>>, %arg8: memref<8x128xf32, #tpu.memory_space<vmem>>, %arg9: memref<8x128xf32, #tpu.memory_space<vmem>>, %arg10: memref<128x8xbf16, #tpu.memory_space<vmem>>, %arg11: memref<1x8xf32, #tpu.memory_space<vmem>>, %arg12: memref<64x8xf32, #tpu.memory_space<vmem>>, %arg13: memref<8x256xf32, #tpu.memory_space<vmem>>, %arg14: memref<64x128xbf16, #tpu.memory_space<vmem>>) attributes {dimension_semantics = [], scalar_prefetch = 0 : i64, scratch_operands = 1 : i64, tpu.core_type = #tpu.core_type<tc>} {
    %c0 = arith.constant 0 : index
    %c0_0 = arith.constant 0 : index
    %0 = vector.load %arg0[%c0, %c0_0] : memref<64x147xf32, #tpu.memory_space<vmem>>, vector<64x147xf32>
    %1 = arith.truncf %0 : vector<64x147xf32> to vector<64x147xbf16>
    %c0_1 = arith.constant 0 : index
    %c0_2 = arith.constant 0 : index
    %2 = vector.load %arg1[%c0_1, %c0_2] : memref<147x400xbf16, #tpu.memory_space<vmem>>, vector<147x400xbf16>
    %cst = arith.constant dense<0.000000e+00> : vector<64x400xf32>
    %3 = tpu.matmul %1, %2, %cst {dimension_numbers = #tpu.dot_dimension_numbers<[1], [0], [0], [1], [0, 0, 1, 1], [], []>} : vector<64x147xbf16>, vector<147x400xbf16>, vector<64x400xf32> -> vector<64x400xf32>
    %c0_3 = arith.constant 0 : index
    %c0_4 = arith.constant 0 : index
    %4 = vector.load %arg2[%c0_3, %c0_4] : memref<1x400xf32, #tpu.memory_space<vmem>>, vector<1x400xf32>
    %5 = vector.broadcast %4 : vector<1x400xf32> to vector<64x400xf32>
    %6 = arith.addf %3, %5 : vector<64x400xf32>
    %cst_5 = arith.constant 0.000000e+00 : f32
    %7 = vector.broadcast %cst_5 : f32 to vector<64x400xf32>
    %8 = arith.maximumf %6, %7 : vector<64x400xf32>
    %9 = arith.truncf %8 : vector<64x400xf32> to vector<64x400xbf16>
    %c0_6 = arith.constant 0 : index
    %c0_7 = arith.constant 0 : index
    %10 = vector.load %arg3[%c0_6, %c0_7] : memref<400x256xbf16, #tpu.memory_space<vmem>>, vector<400x256xbf16>
    %cst_8 = arith.constant dense<0.000000e+00> : vector<64x256xf32>
    %11 = tpu.matmul %9, %10, %cst_8 {dimension_numbers = #tpu.dot_dimension_numbers<[1], [0], [0], [1], [0, 0, 1, 1], [], []>} : vector<64x400xbf16>, vector<400x256xbf16>, vector<64x256xf32> -> vector<64x256xf32>
    %c0_9 = arith.constant 0 : index
    %c0_10 = arith.constant 0 : index
    %12 = vector.load %arg4[%c0_9, %c0_10] : memref<1x256xf32, #tpu.memory_space<vmem>>, vector<1x256xf32>
    %13 = vector.broadcast %12 : vector<1x256xf32> to vector<64x256xf32>
    %14 = arith.addf %11, %13 : vector<64x256xf32>
    %cst_11 = arith.constant 0.000000e+00 : f32
    %15 = vector.broadcast %cst_11 : f32 to vector<64x256xf32>
    %16 = arith.maximumf %14, %15 : vector<64x256xf32>
    %17 = arith.truncf %16 : vector<64x256xf32> to vector<64x256xbf16>
    %c0_12 = arith.constant 0 : index
    %c0_13 = arith.constant 0 : index
    %18 = vector.load %arg5[%c0_12, %c0_13] : memref<256x512xbf16, #tpu.memory_space<vmem>>, vector<256x512xbf16>
    %cst_14 = arith.constant dense<0.000000e+00> : vector<64x512xf32>
    %19 = tpu.matmul %17, %18, %cst_14 {dimension_numbers = #tpu.dot_dimension_numbers<[1], [0], [0], [1], [0, 0, 1, 1], [], []>} : vector<64x256xbf16>, vector<256x512xbf16>, vector<64x512xf32> -> vector<64x512xf32>
    %c0_15 = arith.constant 0 : index
    %c0_16 = arith.constant 0 : index
    %20 = vector.load %arg7[%c0_15, %c0_16] : memref<1x512xf32, #tpu.memory_space<vmem>>, vector<1x512xf32>
    %21 = vector.broadcast %20 : vector<1x512xf32> to vector<64x512xf32>
    %22 = arith.addf %19, %21 : vector<64x512xf32>
    %c0_17 = arith.constant 0 : index
    %c0_18 = arith.constant 0 : index
    %23 = vector.load %arg6[%c0_17, %c0_18] : memref<128x512xbf16, #tpu.memory_space<vmem>>, vector<128x512xbf16>
    %c0_19 = arith.constant 0 : index
    %c0_20 = arith.constant 0 : index
    %24 = vector.load %arg8[%c0_19, %c0_20] : memref<8x128xf32, #tpu.memory_space<vmem>>, vector<8x128xf32>
    %c0_21 = arith.constant 0 : index
    %c0_22 = arith.constant 0 : index
    %25 = vector.load %arg9[%c0_21, %c0_22] : memref<8x128xf32, #tpu.memory_space<vmem>>, vector<8x128xf32>
    %26 = vector.extract_strided_slice %22 {offsets = [0, 0], sizes = [8, 512], strides = [1, 1]} : vector<64x512xf32> to vector<8x512xf32>
    %27 = arith.truncf %24 : vector<8x128xf32> to vector<8x128xbf16>
    %cst_23 = arith.constant dense<0.000000e+00> : vector<8x512xf32>
    %28 = tpu.matmul %27, %23, %cst_23 {dimension_numbers = #tpu.dot_dimension_numbers<[1], [0], [0], [1], [0, 0, 1, 1], [], []>} : vector<8x128xbf16>, vector<128x512xbf16>, vector<8x512xf32> -> vector<8x512xf32>
    %29 = arith.addf %26, %28 : vector<8x512xf32>
    %30 = vector.extract_strided_slice %29 {offsets = [0, 0], sizes = [8, 128], strides = [1, 1]} : vector<8x512xf32> to vector<8x128xf32>
    %31 = arith.negf %30 : vector<8x128xf32>
    %32 = math.exp %31 : vector<8x128xf32>
    %cst_24 = arith.constant 1.000000e+00 : f32
    %33 = vector.broadcast %cst_24 : f32 to vector<8x128xf32>
    %34 = arith.addf %33, %32 : vector<8x128xf32>
    %35 = arith.divf %33, %34 : vector<8x128xf32>
    %36 = vector.extract_strided_slice %29 {offsets = [0, 128], sizes = [8, 128], strides = [1, 1]} : vector<8x512xf32> to vector<8x128xf32>
    %37 = arith.negf %36 : vector<8x128xf32>
    %38 = math.exp %37 : vector<8x128xf32>
    %cst_25 = arith.constant 1.000000e+00 : f32
    %39 = vector.broadcast %cst_25 : f32 to vector<8x128xf32>
    %40 = arith.addf %39, %38 : vector<8x128xf32>
    %41 = arith.divf %39, %40 : vector<8x128xf32>
    %42 = vector.extract_strided_slice %29 {offsets = [0, 256], sizes = [8, 128], strides = [1, 1]} : vector<8x512xf32> to vector<8x128xf32>
    %43 = math.tanh %42 : vector<8x128xf32>
    %44 = vector.extract_strided_slice %29 {offsets = [0, 384], sizes = [8, 128], strides = [1, 1]} : vector<8x512xf32> to vector<8x128xf32>
    %45 = arith.negf %44 : vector<8x128xf32>
    %46 = math.exp %45 : vector<8x128xf32>
    %cst_26 = arith.constant 1.000000e+00 : f32
    %47 = vector.broadcast %cst_26 : f32 to vector<8x128xf32>
    %48 = arith.addf %47, %46 : vector<8x128xf32>
    %49 = arith.divf %47, %48 : vector<8x128xf32>
    %50 = arith.mulf %41, %25 : vector<8x128xf32>
    %51 = arith.mulf %35, %43 : vector<8x128xf32>
    %52 = arith.addf %50, %51 : vector<8x128xf32>
    %53 = math.tanh %52 : vector<8x128xf32>
    %54 = arith.mulf %49, %53 : vector<8x128xf32>
    %55 = arith.truncf %54 : vector<8x128xf32> to vector<8x128xbf16>
    %c0_27 = arith.constant 0 : index
    %c0_28 = arith.constant 0 : index
    %56 = vector.load %arg14[%c0_27, %c0_28] : memref<64x128xbf16, #tpu.memory_space<vmem>>, vector<8x128xbf16>
    tpu.vector_store %arg14[%c0_27, %c0_28], %55 {strides = array<i32>} : memref<64x128xbf16, #tpu.memory_space<vmem>>, vector<8x128xbf16>,
    %57 = vector.extract_strided_slice %22 {offsets = [8, 0], sizes = [8, 512], strides = [1, 1]} : vector<64x512xf32> to vector<8x512xf32>
    %58 = arith.truncf %54 : vector<8x128xf32> to vector<8x128xbf16>
    %cst_29 = arith.constant dense<0.000000e+00> : vector<8x512xf32>
    %59 = tpu.matmul %58, %23, %cst_29 {dimension_numbers = #tpu.dot_dimension_numbers<[1], [0], [0], [1], [0, 0, 1, 1], [], []>} : vector<8x128xbf16>, vector<128x512xbf16>, vector<8x512xf32> -> vector<8x512xf32>
    %60 = arith.addf %57, %59 : vector<8x512xf32>
    %61 = vector.extract_strided_slice %60 {offsets = [0, 0], sizes = [8, 128], strides = [1, 1]} : vector<8x512xf32> to vector<8x128xf32>
    %62 = arith.negf %61 : vector<8x128xf32>
    %63 = math.exp %62 : vector<8x128xf32>
    %cst_30 = arith.constant 1.000000e+00 : f32
    %64 = vector.broadcast %cst_30 : f32 to vector<8x128xf32>
    %65 = arith.addf %64, %63 : vector<8x128xf32>
    %66 = arith.divf %64, %65 : vector<8x128xf32>
    %67 = vector.extract_strided_slice %60 {offsets = [0, 128], sizes = [8, 128], strides = [1, 1]} : vector<8x512xf32> to vector<8x128xf32>
    %68 = arith.negf %67 : vector<8x128xf32>
    %69 = math.exp %68 : vector<8x128xf32>
    %cst_31 = arith.constant 1.000000e+00 : f32
    %70 = vector.broadcast %cst_31 : f32 to vector<8x128xf32>
    %71 = arith.addf %70, %69 : vector<8x128xf32>
    %72 = arith.divf %70, %71 : vector<8x128xf32>
    %73 = vector.extract_strided_slice %60 {offsets = [0, 256], sizes = [8, 128], strides = [1, 1]} : vector<8x512xf32> to vector<8x128xf32>
    %74 = math.tanh %73 : vector<8x128xf32>
    %75 = vector.extract_strided_slice %60 {offsets = [0, 384], sizes = [8, 128], strides = [1, 1]} : vector<8x512xf32> to vector<8x128xf32>
    %76 = arith.negf %75 : vector<8x128xf32>
    %77 = math.exp %76 : vector<8x128xf32>
    %cst_32 = arith.constant 1.000000e+00 : f32
    %78 = vector.broadcast %cst_32 : f32 to vector<8x128xf32>
    %79 = arith.addf %78, %77 : vector<8x128xf32>
    %80 = arith.divf %78, %79 : vector<8x128xf32>
    %81 = arith.mulf %72, %52 : vector<8x128xf32>
    %82 = arith.mulf %66, %74 : vector<8x128xf32>
    %83 = arith.addf %81, %82 : vector<8x128xf32>
    %84 = math.tanh %83 : vector<8x128xf32>
    %85 = arith.mulf %80, %84 : vector<8x128xf32>
    %86 = arith.truncf %85 : vector<8x128xf32> to vector<8x128xbf16>
    %c8 = arith.constant 8 : index
    %c0_33 = arith.constant 0 : index
    %87 = vector.load %arg14[%c8, %c0_33] : memref<64x128xbf16, #tpu.memory_space<vmem>>, vector<8x128xbf16>
    tpu.vector_store %arg14[%c8, %c0_33], %86 {strides = array<i32>} : memref<64x128xbf16, #tpu.memory_space<vmem>>, vector<8x128xbf16>,
    %88 = vector.extract_strided_slice %22 {offsets = [16, 0], sizes = [8, 512], strides = [1, 1]} : vector<64x512xf32> to vector<8x512xf32>
    %89 = arith.truncf %85 : vector<8x128xf32> to vector<8x128xbf16>
    %cst_34 = arith.constant dense<0.000000e+00> : vector<8x512xf32>
    %90 = tpu.matmul %89, %23, %cst_34 {dimension_numbers = #tpu.dot_dimension_numbers<[1], [0], [0], [1], [0, 0, 1, 1], [], []>} : vector<8x128xbf16>, vector<128x512xbf16>, vector<8x512xf32> -> vector<8x512xf32>
    %91 = arith.addf %88, %90 : vector<8x512xf32>
    %92 = vector.extract_strided_slice %91 {offsets = [0, 0], sizes = [8, 128], strides = [1, 1]} : vector<8x512xf32> to vector<8x128xf32>
    %93 = arith.negf %92 : vector<8x128xf32>
    %94 = math.exp %93 : vector<8x128xf32>
    %cst_35 = arith.constant 1.000000e+00 : f32
    %95 = vector.broadcast %cst_35 : f32 to vector<8x128xf32>
    %96 = arith.addf %95, %94 : vector<8x128xf32>
    %97 = arith.divf %95, %96 : vector<8x128xf32>
    %98 = vector.extract_strided_slice %91 {offsets = [0, 128], sizes = [8, 128], strides = [1, 1]} : vector<8x512xf32> to vector<8x128xf32>
    %99 = arith.negf %98 : vector<8x128xf32>
    %100 = math.exp %99 : vector<8x128xf32>
    %cst_36 = arith.constant 1.000000e+00 : f32
    %101 = vector.broadcast %cst_36 : f32 to vector<8x128xf32>
    %102 = arith.addf %101, %100 : vector<8x128xf32>
    %103 = arith.divf %101, %102 : vector<8x128xf32>
    %104 = vector.extract_strided_slice %91 {offsets = [0, 256], sizes = [8, 128], strides = [1, 1]} : vector<8x512xf32> to vector<8x128xf32>
    %105 = math.tanh %104 : vector<8x128xf32>
    %106 = vector.extract_strided_slice %91 {offsets = [0, 384], sizes = [8, 128], strides = [1, 1]} : vector<8x512xf32> to vector<8x128xf32>
    %107 = arith.negf %106 : vector<8x128xf32>
    %108 = math.exp %107 : vector<8x128xf32>
    %cst_37 = arith.constant 1.000000e+00 : f32
    %109 = vector.broadcast %cst_37 : f32 to vector<8x128xf32>
    %110 = arith.addf %109, %108 : vector<8x128xf32>
    %111 = arith.divf %109, %110 : vector<8x128xf32>
    %112 = arith.mulf %103, %83 : vector<8x128xf32>
    %113 = arith.mulf %97, %105 : vector<8x128xf32>
    %114 = arith.addf %112, %113 : vector<8x128xf32>
    %115 = math.tanh %114 : vector<8x128xf32>
    %116 = arith.mulf %111, %115 : vector<8x128xf32>
    %117 = arith.truncf %116 : vector<8x128xf32> to vector<8x128xbf16>
    %c16 = arith.constant 16 : index
    %c0_38 = arith.constant 0 : index
    %118 = vector.load %arg14[%c16, %c0_38] : memref<64x128xbf16, #tpu.memory_space<vmem>>, vector<8x128xbf16>
    tpu.vector_store %arg14[%c16, %c0_38], %117 {strides = array<i32>} : memref<64x128xbf16, #tpu.memory_space<vmem>>, vector<8x128xbf16>,
    %119 = vector.extract_strided_slice %22 {offsets = [24, 0], sizes = [8, 512], strides = [1, 1]} : vector<64x512xf32> to vector<8x512xf32>
    %120 = arith.truncf %116 : vector<8x128xf32> to vector<8x128xbf16>
    %cst_39 = arith.constant dense<0.000000e+00> : vector<8x512xf32>
    %121 = tpu.matmul %120, %23, %cst_39 {dimension_numbers = #tpu.dot_dimension_numbers<[1], [0], [0], [1], [0, 0, 1, 1], [], []>} : vector<8x128xbf16>, vector<128x512xbf16>, vector<8x512xf32> -> vector<8x512xf32>
    %122 = arith.addf %119, %121 : vector<8x512xf32>
    %123 = vector.extract_strided_slice %122 {offsets = [0, 0], sizes = [8, 128], strides = [1, 1]} : vector<8x512xf32> to vector<8x128xf32>
    %124 = arith.negf %123 : vector<8x128xf32>
    %125 = math.exp %124 : vector<8x128xf32>
    %cst_40 = arith.constant 1.000000e+00 : f32
    %126 = vector.broadcast %cst_40 : f32 to vector<8x128xf32>
    %127 = arith.addf %126, %125 : vector<8x128xf32>
    %128 = arith.divf %126, %127 : vector<8x128xf32>
    %129 = vector.extract_strided_slice %122 {offsets = [0, 128], sizes = [8, 128], strides = [1, 1]} : vector<8x512xf32> to vector<8x128xf32>
    %130 = arith.negf %129 : vector<8x128xf32>
    %131 = math.exp %130 : vector<8x128xf32>
    %cst_41 = arith.constant 1.000000e+00 : f32
    %132 = vector.broadcast %cst_41 : f32 to vector<8x128xf32>
    %133 = arith.addf %132, %131 : vector<8x128xf32>
    %134 = arith.divf %132, %133 : vector<8x128xf32>
    %135 = vector.extract_strided_slice %122 {offsets = [0, 256], sizes = [8, 128], strides = [1, 1]} : vector<8x512xf32> to vector<8x128xf32>
    %136 = math.tanh %135 : vector<8x128xf32>
    %137 = vector.extract_strided_slice %122 {offsets = [0, 384], sizes = [8, 128], strides = [1, 1]} : vector<8x512xf32> to vector<8x128xf32>
    %138 = arith.negf %137 : vector<8x128xf32>
    %139 = math.exp %138 : vector<8x128xf32>
    %cst_42 = arith.constant 1.000000e+00 : f32
    %140 = vector.broadcast %cst_42 : f32 to vector<8x128xf32>
    %141 = arith.addf %140, %139 : vector<8x128xf32>
    %142 = arith.divf %140, %141 : vector<8x128xf32>
    %143 = arith.mulf %134, %114 : vector<8x128xf32>
    %144 = arith.mulf %128, %136 : vector<8x128xf32>
    %145 = arith.addf %143, %144 : vector<8x128xf32>
    %146 = math.tanh %145 : vector<8x128xf32>
    %147 = arith.mulf %142, %146 : vector<8x128xf32>
    %148 = arith.truncf %147 : vector<8x128xf32> to vector<8x128xbf16>
    %c24 = arith.constant 24 : index
    %c0_43 = arith.constant 0 : index
    %149 = vector.load %arg14[%c24, %c0_43] : memref<64x128xbf16, #tpu.memory_space<vmem>>, vector<8x128xbf16>
    tpu.vector_store %arg14[%c24, %c0_43], %148 {strides = array<i32>} : memref<64x128xbf16, #tpu.memory_space<vmem>>, vector<8x128xbf16>,
    %150 = vector.extract_strided_slice %22 {offsets = [32, 0], sizes = [8, 512], strides = [1, 1]} : vector<64x512xf32> to vector<8x512xf32>
    %151 = arith.truncf %147 : vector<8x128xf32> to vector<8x128xbf16>
    %cst_44 = arith.constant dense<0.000000e+00> : vector<8x512xf32>
    %152 = tpu.matmul %151, %23, %cst_44 {dimension_numbers = #tpu.dot_dimension_numbers<[1], [0], [0], [1], [0, 0, 1, 1], [], []>} : vector<8x128xbf16>, vector<128x512xbf16>, vector<8x512xf32> -> vector<8x512xf32>
    %153 = arith.addf %150, %152 : vector<8x512xf32>
    %154 = vector.extract_strided_slice %153 {offsets = [0, 0], sizes = [8, 128], strides = [1, 1]} : vector<8x512xf32> to vector<8x128xf32>
    %155 = arith.negf %154 : vector<8x128xf32>
    %156 = math.exp %155 : vector<8x128xf32>
    %cst_45 = arith.constant 1.000000e+00 : f32
    %157 = vector.broadcast %cst_45 : f32 to vector<8x128xf32>
    %158 = arith.addf %157, %156 : vector<8x128xf32>
    %159 = arith.divf %157, %158 : vector<8x128xf32>
    %160 = vector.extract_strided_slice %153 {offsets = [0, 128], sizes = [8, 128], strides = [1, 1]} : vector<8x512xf32> to vector<8x128xf32>
    %161 = arith.negf %160 : vector<8x128xf32>
    %162 = math.exp %161 : vector<8x128xf32>
    %cst_46 = arith.constant 1.000000e+00 : f32
    %163 = vector.broadcast %cst_46 : f32 to vector<8x128xf32>
    %164 = arith.addf %163, %162 : vector<8x128xf32>
    %165 = arith.divf %163, %164 : vector<8x128xf32>
    %166 = vector.extract_strided_slice %153 {offsets = [0, 256], sizes = [8, 128], strides = [1, 1]} : vector<8x512xf32> to vector<8x128xf32>
    %167 = math.tanh %166 : vector<8x128xf32>
    %168 = vector.extract_strided_slice %153 {offsets = [0, 384], sizes = [8, 128], strides = [1, 1]} : vector<8x512xf32> to vector<8x128xf32>
    %169 = arith.negf %168 : vector<8x128xf32>
    %170 = math.exp %169 : vector<8x128xf32>
    %cst_47 = arith.constant 1.000000e+00 : f32
    %171 = vector.broadcast %cst_47 : f32 to vector<8x128xf32>
    %172 = arith.addf %171, %170 : vector<8x128xf32>
    %173 = arith.divf %171, %172 : vector<8x128xf32>
    %174 = arith.mulf %165, %145 : vector<8x128xf32>
    %175 = arith.mulf %159, %167 : vector<8x128xf32>
    %176 = arith.addf %174, %175 : vector<8x128xf32>
    %177 = math.tanh %176 : vector<8x128xf32>
    %178 = arith.mulf %173, %177 : vector<8x128xf32>
    %179 = arith.truncf %178 : vector<8x128xf32> to vector<8x128xbf16>
    %c32 = arith.constant 32 : index
    %c0_48 = arith.constant 0 : index
    %180 = vector.load %arg14[%c32, %c0_48] : memref<64x128xbf16, #tpu.memory_space<vmem>>, vector<8x128xbf16>
    tpu.vector_store %arg14[%c32, %c0_48], %179 {strides = array<i32>} : memref<64x128xbf16, #tpu.memory_space<vmem>>, vector<8x128xbf16>,
    %181 = vector.extract_strided_slice %22 {offsets = [40, 0], sizes = [8, 512], strides = [1, 1]} : vector<64x512xf32> to vector<8x512xf32>
    %182 = arith.truncf %178 : vector<8x128xf32> to vector<8x128xbf16>
    %cst_49 = arith.constant dense<0.000000e+00> : vector<8x512xf32>
    %183 = tpu.matmul %182, %23, %cst_49 {dimension_numbers = #tpu.dot_dimension_numbers<[1], [0], [0], [1], [0, 0, 1, 1], [], []>} : vector<8x128xbf16>, vector<128x512xbf16>, vector<8x512xf32> -> vector<8x512xf32>
    %184 = arith.addf %181, %183 : vector<8x512xf32>
    %185 = vector.extract_strided_slice %184 {offsets = [0, 0], sizes = [8, 128], strides = [1, 1]} : vector<8x512xf32> to vector<8x128xf32>
    %186 = arith.negf %185 : vector<8x128xf32>
    %187 = math.exp %186 : vector<8x128xf32>
    %cst_50 = arith.constant 1.000000e+00 : f32
    %188 = vector.broadcast %cst_50 : f32 to vector<8x128xf32>
    %189 = arith.addf %188, %187 : vector<8x128xf32>
    %190 = arith.divf %188, %189 : vector<8x128xf32>
    %191 = vector.extract_strided_slice %184 {offsets = [0, 128], sizes = [8, 128], strides = [1, 1]} : vector<8x512xf32> to vector<8x128xf32>
    %192 = arith.negf %191 : vector<8x128xf32>
    %193 = math.exp %192 : vector<8x128xf32>
    %cst_51 = arith.constant 1.000000e+00 : f32
    %194 = vector.broadcast %cst_51 : f32 to vector<8x128xf32>
    %195 = arith.addf %194, %193 : vector<8x128xf32>
    %196 = arith.divf %194, %195 : vector<8x128xf32>
    %197 = vector.extract_strided_slice %184 {offsets = [0, 256], sizes = [8, 128], strides = [1, 1]} : vector<8x512xf32> to vector<8x128xf32>
    %198 = math.tanh %197 : vector<8x128xf32>
    %199 = vector.extract_strided_slice %184 {offsets = [0, 384], sizes = [8, 128], strides = [1, 1]} : vector<8x512xf32> to vector<8x128xf32>
    %200 = arith.negf %199 : vector<8x128xf32>
    %201 = math.exp %200 : vector<8x128xf32>
    %cst_52 = arith.constant 1.000000e+00 : f32
    %202 = vector.broadcast %cst_52 : f32 to vector<8x128xf32>
    %203 = arith.addf %202, %201 : vector<8x128xf32>
    %204 = arith.divf %202, %203 : vector<8x128xf32>
    %205 = arith.mulf %196, %176 : vector<8x128xf32>
    %206 = arith.mulf %190, %198 : vector<8x128xf32>
    %207 = arith.addf %205, %206 : vector<8x128xf32>
    %208 = math.tanh %207 : vector<8x128xf32>
    %209 = arith.mulf %204, %208 : vector<8x128xf32>
    %210 = arith.truncf %209 : vector<8x128xf32> to vector<8x128xbf16>
    %c40 = arith.constant 40 : index
    %c0_53 = arith.constant 0 : index
    %211 = vector.load %arg14[%c40, %c0_53] : memref<64x128xbf16, #tpu.memory_space<vmem>>, vector<8x128xbf16>
    tpu.vector_store %arg14[%c40, %c0_53], %210 {strides = array<i32>} : memref<64x128xbf16, #tpu.memory_space<vmem>>, vector<8x128xbf16>,
    %212 = vector.extract_strided_slice %22 {offsets = [48, 0], sizes = [8, 512], strides = [1, 1]} : vector<64x512xf32> to vector<8x512xf32>
    %213 = arith.truncf %209 : vector<8x128xf32> to vector<8x128xbf16>
    %cst_54 = arith.constant dense<0.000000e+00> : vector<8x512xf32>
    %214 = tpu.matmul %213, %23, %cst_54 {dimension_numbers = #tpu.dot_dimension_numbers<[1], [0], [0], [1], [0, 0, 1, 1], [], []>} : vector<8x128xbf16>, vector<128x512xbf16>, vector<8x512xf32> -> vector<8x512xf32>
    %215 = arith.addf %212, %214 : vector<8x512xf32>
    %216 = vector.extract_strided_slice %215 {offsets = [0, 0], sizes = [8, 128], strides = [1, 1]} : vector<8x512xf32> to vector<8x128xf32>
    %217 = arith.negf %216 : vector<8x128xf32>
    %218 = math.exp %217 : vector<8x128xf32>
    %cst_55 = arith.constant 1.000000e+00 : f32
    %219 = vector.broadcast %cst_55 : f32 to vector<8x128xf32>
    %220 = arith.addf %219, %218 : vector<8x128xf32>
    %221 = arith.divf %219, %220 : vector<8x128xf32>
    %222 = vector.extract_strided_slice %215 {offsets = [0, 128], sizes = [8, 128], strides = [1, 1]} : vector<8x512xf32> to vector<8x128xf32>
    %223 = arith.negf %222 : vector<8x128xf32>
    %224 = math.exp %223 : vector<8x128xf32>
    %cst_56 = arith.constant 1.000000e+00 : f32
    %225 = vector.broadcast %cst_56 : f32 to vector<8x128xf32>
    %226 = arith.addf %225, %224 : vector<8x128xf32>
    %227 = arith.divf %225, %226 : vector<8x128xf32>
    %228 = vector.extract_strided_slice %215 {offsets = [0, 256], sizes = [8, 128], strides = [1, 1]} : vector<8x512xf32> to vector<8x128xf32>
    %229 = math.tanh %228 : vector<8x128xf32>
    %230 = vector.extract_strided_slice %215 {offsets = [0, 384], sizes = [8, 128], strides = [1, 1]} : vector<8x512xf32> to vector<8x128xf32>
    %231 = arith.negf %230 : vector<8x128xf32>
    %232 = math.exp %231 : vector<8x128xf32>
    %cst_57 = arith.constant 1.000000e+00 : f32
    %233 = vector.broadcast %cst_57 : f32 to vector<8x128xf32>
    %234 = arith.addf %233, %232 : vector<8x128xf32>
    %235 = arith.divf %233, %234 : vector<8x128xf32>
    %236 = arith.mulf %227, %207 : vector<8x128xf32>
    %237 = arith.mulf %221, %229 : vector<8x128xf32>
    %238 = arith.addf %236, %237 : vector<8x128xf32>
    %239 = math.tanh %238 : vector<8x128xf32>
    %240 = arith.mulf %235, %239 : vector<8x128xf32>
    %241 = arith.truncf %240 : vector<8x128xf32> to vector<8x128xbf16>
    %c48 = arith.constant 48 : index
    %c0_58 = arith.constant 0 : index
    %242 = vector.load %arg14[%c48, %c0_58] : memref<64x128xbf16, #tpu.memory_space<vmem>>, vector<8x128xbf16>
    tpu.vector_store %arg14[%c48, %c0_58], %241 {strides = array<i32>} : memref<64x128xbf16, #tpu.memory_space<vmem>>, vector<8x128xbf16>,
    %243 = vector.extract_strided_slice %22 {offsets = [56, 0], sizes = [8, 512], strides = [1, 1]} : vector<64x512xf32> to vector<8x512xf32>
    %244 = arith.truncf %240 : vector<8x128xf32> to vector<8x128xbf16>
    %cst_59 = arith.constant dense<0.000000e+00> : vector<8x512xf32>
    %245 = tpu.matmul %244, %23, %cst_59 {dimension_numbers = #tpu.dot_dimension_numbers<[1], [0], [0], [1], [0, 0, 1, 1], [], []>} : vector<8x128xbf16>, vector<128x512xbf16>, vector<8x512xf32> -> vector<8x512xf32>
    %246 = arith.addf %243, %245 : vector<8x512xf32>
    %247 = vector.extract_strided_slice %246 {offsets = [0, 0], sizes = [8, 128], strides = [1, 1]} : vector<8x512xf32> to vector<8x128xf32>
    %248 = arith.negf %247 : vector<8x128xf32>
    %249 = math.exp %248 : vector<8x128xf32>
    %cst_60 = arith.constant 1.000000e+00 : f32
    %250 = vector.broadcast %cst_60 : f32 to vector<8x128xf32>
    %251 = arith.addf %250, %249 : vector<8x128xf32>
    %252 = arith.divf %250, %251 : vector<8x128xf32>
    %253 = vector.extract_strided_slice %246 {offsets = [0, 128], sizes = [8, 128], strides = [1, 1]} : vector<8x512xf32> to vector<8x128xf32>
    %254 = arith.negf %253 : vector<8x128xf32>
    %255 = math.exp %254 : vector<8x128xf32>
    %cst_61 = arith.constant 1.000000e+00 : f32
    %256 = vector.broadcast %cst_61 : f32 to vector<8x128xf32>
    %257 = arith.addf %256, %255 : vector<8x128xf32>
    %258 = arith.divf %256, %257 : vector<8x128xf32>
    %259 = vector.extract_strided_slice %246 {offsets = [0, 256], sizes = [8, 128], strides = [1, 1]} : vector<8x512xf32> to vector<8x128xf32>
    %260 = math.tanh %259 : vector<8x128xf32>
    %261 = vector.extract_strided_slice %246 {offsets = [0, 384], sizes = [8, 128], strides = [1, 1]} : vector<8x512xf32> to vector<8x128xf32>
    %262 = arith.negf %261 : vector<8x128xf32>
    %263 = math.exp %262 : vector<8x128xf32>
    %cst_62 = arith.constant 1.000000e+00 : f32
    %264 = vector.broadcast %cst_62 : f32 to vector<8x128xf32>
    %265 = arith.addf %264, %263 : vector<8x128xf32>
    %266 = arith.divf %264, %265 : vector<8x128xf32>
    %267 = arith.mulf %258, %238 : vector<8x128xf32>
    %268 = arith.mulf %252, %260 : vector<8x128xf32>
    %269 = arith.addf %267, %268 : vector<8x128xf32>
    %270 = math.tanh %269 : vector<8x128xf32>
    %271 = arith.mulf %266, %270 : vector<8x128xf32>
    %272 = arith.truncf %271 : vector<8x128xf32> to vector<8x128xbf16>
    %c56 = arith.constant 56 : index
    %c0_63 = arith.constant 0 : index
    %273 = vector.load %arg14[%c56, %c0_63] : memref<64x128xbf16, #tpu.memory_space<vmem>>, vector<8x128xbf16>
    tpu.vector_store %arg14[%c56, %c0_63], %272 {strides = array<i32>} : memref<64x128xbf16, #tpu.memory_space<vmem>>, vector<8x128xbf16>,
    %c0_64 = arith.constant 0 : index
    %c0_65 = arith.constant 0 : index
    %274 = vector.load %arg14[%c0_64, %c0_65] : memref<64x128xbf16, #tpu.memory_space<vmem>>, vector<64x128xbf16>
    %c0_66 = arith.constant 0 : index
    %c0_67 = arith.constant 0 : index
    %275 = vector.load %arg10[%c0_66, %c0_67] : memref<128x8xbf16, #tpu.memory_space<vmem>>, vector<128x8xbf16>
    %cst_68 = arith.constant dense<0.000000e+00> : vector<64x8xf32>
    %276 = tpu.matmul %274, %275, %cst_68 {dimension_numbers = #tpu.dot_dimension_numbers<[1], [0], [0], [1], [0, 0, 1, 1], [], []>} : vector<64x128xbf16>, vector<128x8xbf16>, vector<64x8xf32> -> vector<64x8xf32>
    %c0_69 = arith.constant 0 : index
    %c0_70 = arith.constant 0 : index
    %277 = vector.load %arg11[%c0_69, %c0_70] : memref<1x8xf32, #tpu.memory_space<vmem>>, vector<1x8xf32>
    %278 = vector.broadcast %277 : vector<1x8xf32> to vector<64x8xf32>
    %279 = arith.addf %276, %278 : vector<64x8xf32>
    %280 = tpu.iota {dimensions = array<i32: 1>} : vector<64x8xi32>
    %c7_i32 = arith.constant 7 : i32
    %281 = vector.broadcast %c7_i32 : i32 to vector<64x8xi32>
    %282 = arith.cmpi slt, %280, %281 : vector<64x8xi32>
    %cst_71 = arith.constant -1.000000e+30 : f32
    %283 = vector.broadcast %cst_71 : f32 to vector<64x8xf32>
    %284 = arith.select %282, %279, %283 : vector<64x8xi1>, vector<64x8xf32>
    %cst_72 = arith.constant dense<0xFF800000> : vector<64xf32>
    %285 = vector.multi_reduction <maximumf>, %284, %cst_72 [1] : vector<64x8xf32> to vector<64xf32>
    %286 = vector.shape_cast %285 : vector<64xf32> to vector<64x1xf32>
    %287 = vector.broadcast %286 : vector<64x1xf32> to vector<64x8xf32>
    %288 = arith.subf %279, %287 : vector<64x8xf32>
    %289 = math.exp %288 : vector<64x8xf32>
    %cst_73 = arith.constant 0.000000e+00 : f32
    %290 = vector.broadcast %cst_73 : f32 to vector<64x8xf32>
    %291 = arith.select %282, %289, %290 : vector<64x8xi1>, vector<64x8xf32>
    %cst_74 = arith.constant dense<0.000000e+00> : vector<64xf32>
    %292 = vector.multi_reduction <add>, %291, %cst_74 [1] : vector<64x8xf32> to vector<64xf32>
    %293 = vector.shape_cast %292 : vector<64xf32> to vector<64x1xf32>
    %294 = tpu.reciprocal %293 {approx = true} : vector<64x1xf32> -> vector<64x1xf32>
    %295 = vector.broadcast %294 : vector<64x1xf32> to vector<64x8xf32>
    %296 = arith.mulf %291, %295 : vector<64x8xf32>
    %297 = arith.select %282, %296, %279 : vector<64x8xi1>, vector<64x8xf32>
    %c0_75 = arith.constant 0 : index
    %c0_76 = arith.constant 0 : index
    %298 = vector.load %arg12[%c0_75, %c0_76] : memref<64x8xf32, #tpu.memory_space<vmem>>, vector<64x8xf32>
    tpu.vector_store %arg12[%c0_75, %c0_76], %297 {strides = array<i32>} : memref<64x8xf32, #tpu.memory_space<vmem>>, vector<64x8xf32>,
    %299 = tpu.concatenate %271, %269 in 1 : vector<8x128xf32>, vector<8x128xf32> -> vector<8x256xf32>
    %c0_77 = arith.constant 0 : index
    %c0_78 = arith.constant 0 : index
    %300 = vector.load %arg13[%c0_77, %c0_78] : memref<8x256xf32, #tpu.memory_space<vmem>>, vector<8x256xf32>
    tpu.vector_store %arg13[%c0_77, %c0_78], %299 {strides = array<i32>} : memref<8x256xf32, #tpu.memory_space<vmem>>, vector<8x256xf32>,
    return
  }
}

</mosaic_0001>

<bundles_post_ra>
// kernel: tpu_custom_call.1
= control target key start
LH: loop header
LB: loop body
LE: loop exit
PB: predicated region body
PF: predicated region fallthrough
CT: control target
= control target key end

     0   :  { %19 = vsyncpa [#allocation4], 0  ;;  %s5873_s0 = inlined_call_operand.hbm [shape: f32[64,147], index: 0, kind: input, shape index: {}]   ;;  %s5874_s1 = inlined_call_operand.hbm [shape: bf16[147,400], index: 1, kind: input, shape index: {}]   ;;  %s5875_s2 = inlined_call_operand.vmem [shape: f32[1,400], index: 2, kind: input, shape index: {}]   ;;  %s5876_s3 = inlined_call_operand.hbm [shape: bf16[400,256], index: 3, kind: input, shape index: {}]   ;;  %s5877_s4 = inlined_call_operand.vmem [shape: f32[1,256], index: 4, kind: input, shape index: {}]   ;;  %s5878_s5 = inlined_call_operand.hbm [shape: bf16[256,512], index: 5, kind: input, shape index: {}]   ;;  %s5879_s6 = inlined_call_operand.hbm [shape: bf16[128,512], index: 6, kind: input, shape index: {}]   ;;  %s5880_s7 = inlined_call_operand.vmem [shape: f32[1,512], index: 7, kind: input, shape index: {}]   ;;  %s5881_s8 = inlined_call_operand.vmem [shape: f32[8,128], index: 8, kind: input, shape index: {}]   ;;  %s5882_s9 = inlined_call_operand.vmem [shape: f32[8,128], index: 9, kind: input, shape index: {}]   ;;  %s5883_s10 = inlined_call_operand.vmem [shape: bf16[128,8], index: 10, kind: input, shape index: {}]   ;;  %s5884_s11 = inlined_call_operand.vmem [shape: f32[1,8], index: 11, kind: input, shape index: {}]   ;;  %s5885_s12 = inlined_call_operand.vmem [shape: f32[64,8], index: 12, kind: output, shape index: {0}]   ;;  %s5886_s13 = inlined_call_operand.hbm [shape: f32[8,256], index: 13, kind: output, shape index: {1}]  }
   0x1   :  { %20 = vsyncpa [#allocation7], 0 }
   0x2   :  { %21 = vsyncpa [#allocation10], 0 }
   0x3   :  { %22 = vsyncpa [#allocation5], 0  ;;  %s40_s27 = sshll.u32 %s5874_s1, 4  ;;  %s4680_s28 = smov [#allocation6]   ;;  %s41_s27 = int_to_ptr.hbm [resolvable:$true] %s40_s27 }
   0x4   :  { %s42_s29 = sshll.u32 %s4680_s28, 4  ;;  %s70_s15 = sshll.u32 %s5878_s5, 4  ;;  %s43_s29 = int_to_ptr.vmem [resolvable:$true] %s42_s29  ;;  %s71_s15 = int_to_ptr.hbm [resolvable:$true] %s70_s15 }
   0x5   :  { %s4681_s16 = smov 256   ;;  %s4682_s17 = smov 16  }
   0x6   :  { %48 = dma.hbm_to_vmem [thread:$0]  %s41_s27, 4864, %s43_s29, [#allocation7], %s4681_s16, %s4681_s16, %s4682_s17  }
   0x7   :  { %s4683_s18 = smov [#allocation9]   ;;  %s27_s1 = sshll.u32 %s5873_s0, 4  ;;  %s28_s1 = int_to_ptr.hbm [resolvable:$true] %s27_s1 }
   0x8   :  { %s72_s19 = sshll.u32 %s4683_s18, 4  ;;  %s55_s23 = sshll.u32 %s5876_s3, 4  ;;  %s73_s19 = int_to_ptr.vmem [resolvable:$true] %s72_s19  ;;  %s56_s23 = int_to_ptr.hbm [resolvable:$true] %s55_s23 }
   0x9   :  { %78 = dma.hbm_to_vmem [thread:$0]  %s71_s15, 8192, %s73_s19, [#allocation10], %s4681_s16, %s4681_s16, %s4682_s17  }
   0xa   :  { %s4684_s24 = smov [#allocation3]   ;;  %s4685_s26 = smov [#allocation8]  }
   0xb   :  { %s29_s25 = sshll.u32 %s4684_s24, 4  ;;  %s57_s0 = sshll.u32 %s4685_s26, 4  ;;  %s30_s25 = int_to_ptr.vmem [resolvable:$true] %s29_s25  ;;  %s58_s0 = int_to_ptr.vmem [resolvable:$true] %s57_s0 }
   0xc   :  { %35 = dma.hbm_to_vmem [thread:$0]  %s28_s1, 2048, %s30_s25, [#allocation4], %s4681_s16, %s4681_s16, %s4682_s17  }
   0xd   :  { %s4686_s27 = smov 128   ;;  %s4687_s28 = smov 8  }
   0xe   :  { %63 = dma.hbm_to_vmem [thread:$0]  %s56_s23, 6400, %s58_s0, [#allocation7], %s4686_s27, %s4686_s27, %s4687_s28  }
   0xf   :  { %s83_s14 = sshll.u32 %s5879_s6, 4  ;;  %s4688_s3 = smov [#allocation11]   ;;  %s84_s14 = int_to_ptr.hbm [resolvable:$true] %s83_s14 }
  0x10   :  { %s85_s15 = sshll.u32 %s4688_s3, 4  ;;  %s86_s15 = int_to_ptr.vmem [resolvable:$true] %s85_s15 }
  0x11   :  { %91 = dma.hbm_to_vmem [thread:$0]  %s84_s14, 4096, %s86_s15, [#allocation10], %s4681_s16, %s4681_s16, %s4682_s17  }
  0x12   :  { %4672 = dma.done.wait [#allocation4], 2048  }
  0x13   :  { %4673 = vsyncadd [#allocation4], 4294965248 }
  0x14   :  { %4674 = dma.done.wait [#allocation7], 11264  }
  0x15   :  { %4675 = vsyncadd [#allocation7], 4294956032 }
  0x16   :  { %4676 = dma.done.wait [#allocation10], 12288  }
  0x17   :  { %4677 = vsyncadd [#allocation10], 4294955008  ;;  %vm398_vm0 = vcmask 1040384   ;;  %vm399_vm1 = vcmask 1041408   ;;  %v4689_v0 = vmov 65535   ;;  %v132_v29 = vld [vmem:[#allocation3 + $0x48] sm:$0xff] }
  0x18   :  { %v400_v1 = vsel %vm398_vm0, 4294967295, %v4689_v0  ;;  %v3450_v2 = vld [vmem:[#allocation6 + $0xe0] sm:$0xf]  ;;  %v4190_v3 = vld [vmem:[#allocation6 + $0xec] sm:$0xf0]  ;;  %v134_v33 = vld [vmem:[#allocation3 + $0x58] sm:$0xff] }
  0x19   :  { %v4188_v4 = vld [vmem:[#allocation6 + $0xe4] sm:$0xf]  ;;  %v3451_v5 = vor.u32 %v4190_v3, %v3450_v2  ;;  %v3452_v6 = vld [vmem:[#allocation6 + $0xf0] sm:$0xf0]  ;;  %v3434_v7 = vld [vmem:[#allocation6 + $0xc0] sm:$0xf]  ;;  %v4793_v39 = vpack.c.bf16 %v134_v33, %v132_v29 }
  0x1a   :  { %v4186_v8 = vld [vmem:[#allocation6 + $0xcc] sm:$0xf0]  ;;  %v3455_v9 = vor.u32 %v4188_v4, %v3452_v6  ;;  %v183_v10 = vld [vmem:[#allocation6 + $0x120] sm:$0x33]  ;;  %v3436_v12 = vld [vmem:[#allocation6 + $0xd0] sm:$0xf0] }
  0x1b   :  { %v4184_v11 = vld [vmem:[#allocation6 + $0xc4] sm:$0xf]  ;;  %414 = vmatpush.bf16.msra.mxu0 %v3451_v5  ;;  %v3435_v13 = vor.u32 %v4186_v8, %v3434_v7  ;;  %v305_v14 = vunpack.c.l.b16 %v183_v10  ;;  %v306_v15 = vunpack.c.h.b16 %v183_v10  ;;  %v4789_v16 = vsel %vm399_vm1, %v400_v1, 0  ;;  %v3418_v18 = vld [vmem:[#allocation6 + $0xa0] sm:$0xf]  ;;  %v124_v47 = vld [vmem:[#allocation3 + $0x8] sm:$0xff] }
  0x1c   :  { %472 = vmatpush.bf16.msra.mxu2 %v3455_v9  ;;  %v3439_v17 = vor.u32 %v4184_v11, %v3436_v12  ;;  %v4182_v19 = vld [vmem:[#allocation6 + $0xac] sm:$0xf0]  ;;  %v4180_v21 = vld [vmem:[#allocation6 + $0xa4] sm:$0xf]  ;;  %v3420_v22 = vld [vmem:[#allocation6 + $0xb0] sm:$0xf0] }
  0x1d   :  { %v345_v20 = vpack.c.b16 %v305_v14, %v305_v14  ;;  %v3466_v23 = vld [vmem:[#allocation6 + $0x100] sm:$0xf]  ;;  %v4194_v24 = vld [vmem:[#allocation6 + $0x10c] sm:$0xf0]  ;;  %v346_v25 = vpack.c.b16 %v306_v15, %v306_v15  ;;  %v3419_v27 = vor.u32 %v4182_v19, %v3418_v18  ;;  %v3423_v28 = vor.u32 %v4180_v21, %v3420_v22  ;;  %v4176_v34 = vld [vmem:[#allocation6 + $0x84] sm:$0xf] }
  0x1e   :  { %v3402_v30 = vld [vmem:[#allocation6 + $0x80] sm:$0xf]  ;;  %v4178_v31 = vld [vmem:[#allocation6 + $0x8c] sm:$0xf0]  ;;  %v3467_v32 = vor.u32 %v4194_v24, %v3466_v23  ;;  %v3404_v35 = vld [vmem:[#allocation6 + $0x90] sm:$0xf0] }
  0x1f   :  { %415 = vmatpush.bf16.msra.mxu0 %v3435_v13  ;;  %v403_v26 = vand.u32 %v4789_v16, %v345_v20  ;;  %v406_v36 = vand.u32 %v4789_v16, %v346_v25  ;;  %v3403_v37 = vor.u32 %v4178_v31, %v3402_v30  ;;  %v4192_v38 = vld [vmem:[#allocation6 + $0x104] sm:$0xf]  ;;  %v3407_v40 = vor.u32 %v4176_v34, %v3404_v35  ;;  %v3386_v41 = vld [vmem:[#allocation6 + $0x60] sm:$0xf]  ;;  %v4174_v42 = vld [vmem:[#allocation6 + $0x6c] sm:$0xf0] }
  0x20   :  { %473 = vmatpush.bf16.msra.mxu2 %v3439_v17  ;;  %v3468_v43 = vld [vmem:[#allocation6 + $0x110] sm:$0xf0]  ;;  %vm385_vm2 = vcmask 154624   ;;  %v4172_v44 = vld [vmem:[#allocation6 + $0x64] sm:$0xf]  ;;  %v126_v48 = vld [vmem:[#allocation3 + $0x18] sm:$0xff]  ;;  %v3387_v49 = vor.u32 %v4174_v42, %v3386_v41 }
  0x21   :  { %4354 = vmatpush.bf16.msra.mxu3 %v403_v26  ;;  %449 = vmatpush.bf16.msra.mxu1 %v403_v26  ;;  %v3388_v45 = vld [vmem:[#allocation6 + $0x70] sm:$0xf0]  ;;  %v3471_v46 = vor.u32 %v4192_v38, %v3468_v43  ;;  %v4795_v50 = vpack.c.bf16 %v126_v48, %v124_v47  ;;  %v184_v51 = vld [vmem:[#allocation6 + $0x128] sm:$0x33]  ;;  %v3370_v53 = vld [vmem:[#allocation6 + $0x40] sm:$0xf] }
  0x22   :  { %v3391_v52 = vor.u32 %v4172_v44, %v3388_v45  ;;  %v4170_v54 = vld [vmem:[#allocation6 + $0x4c] sm:$0xf0]  ;;  %v307_v55 = vunpack.c.l.b16 %v184_v51  ;;  %v4168_v56 = vld [vmem:[#allocation6 + $0x44] sm:$0xf]  ;;  %v3372_v57 = vld [vmem:[#allocation6 + $0x50] sm:$0xf0]  ;;  %v308_v2 = vunpack.c.h.b16 %v184_v51 }
  0x23   :  { %416 = vmatpush.bf16.msra.mxu0 %v3419_v27  ;;  %v3371_v59 = vor.u32 %v4170_v54, %v3370_v53  ;;  %v3375_v60 = vor.u32 %v4168_v56, %v3372_v57  ;;  %v3354_v61 = vld [vmem:[#allocation6 + $0x20] sm:$0xf]  ;;  %v4166_v62 = vld [vmem:[#allocation6 + $0x2c] sm:$0xf0]  ;;  %v4164_v0 = vld [vmem:[#allocation6 + $0x24] sm:$0xf] }
  0x24   :  { %474 = vmatpush.bf16.msra.mxu2 %v3423_v28  ;;  %v347_v58 = vpack.c.b16 %v307_v55, %v307_v55  ;;  %v3356_v1 = vld [vmem:[#allocation6 + $0x30] sm:$0xf0]  ;;  %v3355_v3 = vor.u32 %v4166_v62, %v3354_v61  ;;  %v136_v5 = vld [vmem:[#allocation3 + $0x68] sm:$0xff]  ;;  %v3338_v6 = vld [vmem:[#allocation6] sm:$0xf]  ;;  %v348_v11 = vpack.c.b16 %v308_v2, %v308_v2  ;;  %vm1000_vm3 = vcmask 130048  }
  0x25   :  { %4355 = vmatpush.bf16.msra.mxu3 %v3467_v32  ;;  %450 = vmatpush.bf16.msra.mxu1 %v3467_v32  ;;  %v3359_v4 = vor.u32 %v4164_v0, %v3356_v1  ;;  %v4162_v7 = vld [vmem:[#allocation6 + $0xc] sm:$0xf0]  ;;  %v138_v8 = vld [vmem:[#allocation3 + $0x78] sm:$0xff]  ;;  %v4160_v9 = vld [vmem:[#allocation6 + $0x4] sm:$0xf]  ;;  %s3322_s19 = sshll.u32 %s5886_s13, 4  ;;  %s3323_s19 = int_to_ptr.hbm [resolvable:$true] %s3322_s19 }
  0x26   :  { %v409_v63 = vand.u32 %v4789_v16, %v347_v58  ;;  %v3340_v10 = vld [vmem:[#allocation6 + $0x10] sm:$0xf0]  ;;  %v123_v12 = vld [vmem:[#allocation3] sm:$0xff]  ;;  %v4189_v13 = vld [vmem:[#allocation6 + $0xec] sm:$0xf]  ;;  %v3339_v15 = vor.u32 %v4162_v7, %v3338_v6  ;;  %v4802_v20 = vpack.c.bf16 %v138_v8, %v136_v5  ;;  %v412_v22 = vand.u32 %v4789_v16, %v348_v11 }
  0x27   :  { %417 = vmatpush.bf16.msra.mxu0 %v3403_v37  ;;  %v3460_v14 = vld [vmem:[#allocation6 + $0xf8] sm:$0xf0]  ;;  %v125_v17 = vld [vmem:[#allocation3 + $0x10] sm:$0xff]  ;;  %v128_v18 = vld [vmem:[#allocation3 + $0x28] sm:$0xff]  ;;  %v3343_v21 = vor.u32 %v4160_v9, %v3340_v10 }
  0x28   :  { %3482 = vmatmul.msk.bf16.vlgmr.msra.gmra.mxu3 %vm385_vm2, %v4793_v39  ;;  %475 = vmatpush.bf16.msra.mxu2 %v3407_v40  ;;  %v130_v19 = vld [vmem:[#allocation3 + $0x38] sm:$0xff]  ;;  %v3463_v23 = vor.u32 %v4189_v13, %v3460_v14  ;;  %v4805_v24 = vpack.c.bf16 %v125_v17, %v123_v12  ;;  %v4185_v26 = vld [vmem:[#allocation6 + $0xcc] sm:$0xf]  ;;  %v3458_v32 = vld [vmem:[#allocation6 + $0xe8] sm:$0xf] }
  0x29   :  { %507 = vmatpush.bf16.msrb.mxu3 %v406_v36  ;;  %3480 = vmatmul.msk.bf16.vlgmr.msra.gmra.mxu1 %vm385_vm2, %v4795_v50  ;;  %v4807_v25 = vpack.c.bf16 %v130_v19, %v128_v18  ;;  %v3444_v27 = vld [vmem:[#allocation6 + $0xd8] sm:$0xf0]  ;;  %v4181_v16 = vld [vmem:[#allocation6 + $0xac] sm:$0xf]  ;;  %v4191_v33 = vld [vmem:[#allocation6 + $0xf4] sm:$0xf0] }
  0x2a   :  { %v3447_v28 = vor.u32 %v4185_v26, %v3444_v27  ;;  %v3428_v29 = vld [vmem:[#allocation6 + $0xb8] sm:$0xf0]  ;;  %v4193_v30 = vld [vmem:[#allocation6 + $0x10c] sm:$0xf]  ;;  %v3459_v36 = vor.u32 %v4191_v33, %v3458_v32  ;;  %v127_v41 = vld [vmem:[#allocation3 + $0x20] sm:$0xff] }
  0x2b   :  { %418 = vmatpush.bf16.msra.mxu0 %v3387_v49  ;;  %v3476_v31 = vld [vmem:[#allocation6 + $0x118] sm:$0xf0]  ;;  %v3431_v34 = vor.u32 %v4181_v16, %v3428_v29  ;;  %v4177_v37 = vld [vmem:[#allocation6 + $0x8c] sm:$0xf]  ;;  %v129_v42 = vld [vmem:[#allocation3 + $0x30] sm:$0xff] }
  0x2c   :  { %476 = vmatpush.bf16.msra.mxu2 %v3391_v52  ;;  %v3479_v35 = vor.u32 %v4193_v30, %v3476_v31  ;;  %v3412_v38 = vld [vmem:[#allocation6 + $0x98] sm:$0xf0]  ;;  %530 = vmatpush.bf16.msrb.mxu1 %v3459_v36  ;;  %v4815_v43 = vpack.c.bf16 %v129_v42, %v127_v41  ;;  %v3442_v44 = vld [vmem:[#allocation6 + $0xc8] sm:$0xf]  ;;  %v4187_v45 = vld [vmem:[#allocation6 + $0xd4] sm:$0xf0] }
  0x2d   :  { %508 = vmatpush.bf16.msrb.mxu3 %v3471_v46  ;;  %v3415_v40 = vor.u32 %v4177_v37, %v3412_v38  ;;  %v3443_v46 = vor.u32 %v4187_v45, %v3442_v44  ;;  %v3474_v47 = vld [vmem:[#allocation6 + $0x108] sm:$0xf]  ;;  %v4195_v48 = vld [vmem:[#allocation6 + $0x114] sm:$0xf0]  ;;  %v4173_v49 = vld [vmem:[#allocation6 + $0x6c] sm:$0xf] }
  0x2e   :  { %v3475_v51 = vor.u32 %v4195_v48, %v3474_v47  ;;  %v3396_v52 = vld [vmem:[#allocation6 + $0x78] sm:$0xf0]  ;;  %v3426_v54 = vld [vmem:[#allocation6 + $0xa8] sm:$0xf]  ;;  %v4183_v55 = vld [vmem:[#allocation6 + $0xb4] sm:$0xf0] }
  0x2f   :  { %419 = vmatpush.bf16.msra.mxu0 %v3371_v59  ;;  %v3399_v53 = vor.u32 %v4173_v49, %v3396_v52  ;;  %v3427_v56 = vor.u32 %v4183_v55, %v3426_v54  ;;  %v4169_v57 = vld [vmem:[#allocation6 + $0x4c] sm:$0xf]  ;;  %v3380_v58 = vld [vmem:[#allocation6 + $0x58] sm:$0xf0]  ;;  %v3410_v59 = vld [vmem:[#allocation6 + $0x88] sm:$0xf] }
  0x30   :  { %477 = vmatpush.bf16.msra.mxu2 %v3375_v60  ;;  %531 = vmatpush.bf16.msrb.mxu1 %v3443_v46  ;;  %v3383_v60 = vor.u32 %v4169_v57, %v3380_v58  ;;  %v4179_v61 = vld [vmem:[#allocation6 + $0x94] sm:$0xf0]  ;;  %v131_v2 = vld [vmem:[#allocation3 + $0x40] sm:$0xff]  ;;  %v4165_v5 = vld [vmem:[#allocation6 + $0x2c] sm:$0xf] }
  0x31   :  { %565 = vmatpush.bf16.msra.mxu3 %v409_v63  ;;  %v3411_v62 = vor.u32 %v4179_v61, %v3410_v59  ;;  %v3394_v63 = vld [vmem:[#allocation6 + $0x68] sm:$0xf]  ;;  %v4175_v0 = vld [vmem:[#allocation6 + $0x74] sm:$0xf0]  ;;  %v3364_v6 = vld [vmem:[#allocation6 + $0x38] sm:$0xf0] }
  0x32   :  { %v3395_v1 = vor.u32 %v4175_v0, %v3394_v63  ;;  %v3378_v7 = vld [vmem:[#allocation6 + $0x48] sm:$0xf]  ;;  %v3367_v8 = vor.u32 %v4165_v5, %v3364_v6  ;;  %v4171_v9 = vld [vmem:[#allocation6 + $0x54] sm:$0xf0]  ;;  %v4161_v13 = vld [vmem:[#allocation6 + $0xc] sm:$0xf] }
  0x33   :  { %420 = vmatpush.bf16.msra.mxu0 %v3355_v3  ;;  %v133_v3 = vld [vmem:[#allocation3 + $0x50] sm:$0xff]  ;;  %v3379_v10 = vor.u32 %v4171_v9, %v3378_v7  ;;  %v3362_v11 = vld [vmem:[#allocation6 + $0x28] sm:$0xf]  ;;  %v4167_v12 = vld [vmem:[#allocation6 + $0x34] sm:$0xf0] }
  0x34   :  { %478 = vmatpush.bf16.msra.mxu2 %v3359_v4  ;;  %532 = vmatpush.bf16.msrb.mxu1 %v3427_v56  ;;  %v143_v4 = vpack.c.bf16 %v133_v3, %v131_v2  ;;  %v3363_v14 = vor.u32 %v4167_v12, %v3362_v11  ;;  %v3346_v17 = vld [vmem:[#allocation6 + $0x8] sm:$0xf]  ;;  %v4163_v18 = vld [vmem:[#allocation6 + $0x14] sm:$0xf0]  ;;  %v3554_v27 = vld [vmem:[#allocation8 + $0x70] sm:$0xf] }
  0x35   :  { %566 = vmatpush.bf16.msra.mxu3 %v3475_v51  ;;  %v3546_v29 = vld [vmem:[#allocation8 + $0x60] sm:$0xf]  ;;  %v4209_v30 = vld [vmem:[#allocation8 + $0x64] sm:$0xf0]  ;;  %v4207_v32 = vld [vmem:[#allocation8 + $0x54] sm:$0xf0] }
  0x36   :  { %v3547_v31 = vor.u32 %v4209_v30, %v3546_v29  ;;  %v3522_v36 = vld [vmem:[#allocation8 + $0x30] sm:$0xf]  ;;  %v4203_v37 = vld [vmem:[#allocation8 + $0x34] sm:$0xf0]  ;;  %v4201_v44 = vld [vmem:[#allocation8 + $0x24] sm:$0xf0] }
  0x37   :  { %421 = vmatpush.bf16.msra.mxu0 %v3339_v15  ;;  %v3348_v15 = vld [vmem:[#allocation6 + $0x18] sm:$0xf0]  ;;  %v3523_v38 = vor.u32 %v4203_v37, %v3522_v36  ;;  %v4227_v41 = vld [vmem:[#allocation8 + $0xf4] sm:$0xf0]  ;;  %v3610_v46 = vld [vmem:[#allocation8 + $0xe0] sm:$0xf] }
  0x38   :  { %3483 = vmatmul.msk.bf16.gmra.mxu3 %vm385_vm2, %v4802_v20  ;;  %479 = vmatpush.bf16.msra.mxu2 %v3343_v21  ;;  %v3351_v19 = vor.u32 %v4161_v13, %v3348_v15  ;;  %v3347_v21 = vor.u32 %v4163_v18, %v3346_v17  ;;  %v4225_v47 = vld [vmem:[#allocation8 + $0xe4] sm:$0xf0]  ;;  %v4199_v49 = vld [vmem:[#allocation8 + $0x14] sm:$0xf0]  ;;  %v3602_v51 = vld [vmem:[#allocation8 + $0xd0] sm:$0xf] }
  0x39   :  { %3481 = vmatmul.msk.bf16.gmra.mxu1 %vm385_vm2, %v4807_v25  ;;  %v3611_v48 = vor.u32 %v4225_v47, %v3610_v46  ;;  %v3498_v55 = vld [vmem:[#allocation8] sm:$0xf]  ;;  %v4197_v56 = vld [vmem:[#allocation8 + $0x4] sm:$0xf0]  ;;  %v3586_v61 = vld [vmem:[#allocation8 + $0xb0] sm:$0xf] }
  0x3a   :  { %422 = vmatmul.bf16.vlgmr.msra.gmra.mxu0 %v4805_v24  ;;  %533 = vmatpush.bf16.msrb.mxu1 %v3411_v62  ;;  %v3594_v57 = vld [vmem:[#allocation8 + $0xc0] sm:$0xf]  ;;  %v3499_v58 = vor.u32 %v4197_v56, %v3498_v55  ;;  %v4221_v59 = vld [vmem:[#allocation8 + $0xc4] sm:$0xf0]  ;;  %v4219_v62 = vld [vmem:[#allocation8 + $0xb4] sm:$0xf0] }
  0x3b   :  { %588 = vmatpush.bf16.msrb.mxu0 %v3463_v23  ;;  %480 = vmatmul.bf16.vlgmr.msra.gmra.mxu2 %v4805_v24  ;;  %v137_v23 = vld [vmem:[#allocation3 + $0x70] sm:$0xff]  ;;  %v3587_v63 = vor.u32 %v4219_v62, %v3586_v61  ;;  %v4217_v2 = vld [vmem:[#allocation8 + $0xa4] sm:$0xf0]  ;;  %v4215_v5 = vld [vmem:[#allocation8 + $0x94] sm:$0xf0] }
  0x3c   :  { %623 = vmatpush.bf16.msrb.mxu2 %v412_v22  ;;  %v135_v22 = vld [vmem:[#allocation3 + $0x60] sm:$0xff]  ;;  %v3562_v9 = vld [vmem:[#allocation8 + $0x80] sm:$0xf]  ;;  %v4245_v15 = vld [vmem:[#allocation8 + $0x184] sm:$0xf0] }
  0x3d   :  { %v4824_v26 = vpack.c.bf16 %v137_v23, %v135_v22  ;;  %v3682_v22 = vld [vmem:[#allocation8 + $0x170] sm:$0xf]  ;;  %v4243_v23 = vld [vmem:[#allocation8 + $0x174] sm:$0xf0] }
  0x3e   :  { %534 = vmatpush.bf16.msrb.mxu1 %v3395_v1  ;;  %v3578_v1 = vld [vmem:[#allocation8 + $0xa0] sm:$0xf]  ;;  %v4239_v46 = vld [vmem:[#allocation8 + $0x154] sm:$0xf0] }
  0x3f   :  { %589 = vmatpush.bf16.msrb.mxu0 %v3447_v28  ;;  %v4211_v28 = vld [vmem:[#allocation8 + $0x74] sm:$0xf0]  ;;  %v3579_v3 = vor.u32 %v4217_v2, %v3578_v1  ;;  %v3658_v1 = vld [vmem:[#allocation8 + $0x140] sm:$0xf]  ;;  %v4237_v2 = vld [vmem:[#allocation8 + $0x144] sm:$0xf0] }
  0x40   :  { %624 = vmatpush.bf16.msrb.mxu2 %v3479_v35  ;;  %v3555_v16 = vor.u32 %v4211_v28, %v3554_v27  ;;  %v4205_v35 = vld [vmem:[#allocation8 + $0x44] sm:$0xf0] }
  0x42   :  { %535 = vmatpush.bf16.msrb.mxu1 %v3379_v10  ;;  %v4213_v10 = vld [vmem:[#allocation8 + $0x84] sm:$0xf0] }
  0x43   :  { %590 = vmatpush.bf16.msrb.mxu0 %v3431_v34  ;;  %v3530_v34 = vld [vmem:[#allocation8 + $0x40] sm:$0xf]  ;;  %v3563_v11 = vor.u32 %v4213_v10, %v3562_v9  ;;  %v3532_v9 = vld [vmem:[#allocation8 + $0x48] sm:$0xf0] }
  0x46   :  { %536 = vmatpush.bf16.msrb.mxu1 %v3363_v14  ;;  %v3690_v14 = vld [vmem:[#allocation8 + $0x180] sm:$0xf] }
  0x47   :  { %591 = vmatpush.bf16.msrb.mxu0 %v3415_v40  ;;  %v3618_v40 = vld [vmem:[#allocation8 + $0xf0] sm:$0xf]  ;;  %v3691_v17 = vor.u32 %v4245_v15, %v3690_v14 }
  0x48   :  { %3484 = vmatmul.msk.bf16.vlgmr.msrb.gmra.mxu3 %vm385_vm2, %v4795_v50  ;;  %v3619_v42 = vor.u32 %v4227_v41, %v3618_v40  ;;  %v3556_v40 = vld [vmem:[#allocation8 + $0x78] sm:$0xf0] }
  0x49   :  { %1107 = vmatpush.bf16.msra.mxu2 %v3691_v17 }
  0x4a   :  { %427 = vmatmul.bf16.gmra.mxu0 %v4815_v43  ;;  %537 = vmatpush.bf16.msrb.mxu1 %v3347_v21 }
  0x4b   :  { %485 = vmatmul.bf16.gmra.mxu2 %v4815_v43  ;;  %592 = vmatpush.bf16.msrb.mxu0 %v3399_v53  ;;  %v4223_v53 = vld [vmem:[#allocation8 + $0xd4] sm:$0xf0] }
  0x4c   :  { %1042 = vmatpush.bf16.msrb.mxu3 %v3619_v42  ;;  %v3603_v54 = vor.u32 %v4223_v53, %v3602_v51 }
  0x4d   :  { %538 = vmatmul.bf16.vlgmr.msrb.gmra.mxu1 %v4805_v24 }
  0x4e   :  { %1013 = vmatpush.bf16.msra.mxu1 %v3555_v16 }
  0x4f   :  { %593 = vmatpush.bf16.msrb.mxu0 %v3383_v60  ;;  %v3595_v60 = vor.u32 %v4221_v59, %v3594_v57  ;;  %v4206_v57 = vld [vmem:[#allocation8 + $0x54] sm:$0xf] }
  0x50   :  { %1043 = vmatpush.bf16.msrb.mxu3 %v3611_v48  ;;  %v4208_v48 = vld [vmem:[#allocation8 + $0x64] sm:$0xf] }
  0x52   :  { %1014 = vmatpush.bf16.msra.mxu1 %v3547_v31  ;;  %v3674_v31 = vld [vmem:[#allocation8 + $0x160] sm:$0xf] }
  0x53   :  { %594 = vmatpush.bf16.msrb.mxu0 %v3367_v8  ;;  %v4858_v8 = vld [vmem:[%s5875_s2] sm:$0xf] }
  0x54   :  { %1044 = vmatpush.bf16.msrb.mxu3 %v3603_v54  ;;  %v4861_v12 = vperm.slane %v4858_v8, 0 }
  0x57   :  { %595 = vmatpush.bf16.msrb.mxu0 %v3351_v19 }
  0x58   :  { %3485 = vmatmul.msk.bf16.gmra.mxu3 %vm385_vm2, %v4807_v25 }
  0x59   :  { %1045 = vmatpush.bf16.msrb.mxu3 %v3595_v60 }
  0x5a   :  { %432 = vmatmul.bf16.gmra.mxu0 %v143_v4 }
  0x5b   :  { %490 = vmatmul.bf16.gmra.mxu2 %v143_v4 }
  0x5d   :  { %543 = vmatmul.bf16.gmra.mxu1 %v4815_v43  ;;  %1046 = vmatpush.bf16.msrb.mxu3 %v3587_v63 }
  0x61   :  { %1047 = vmatpush.bf16.msrb.mxu3 %v3579_v3 }
  0x68   :  { %3486 = vmatmul.msk.bf16.gmra.mxu3 %vm385_vm2, %v4793_v39 }
  0x6a   :  { %437 = vmatmul.bf16.gmra.mxu0 %v4824_v26 }
  0x6b   :  { %495 = vmatmul.bf16.gmra.mxu2 %v4824_v26 }
  0x6d   :  { %548 = vmatmul.bf16.gmra.mxu1 %v143_v4 }
  0x78   :  { %3487 = vmatmul.msk.bf16.gmra.mxu3 %vm385_vm2, %v4802_v20 }
  0x7a   :  { %596 = vmatmul.bf16.vlgmr.msrb.gmra.mxu0 %v4805_v24  ;;  %v3538_v24 = vld [vmem:[#allocation8 + $0x50] sm:$0xf] }
  0x7b   :  { %3492 = vmatmul.msk.bf16.vlgmr.msrb.gmra.mxu2 %vm385_vm2, %v4795_v50  ;;  %v3539_v33 = vor.u32 %v4207_v32, %v3538_v24  ;;  %v4241_v24 = vld [vmem:[#allocation8 + $0x164] sm:$0xf0] }
  0x7d   :  { %1015 = vmatpush.bf16.msra.mxu1 %v3539_v33  ;;  %v3675_v33 = vor.u32 %v4241_v24, %v3674_v31  ;;  %v4200_v24 = vld [vmem:[#allocation8 + $0x24] sm:$0xf] }
  0x7e   :  { %553 = vmatmul.bf16.gmra.mxu1 %v4824_v26 }
  0x88   :  { %3488 = vmatmul.msk.bf16.vlgmr.msra.gmra.mxu3 %vm385_vm2, %v4795_v50  ;;  %v3531_v50 = vor.u32 %v4205_v35, %v3530_v34 }
  0x8a   :  { %601 = vmatmul.bf16.gmra.mxu0 %v4815_v43  ;;  %1016 = vmatpush.bf16.msra.mxu1 %v3531_v50  ;;  %v3514_v43 = vld [vmem:[#allocation8 + $0x20] sm:$0xf] }
  0x8b   :  { %3493 = vmatmul.msk.bf16.gmra.mxu2 %vm385_vm2, %v4807_v25  ;;  %v3515_v45 = vor.u32 %v4201_v44, %v3514_v43  ;;  %v4876_v44 = vperm.slane %v4858_v8, 1 }
  0x8e   :  { %1017 = vmatpush.bf16.msra.mxu1 %v3523_v38  ;;  %v4210_v38 = vld [vmem:[#allocation8 + $0x74] sm:$0xf] }
  0x8f   :  { %v3559_v41 = vor.u32 %v4210_v38, %v3556_v40 }
  0x92   :  { %1018 = vmatpush.bf16.msra.mxu1 %v3515_v45  ;;  %v3666_v45 = vld [vmem:[#allocation8 + $0x150] sm:$0xf] }
  0x93   :  { %v3667_v47 = vor.u32 %v4239_v46, %v3666_v45  ;;  %v4198_v45 = vld [vmem:[#allocation8 + $0x14] sm:$0xf]  ;;  %v3508_v46 = vld [vmem:[#allocation8 + $0x18] sm:$0xf0] }
  0x98   :  { %3489 = vmatmul.msk.bf16.gmra.mxu3 %vm385_vm2, %v4807_v25  ;;  %v3506_v25 = vld [vmem:[#allocation8 + $0x10] sm:$0xf] }
  0x99   :  { %v3507_v52 = vor.u32 %v4199_v49, %v3506_v25  ;;  %v3548_v25 = vld [vmem:[#allocation8 + $0x68] sm:$0xf0] }
  0x9a   :  { %606 = vmatmul.bf16.gmra.mxu0 %v143_v4  ;;  %v3570_v4 = vld [vmem:[#allocation8 + $0x90] sm:$0xf] }
  0x9b   :  { %3494 = vmatmul.msk.bf16.gmra.mxu2 %vm385_vm2, %v4793_v39  ;;  %1019 = vmatpush.bf16.msra.mxu1 %v3507_v52  ;;  %v3551_v52 = vor.u32 %v4208_v48, %v3548_v25  ;;  %v3642_v48 = vld [vmem:[#allocation8 + $0x120] sm:$0xf]  ;;  %v4233_v25 = vld [vmem:[#allocation8 + $0x124] sm:$0xf0] }
  0x9f   :  { %1020 = vmatpush.bf16.msra.mxu1 %v3499_v58  ;;  %v3540_v58 = vld [vmem:[#allocation8 + $0x58] sm:$0xf0] }
  0xa0   :  { %v3543_v59 = vor.u32 %v4206_v57, %v3540_v58 }
  0xa3   :  { %1129 = vmatpush.bf16.msrb.mxu1 %v3559_v41 }
  0xa6   :  { %v452_v6 = vpop.f32.mrf.mxu1 }
  0xa7   :  { %1130 = vmatpush.bf16.msrb.mxu1 %v3551_v52 }
  0xa8   :  { %3490 = vmatmul.msk.bf16.gmra.mxu3 %vm385_vm2, %v4793_v39  ;;  %v3571_v39 = vor.u32 %v4215_v5, %v3570_v4  ;;  %v3659_v4 = vor.u32 %v4237_v2, %v3658_v1  ;;  %v3596_v1 = vld [vmem:[#allocation8 + $0xc8] sm:$0xf0] }
  0xaa   :  { %611 = vmatmul.bf16.gmra.mxu0 %v4824_v26  ;;  %1048 = vmatpush.bf16.msrb.mxu3 %v3571_v39  ;;  %v3683_v26 = vor.u32 %v4243_v23, %v3682_v22  ;;  %v4204_v39 = vld [vmem:[#allocation8 + $0x44] sm:$0xf]  ;;  %v3524_v22 = vld [vmem:[#allocation8 + $0x38] sm:$0xf0]  ;;  %v4226_v23 = vld [vmem:[#allocation8 + $0xf4] sm:$0xf] }
  0xab   :  { %v4849_v0 = vpop.f32.mrf.mxu3  ;;  %3495 = vmatmul.msk.bf16.gmra.mxu2 %vm385_vm2, %v4802_v20  ;;  %1131 = vmatpush.bf16.msrb.mxu1 %v3543_v59  ;;  %v3535_v10 = vor.u32 %v4204_v39, %v3532_v9  ;;  %v4218_v9 = vld [vmem:[#allocation8 + $0xb4] sm:$0xf] }
  0xac   :  { %1071 = vmatpush.bf16.msra.mxu0 %v3683_v26 }
  0xae   :  { %1049 = vmatpush.bf16.msrb.mxu3 %v3563_v11  ;;  %v454_v21 = vpop.f32.mrf.mxu1 }
  0xaf   :  { %1132 = vmatpush.bf16.msrb.mxu1 %v3535_v10  ;;  %v3588_v10 = vld [vmem:[#allocation8 + $0xb8] sm:$0xf0] }
  0xb0   :  { %1072 = vmatpush.bf16.msra.mxu0 %v3675_v33  ;;  %v3516_v33 = vld [vmem:[#allocation8 + $0x28] sm:$0xf0] }
  0xb3   :  { %v4853_v7 = vpop.f32.mrf.mxu3 }
  0xb4   :  { %1073 = vmatpush.bf16.msra.mxu0 %v3667_v47  ;;  %v4222_v47 = vld [vmem:[#allocation8 + $0xd4] sm:$0xf] }
  0xb6   :  { %v457_v35 = vpop.f32.mrf.mxu1 }
  0xb7   :  { %v423_v13 = vpop.f32.mrf.mxu0 }
  0xb8   :  { %3491 = vmatmul.msk.bf16.gmra.mxu3 %vm385_vm2, %v4802_v20  ;;  %v424_v18 = vadd.f32 %v423_v13, %v4861_v12  ;;  %1074 = vmatpush.bf16.msra.mxu0 %v3659_v4 }
  0xba   :  { %v453_v27 = vadd.f32 %v452_v6, %v424_v18 }
  0xbb   :  { %v4866_v19 = vpop.f32.mrf.mxu3 }
  0xbc   :  { %v646_v20 = vmax.f32 %v453_v27, 0.0  ;;  %v3620_v27 = vld [vmem:[#allocation8 + $0xf8] sm:$0xf0] }
  0xbe   :  { %v481_v28 = vpop.f32.mrf.mxu2  ;;  %v459_v54 = vpop.f32.mrf.mxu1 }
  0xbf   :  { %v425_v16 = vpop.f32.mrf.mxu0  ;;  %v482_v55 = vadd.f32 %v481_v28, %v4876_v44  ;;  %v3650_v28 = vld [vmem:[#allocation8 + $0x130] sm:$0xf] }
  0xc0   :  { %v426_v29 = vadd.f32 %v425_v16, %v4861_v12  ;;  %v4235_v16 = vld [vmem:[#allocation8 + $0x134] sm:$0xf0] }
  0xc2   :  { %v455_v30 = vadd.f32 %v454_v21, %v426_v29  ;;  %v4202_v21 = vld [vmem:[#allocation8 + $0x34] sm:$0xf]  ;;  %v3623_v29 = vor.u32 %v4226_v23, %v3620_v27  ;;  %v4216_v23 = vld [vmem:[#allocation8 + $0xa4] sm:$0xf] }
  0xc3   :  { %v4869_v32 = vpop.f32.mrf.mxu3  ;;  %v3527_v26 = vor.u32 %v4202_v21, %v3524_v22 }
  0xc4   :  { %v650_v34 = vmax.f32 %v455_v30, 0.0  ;;  %v3651_v30 = vor.u32 %v4235_v16, %v3650_v28  ;;  %1158 = vmatpush.bf16.msra.mxu3 %v3623_v29 }
  0xc5   :  { %1133 = vmatpush.bf16.msrb.mxu1 %v3527_v26  ;;  %v3580_v26 = vld [vmem:[#allocation8 + $0xa8] sm:$0xf0] }
  0xc6   :  { %v4871_v50 = vpack.c.bf16 %v650_v34, %v646_v20  ;;  %v483_v36 = vpop.f32.mrf.mxu2  ;;  %1075 = vmatpush.bf16.msra.mxu0 %v3651_v30  ;;  %v3519_v34 = vor.u32 %v4200_v24, %v3516_v33  ;;  %v3583_v27 = vor.u32 %v4216_v23, %v3580_v26  ;;  %v3572_v24 = vld [vmem:[#allocation8 + $0x98] sm:$0xf0]  ;;  %v3626_v33 = vld [vmem:[#allocation8 + $0x100] sm:$0xf] }
  0xc7   :  { %v428_v37 = vpop.f32.mrf.mxu0  ;;  %v484_v60 = vadd.f32 %v483_v36, %v4876_v44  ;;  %v3612_v36 = vld [vmem:[#allocation8 + $0xe8] sm:$0xf0] }
  0xc8   :  { %1021 = vmatmul.bf16.vlgmr.msra.gmra.mxu1 %v4871_v50  ;;  %v429_v42 = vadd.f32 %v428_v37, %v4861_v12 }
  0xc9   :  { %1134 = vmatpush.bf16.msrb.mxu1 %v3519_v34  ;;  %v4229_v34 = vld [vmem:[#allocation8 + $0x104] sm:$0xf0] }
  0xca   :  { %v458_v49 = vadd.f32 %v457_v35, %v429_v42  ;;  %v4224_v35 = vld [vmem:[#allocation8 + $0xe4] sm:$0xf] }
  0xcb   :  { %v510_v43 = vpop.f32.mrf.mxu3  ;;  %v3615_v38 = vor.u32 %v4224_v35, %v3612_v36 }
  0xcc   :  { %v654_v61 = vmax.f32 %v458_v49, 0.0  ;;  %v511_v62 = vadd.f32 %v510_v43, %v482_v55  ;;  %v3511_v49 = vor.u32 %v4198_v45, %v3508_v46  ;;  %v3643_v55 = vor.u32 %v4233_v25, %v3642_v48  ;;  %v3564_v46 = vld [vmem:[#allocation8 + $0x88] sm:$0xf0] }
  0xcd   :  { %1159 = vmatpush.bf16.msra.mxu3 %v3615_v38 }
  0xce   :  { %v486_v51 = vpop.f32.mrf.mxu2  ;;  %v647_v11 = vmax.f32 %v511_v62, 0.0  ;;  %1076 = vmatpush.bf16.msra.mxu0 %v3643_v55  ;;  %1135 = vmatpush.bf16.msrb.mxu1 %v3511_v49  ;;  %v539_v55 = vpop.f32.mrf.mxu1 }
  0xcf   :  { %v430_v53 = vpop.f32.mrf.mxu0  ;;  %v487_v41 = vadd.f32 %v486_v51, %v4876_v44 }
  0xd0   :  { %v431_v56 = vadd.f32 %v430_v53, %v4861_v12 }
  0xd2   :  { %v460_v63 = vadd.f32 %v459_v54, %v431_v56  ;;  %v3604_v56 = vld [vmem:[#allocation8 + $0xd8] sm:$0xf0] }
  0xd3   :  { %v512_v3 = vpop.f32.mrf.mxu3  ;;  %v3607_v57 = vor.u32 %v4222_v47, %v3604_v56 }
  0xd4   :  { %v658_v5 = vmax.f32 %v460_v63, 0.0  ;;  %v513_v6 = vadd.f32 %v512_v3, %v484_v60  ;;  %v4196_v60 = vld [vmem:[#allocation8 + $0x4] sm:$0xf] }
  0xd5   :  { %1160 = vmatpush.bf16.msra.mxu3 %v3607_v57  ;;  %v4220_v63 = vld [vmem:[#allocation8 + $0xc4] sm:$0xf]  ;;  %v3684_v57 = vld [vmem:[#allocation8 + $0x178] sm:$0xf0] }
  0xd6   :  { %v651_v13 = vmax.f32 %v513_v6, 0.0  ;;  %v488_v14 = vpop.f32.mrf.mxu2  ;;  %v4881_v15 = vpack.c.bf16 %v658_v5, %v654_v61  ;;  %v3500_v61 = vld [vmem:[#allocation8 + $0x8] sm:$0xf0] }
  0xd7   :  { %v433_v17 = vpop.f32.mrf.mxu0  ;;  %v489_v52 = vadd.f32 %v488_v14, %v4876_v44  ;;  %v3503_v62 = vor.u32 %v4196_v60, %v3500_v61  ;;  %v3634_v14 = vld [vmem:[#allocation8 + $0x110] sm:$0xf] }
  0xd8   :  { %v4883_v18 = vpack.c.bf16 %v651_v13, %v647_v11  ;;  %1026 = vmatmul.bf16.gmra.mxu1 %v4881_v15  ;;  %v434_v31 = vadd.f32 %v433_v17, %v4861_v12  ;;  %v3591_v11 = vor.u32 %v4218_v9, %v3588_v10  ;;  %v4231_v17 = vld [vmem:[#allocation8 + $0x114] sm:$0xf0] }
  0xd9   :  { %1136 = vmatpush.bf16.msrb.mxu1 %v3503_v62  ;;  %v3635_v22 = vor.u32 %v4231_v17, %v3634_v14 }
  0xda   :  { %1050 = vmatmul.bf16.vlgmr.msrb.gmra.mxu3 %v4883_v18  ;;  %v463_v42 = vadd.f32 %v4849_v0, %v434_v31  ;;  %v4214_v31 = vld [vmem:[#allocation8 + $0x94] sm:$0xf] }
  0xdb   :  { %v515_v20 = vpop.f32.mrf.mxu3  ;;  %1077 = vmatpush.bf16.msra.mxu0 %v3635_v22  ;;  %v3575_v35 = vor.u32 %v4214_v31, %v3572_v24 }
  0xdc   :  { %v516_v53 = vadd.f32 %v515_v20, %v487_v41  ;;  %v662_v0 = vmax.f32 %v463_v42, 0.0  ;;  %v3627_v41 = vor.u32 %v4229_v34, %v3626_v33 }
  0xde   :  { %v491_v37 = vpop.f32.mrf.mxu2  ;;  %v655_v2 = vmax.f32 %v516_v53, 0.0 }
  0xdf   :  { %v435_v40 = vpop.f32.mrf.mxu0  ;;  %v492_v29 = vadd.f32 %v491_v37, %v4876_v44  ;;  %1078 = vmatpush.bf16.msra.mxu0 %v3627_v41 }
  0xe0   :  { %v436_v43 = vadd.f32 %v435_v40, %v4861_v12 }
  0xe2   :  { %v465_v54 = vadd.f32 %v4853_v7, %v436_v43  ;;  %v3599_v7 = vor.u32 %v4220_v63, %v3596_v1  ;;  %v4240_v1 = vld [vmem:[#allocation8 + $0x164] sm:$0xf] }
  0xe3   :  { %v517_v51 = vpop.f32.mrf.mxu3 }
  0xe4   :  { %v518_v58 = vadd.f32 %v517_v51, %v489_v52  ;;  %v666_v59 = vmax.f32 %v465_v54, 0.0  ;;  %1161 = vmatpush.bf16.msra.mxu3 %v3599_v7  ;;  %v3692_v54 = vld [vmem:[#allocation8 + $0x188] sm:$0xf0]  ;;  %v4242_v51 = vld [vmem:[#allocation8 + $0x174] sm:$0xf] }
  0xe6   :  { %v659_v3 = vmax.f32 %v518_v58, 0.0  ;;  %v493_v4 = vpop.f32.mrf.mxu2  ;;  %v4893_v5 = vpack.c.bf16 %v666_v59, %v662_v0  ;;  %v4912_v58 = vperm.slane %v4858_v8, 3  ;;  %v3687_v59 = vor.u32 %v4242_v51, %v3684_v57 }
  0xe7   :  { %v438_v6 = vpop.f32.mrf.mxu0  ;;  %v494_v36 = vadd.f32 %v493_v4, %v4876_v44 }
  0xe8   :  { %1031 = vmatmul.bf16.gmra.mxu1 %v4893_v5  ;;  %v4896_v39 = vpack.c.bf16 %v659_v3, %v655_v2  ;;  %v439_v21 = vadd.f32 %v438_v6, %v4861_v12  ;;  %1162 = vmatpush.bf16.msra.mxu3 %v3591_v11  ;;  %v3676_v2 = vld [vmem:[#allocation8 + $0x168] sm:$0xf0]  ;;  %v541_v11 = vpop.f32.mrf.mxu1 }
  0xe9   :  { %1187 = vmatpush.bf16.msrb.mxu0 %v3687_v59  ;;  %v3679_v7 = vor.u32 %v4240_v1, %v3676_v2 }
  0xea   :  { %1055 = vmatmul.bf16.gmra.mxu3 %v4896_v39  ;;  %v468_v20 = vadd.f32 %v4866_v19, %v439_v21  ;;  %v4212_v19 = vld [vmem:[#allocation8 + $0x84] sm:$0xf] }
  0xeb   :  { %v520_v13 = vpop.f32.mrf.mxu3 }
  0xec   :  { %1163 = vmatpush.bf16.msra.mxu3 %v3583_v27  ;;  %v521_v38 = vadd.f32 %v520_v13, %v492_v29  ;;  %v670_v43 = vmax.f32 %v468_v20, 0.0  ;;  %v3668_v29 = vld [vmem:[#allocation8 + $0x158] sm:$0xf0] }
  0xed   :  { %1188 = vmatpush.bf16.msrb.mxu0 %v3679_v7 }
  0xee   :  { %v496_v28 = vpop.f32.mrf.mxu2  ;;  %v663_v47 = vmax.f32 %v521_v38, 0.0 }
  0xef   :  { %v440_v16 = vpop.f32.mrf.mxu0  ;;  %v497_v63 = vadd.f32 %v496_v28, %v4876_v44  ;;  %v4922_v28 = vperm.slane %v4858_v8, 2 }
  0xf0   :  { %v441_v30 = vadd.f32 %v440_v16, %v4861_v12  ;;  %1164 = vmatpush.bf16.msra.mxu3 %v3575_v35  ;;  %v3567_v12 = vor.u32 %v4212_v19, %v3564_v46  ;;  %v4238_v16 = vld [vmem:[#allocation8 + $0x154] sm:$0xf]  ;;  %v544_v24 = vpop.f32.mrf.mxu1  ;;  %v4236_v35 = vld [vmem:[#allocation8 + $0x144] sm:$0xf] }
  0xf1   :  { %v3671_v31 = vor.u32 %v4238_v16, %v3668_v29  ;;  %v542_v38 = vadd.f32 %v541_v11, %v4922_v28  ;;  %v545_v59 = vadd.f32 %v544_v24, %v4922_v28 }
  0xf2   :  { %v470_v40 = vadd.f32 %v4869_v32, %v441_v30  ;;  %v4244_v32 = vld [vmem:[#allocation8 + $0x184] sm:$0xf] }
  0xf3   :  { %v522_v42 = vpop.f32.mrf.mxu3  ;;  %v3695_v56 = vor.u32 %v4244_v32, %v3692_v54  ;;  %1189 = vmatpush.bf16.msrb.mxu0 %v3671_v31 }
  0xf4   :  { %v523_v45 = vadd.f32 %v522_v42, %v494_v36  ;;  %v674_v37 = vmax.f32 %v470_v40, 0.0  ;;  %1165 = vmatpush.bf16.msra.mxu3 %v3567_v12  ;;  %v3660_v36 = vld [vmem:[#allocation8 + $0x148] sm:$0xf0] }
  0xf5   :  { %1223 = vmatpush.bf16.msrb.mxu2 %v3695_v56  ;;  %v3663_v41 = vor.u32 %v4236_v35, %v3660_v36  ;;  %v3652_v56 = vld [vmem:[#allocation8 + $0x138] sm:$0xf0] }
  0xf6   :  { %v667_v48 = vmax.f32 %v523_v45, 0.0  ;;  %v498_v25 = vpop.f32.mrf.mxu2  ;;  %v4905_v49 = vpack.c.bf16 %v674_v37, %v670_v43 }
  0xf7   :  { %v597_v52 = vpop.f32.mrf.mxu0  ;;  %v499_v3 = vadd.f32 %v498_v25, %v4876_v44  ;;  %1190 = vmatpush.bf16.msrb.mxu0 %v3663_v41 }
  0xf8   :  { %1036 = vmatmul.bf16.gmra.mxu1 %v4905_v49  ;;  %v4908_v53 = vpack.c.bf16 %v667_v48, %v663_v47  ;;  %v598_v61 = vadd.f32 %v597_v52, %v4912_v58  ;;  %v546_v25 = vpop.f32.mrf.mxu1 }
  0xf9   :  { %v547_v2 = vadd.f32 %v546_v25, %v4922_v28 }
  0xfa   :  { %1060 = vmatmul.bf16.gmra.mxu3 %v4908_v53 }
  0xfb   :  { %v525_v0 = vpop.f32.mrf.mxu3 }
  0xfc   :  { %v526_v4 = vadd.f32 %v525_v0, %v497_v63 }
  0xfe   :  { %v626_v60 = vpop.f32.mrf.mxu2  ;;  %v671_v14 = vmax.f32 %v526_v4, 0.0 }
  0xff   :  { %v599_v62 = vpop.f32.mrf.mxu0  ;;  %v627_v6 = vadd.f32 %v626_v60, %v598_v61  ;;  %v4232_v61 = vld [vmem:[#allocation8 + $0x124] sm:$0xf] }
 0x100   :  { %v600_v10 = vadd.f32 %v599_v62, %v4912_v58 }
 0x101   :  { %v649_v22 = vmax.f32 %v627_v6, 0.0 }
 0x103   :  { %v527_v9 = vpop.f32.mrf.mxu3 }
 0x104   :  { %v528_v13 = vadd.f32 %v527_v9, %v499_v3 }
 0x106   :  { %v675_v17 = vmax.f32 %v528_v13, 0.0  ;;  %v628_v21 = vpop.f32.mrf.mxu2 }
 0x107   :  { %v629_v23 = vadd.f32 %v628_v21, %v600_v10  ;;  %v602_v26 = vpop.f32.mrf.mxu0 }
 0x108   :  { %v4918_v27 = vpack.c.bf16 %v675_v17, %v671_v14  ;;  %1137 = vmatmul.bf16.vlgmr.msrb.gmra.mxu1 %v4871_v50  ;;  %v540_v50 = vadd.f32 %v539_v55, %v4922_v28  ;;  %v603_v8 = vadd.f32 %v602_v26, %v4912_v58  ;;  %v4234_v55 = vld [vmem:[#allocation8 + $0x134] sm:$0xf] }
 0x109   :  { %v653_v44 = vmax.f32 %v629_v23, 0.0  ;;  %v3655_v0 = vor.u32 %v4234_v55, %v3652_v56  ;;  %v4230_v26 = vld [vmem:[#allocation8 + $0x114] sm:$0xf] }
 0x10a   :  { %1065 = vmatmul.bf16.gmra.mxu3 %v4918_v27 }
 0x10b   :  { %v4925_v20 = vpack.c.bf16 %v653_v44, %v649_v22  ;;  %v568_v30 = vpop.f32.mrf.mxu3  ;;  %1191 = vmatpush.bf16.msrb.mxu0 %v3655_v0  ;;  %v3636_v44 = vld [vmem:[#allocation8 + $0x118] sm:$0xf0] }
 0x10c   :  { %v569_v40 = vadd.f32 %v568_v30, %v540_v50  ;;  %v3639_v31 = vor.u32 %v4230_v26, %v3636_v44  ;;  %v3754_v26 = vld [vmem:[#allocation9 + $0x60] sm:$0xf]  ;;  %v4260_v44 = vld [vmem:[#allocation9 + $0x6c] sm:$0xf0] }
 0x10d   :  { %3696 = vmatmul.msk.bf16.vlgmr.msra.gmra.mxu2 %vm1000_vm3, %v4925_v20 }
 0x10e   :  { %v631_v33 = vpop.f32.mrf.mxu2  ;;  %v648_v19 = vmax.f32 %v569_v40, 0.0 }
 0x10f   :  { %v604_v34 = vpop.f32.mrf.mxu0  ;;  %v632_v42 = vadd.f32 %v631_v33, %v603_v8  ;;  %v4228_v33 = vld [vmem:[#allocation8 + $0x104] sm:$0xf]  ;;  %v3628_v8 = vld [vmem:[#allocation8 + $0x108] sm:$0xf0] }
 0x110   :  { %v605_v45 = vadd.f32 %v604_v34, %v4912_v58  ;;  %v3631_v34 = vor.u32 %v4228_v33, %v3628_v8  ;;  %v4254_v33 = vld [vmem:[#allocation9 + $0x44] sm:$0xf] }
 0x111   :  { %v657_v47 = vmax.f32 %v632_v42, 0.0 }
 0x113   :  { %v570_v43 = vpop.f32.mrf.mxu3 }
 0x114   :  { %v571_v37 = vadd.f32 %v570_v43, %v542_v38 }
 0x116   :  { %v652_v46 = vmax.f32 %v571_v37, 0.0  ;;  %v633_v12 = vpop.f32.mrf.mxu2 }
 0x117   :  { %v634_v48 = vadd.f32 %v633_v12, %v605_v45  ;;  %v607_v52 = vpop.f32.mrf.mxu0 }
 0x118   :  { %v4933_v32 = vpack.c.bf16 %v652_v46, %v648_v19  ;;  %1142 = vmatmul.bf16.gmra.mxu1 %v4881_v15  ;;  %v3644_v15 = vld [vmem:[#allocation8 + $0x128] sm:$0xf0]  ;;  %v608_v62 = vadd.f32 %v607_v52, %v4912_v58 }
 0x119   :  { %v661_v54 = vmax.f32 %v634_v48, 0.0  ;;  %v3647_v1 = vor.u32 %v4232_v61, %v3644_v15  ;;  %v4274_v15 = vld [vmem:[#allocation9 + $0xe4] sm:$0xf] }
 0x11a   :  { %1079 = vmatmul.bf16.vlgmr.msra.gmra.mxu0 %v4933_v32  ;;  %1166 = vmatmul.bf16.vlgmr.msra.gmra.mxu3 %v4883_v18  ;;  %v549_v18 = vpop.f32.mrf.mxu1 }
 0x11b   :  { %v573_v51 = vpop.f32.mrf.mxu3  ;;  %v4938_v57 = vpack.c.bf16 %v661_v54, %v657_v47  ;;  %1192 = vmatpush.bf16.msrb.mxu0 %v3647_v1  ;;  %v550_v24 = vadd.f32 %v549_v18, %v4922_v28  ;;  %v3802_v1 = vld [vmem:[#allocation9 + $0xc0] sm:$0xf]  ;;  %v4272_v18 = vld [vmem:[#allocation9 + $0xcc] sm:$0xf0] }
 0x11c   :  { %v574_v3 = vadd.f32 %v573_v51, %v545_v59 }
 0x11d   :  { %3697 = vmatmul.msk.bf16.gmra.mxu2 %vm1000_vm3, %v4938_v57 }
 0x11e   :  { %v636_v60 = vpop.f32.mrf.mxu2  ;;  %v656_v10 = vmax.f32 %v574_v3, 0.0  ;;  %v3804_v3 = vld [vmem:[#allocation9 + $0xd0] sm:$0xf0] }
 0x11f   :  { %v609_v63 = vpop.f32.mrf.mxu0  ;;  %v637_v4 = vadd.f32 %v636_v60, %v608_v62  ;;  %1193 = vmatpush.bf16.msrb.mxu0 %v3639_v31  ;;  %v3820_v62 = vld [vmem:[#allocation9 + $0xf0] sm:$0xf0] }
 0x120   :  { %v610_v6 = vadd.f32 %v609_v63, %v4912_v58  ;;  %v3823_v63 = vor.u32 %v4274_v15, %v3820_v62  ;;  %v3948_v15 = vld [vmem:[#allocation9 + $0x1f0] sm:$0xf0] }
 0x121   :  { %v665_v14 = vmax.f32 %v637_v4, 0.0  ;;  %v4266_v4 = vld [vmem:[#allocation9 + $0xa4] sm:$0xf] }
 0x122   :  { %v551_v16 = vpop.f32.mrf.mxu1 }
 0x123   :  { %v575_v7 = vpop.f32.mrf.mxu3  ;;  %1194 = vmatpush.bf16.msrb.mxu0 %v3631_v34 }
 0x124   :  { %v576_v9 = vadd.f32 %v575_v7, %v547_v2  ;;  %v4270_v2 = vld [vmem:[#allocation9 + $0xc4] sm:$0xf] }
 0x126   :  { %v660_v11 = vmax.f32 %v576_v9, 0.0  ;;  %v638_v13 = vpop.f32.mrf.mxu2 }
 0x127   :  { %v639_v17 = vadd.f32 %v638_v13, %v610_v6  ;;  %v612_v21 = vpop.f32.mrf.mxu0  ;;  %1721 = vmatpush.bf16.msra.mxu0 %v3823_v63  ;;  %v3788_v6 = vld [vmem:[#allocation9 + $0xb0] sm:$0xf0]  ;;  %v4262_v13 = vld [vmem:[#allocation9 + $0x84] sm:$0xf] }
 0x128   :  { %v684_v22 = vpack.c.bf16 %v660_v11, %v656_v10  ;;  %1147 = vmatmul.bf16.gmra.mxu1 %v4893_v5  ;;  %v613_v5 = vadd.f32 %v612_v21, %v4912_v58  ;;  %v3791_v9 = vor.u32 %v4266_v4, %v3788_v6  ;;  %v3770_v10 = vld [vmem:[#allocation9 + $0x80] sm:$0xf]  ;;  %v4264_v11 = vld [vmem:[#allocation9 + $0x8c] sm:$0xf0]  ;;  %v3772_v21 = vld [vmem:[#allocation9 + $0x90] sm:$0xf0] }
 0x129   :  { %v669_v23 = vmax.f32 %v639_v17, 0.0  ;;  %v3771_v17 = vor.u32 %v4264_v11, %v3770_v10  ;;  %v3932_v6 = vld [vmem:[#allocation9 + $0x1d0] sm:$0xf0] }
 0x12a   :  { %1084 = vmatmul.bf16.gmra.mxu0 %v684_v22  ;;  %1171 = vmatmul.bf16.gmra.mxu3 %v4896_v39  ;;  %v552_v39 = vadd.f32 %v551_v16, %v4922_v28  ;;  %v554_v43 = vpop.f32.mrf.mxu1  ;;  %v4258_v16 = vld [vmem:[#allocation9 + $0x64] sm:$0xf] }
 0x12b   :  { %v578_v29 = vpop.f32.mrf.mxu3  ;;  %v689_v30 = vpack.c.bf16 %v669_v23, %v665_v14 }
 0x12c   :  { %v579_v36 = vadd.f32 %v578_v29, %v550_v24  ;;  %v3755_v29 = vor.u32 %v4260_v44, %v3754_v26  ;;  %v3738_v24 = vld [vmem:[#allocation9 + $0x40] sm:$0xf] }
 0x12d   :  { %3698 = vmatmul.msk.bf16.gmra.mxu2 %vm1000_vm3, %v689_v30 }
 0x12e   :  { %v641_v50 = vpop.f32.mrf.mxu2  ;;  %v664_v45 = vmax.f32 %v579_v36, 0.0  ;;  %v4252_v36 = vld [vmem:[#allocation9 + $0x2c] sm:$0xf0] }
 0x12f   :  { %v614_v35 = vpop.f32.mrf.mxu0  ;;  %v642_v38 = vadd.f32 %v641_v50, %v613_v5  ;;  %v4256_v50 = vld [vmem:[#allocation9 + $0x4c] sm:$0xf0]  ;;  %v3740_v5 = vld [vmem:[#allocation9 + $0x50] sm:$0xf0] }
 0x130   :  { %v615_v41 = vadd.f32 %v614_v35, %v4912_v58  ;;  %v555_v58 = vadd.f32 %v554_v43, %v4922_v28  ;;  %v3739_v8 = vor.u32 %v4256_v50, %v3738_v24  ;;  %v3743_v34 = vor.u32 %v4254_v33, %v3740_v5  ;;  %v3916_v33 = vld [vmem:[#allocation9 + $0x1b0] sm:$0xf0]  ;;  %v4277_v5 = vld [vmem:[#allocation9 + $0xf4] sm:$0xf0] }
 0x131   :  { %v673_v46 = vmax.f32 %v642_v38, 0.0  ;;  %v4250_v38 = vld [vmem:[#allocation9 + $0x24] sm:$0xf] }
 0x132   :  { %v556_v54 = vpop.f32.mrf.mxu1 }
 0x133   :  { %v580_v40 = vpop.f32.mrf.mxu3  ;;  %v557_v55 = vadd.f32 %v556_v54, %v4922_v28  ;;  %v4276_v28 = vld [vmem:[#allocation9 + $0xec] sm:$0xf0] }
 0x134   :  { %v581_v42 = vadd.f32 %v580_v40, %v552_v39  ;;  %v3722_v39 = vld [vmem:[#allocation9 + $0x20] sm:$0xf] }
 0x136   :  { %v668_v37 = vmax.f32 %v581_v42, 0.0  ;;  %v643_v19 = vpop.f32.mrf.mxu2  ;;  %v3724_v42 = vld [vmem:[#allocation9 + $0x30] sm:$0xf0] }
 0x137   :  { %v644_v12 = vadd.f32 %v643_v19, %v615_v41  ;;  %v3723_v41 = vor.u32 %v4252_v36, %v3722_v39  ;;  %v3727_v43 = vor.u32 %v4250_v38, %v3724_v42  ;;  %v4246_v19 = vld [vmem:[#allocation9 + $0x4] sm:$0xf]  ;;  %v4275_v38 = vld [vmem:[#allocation9 + $0xec] sm:$0xf] }
 0x138   :  { %v4953_v47 = vpack.c.bf16 %v668_v37, %v664_v45  ;;  %1152 = vmatmul.bf16.gmra.mxu1 %v4905_v49  ;;  %v3706_v45 = vld [vmem:[#allocation9] sm:$0xf]  ;;  %v4248_v37 = vld [vmem:[#allocation9 + $0xc] sm:$0xf0] }
 0x139   :  { %v677_v48 = vmax.f32 %v644_v12, 0.0  ;;  %v3708_v12 = vld [vmem:[#allocation9 + $0x10] sm:$0xf0] }
 0x13a   :  { %1089 = vmatmul.bf16.gmra.mxu0 %v4953_v47  ;;  %1176 = vmatmul.bf16.gmra.mxu3 %v4908_v53  ;;  %v3818_v53 = vld [vmem:[#allocation9 + $0xe0] sm:$0xf] }
 0x13b   :  { %v583_v25 = vpop.f32.mrf.mxu3  ;;  %v4958_v52 = vpack.c.bf16 %v677_v48, %v673_v46  ;;  %v3819_v61 = vor.u32 %v4276_v28, %v3818_v53  ;;  %v3707_v46 = vor.u32 %v4248_v37, %v3706_v45  ;;  %v4304_v53 = vld [vmem:[#allocation9 + $0x1cc] sm:$0xf0]  ;;  %v4273_v45 = vld [vmem:[#allocation9 + $0xd4] sm:$0xf0]  ;;  %v4271_v37 = vld [vmem:[#allocation9 + $0xcc] sm:$0xf] }
 0x13c   :  { %v584_v56 = vadd.f32 %v583_v25, %v555_v58  ;;  %v4308_v58 = vld [vmem:[#allocation9 + $0x1ec] sm:$0xf0] }
 0x13d   :  { %3699 = vmatmul.msk.bf16.gmra.mxu2 %vm1000_vm3, %v4958_v52  ;;  %1663 = vmatpush.bf16.msra.mxu1 %v3819_v61 }
 0x13e   :  { %v672_v49 = vmax.f32 %v584_v56, 0.0  ;;  %v4983_v56 = vld [vmem:[%s5877_s4] sm:$0x3] }
 0x143   :  { %v585_v51 = vpop.f32.mrf.mxu3 }
 0x144   :  { %v586_v0 = vadd.f32 %v585_v51, %v557_v55 }
 0x145   :  { %v1022_v14 = vpop.f32.mrf.mxu1 }
 0x146   :  { %v676_v59 = vmax.f32 %v586_v0, 0.0 }
 0x148   :  { %v4964_v60 = vpack.c.bf16 %v676_v59, %v672_v49  ;;  %v4990_v49 = vperm.slane %v4983_v56, 0  ;;  %v3930_v59 = vld [vmem:[#allocation9 + $0x1c0] sm:$0xf] }
 0x149   :  { %v3931_v61 = vor.u32 %v4304_v53, %v3930_v59  ;;  %v3900_v59 = vld [vmem:[#allocation9 + $0x190] sm:$0xf0] }
 0x14a   :  { %1094 = vmatmul.bf16.gmra.mxu0 %v4964_v60  ;;  %1181 = vmatmul.bf16.gmra.mxu3 %v4918_v27  ;;  %v3803_v27 = vor.u32 %v4272_v18, %v3802_v1  ;;  %v1023_v62 = vadd.f32 %v1022_v14, %v4990_v49 }
 0x14c   :  { %1664 = vmatpush.bf16.msra.mxu1 %v3803_v27 }
 0x14d   :  { %3700 = vmatmul.msk.bf16.vlgmr.msrb.gmra.mxu2 %vm1000_vm3, %v4925_v20  ;;  %v3807_v20 = vor.u32 %v4270_v2, %v3804_v3  ;;  %v1024_v35 = vpop.f32.mrf.mxu1 }
 0x14e   :  { %v1025_v27 = vadd.f32 %v1024_v35, %v4990_v49 }
 0x14f   :  { %1722 = vmatpush.bf16.msra.mxu0 %v3807_v20  ;;  %v3914_v20 = vld [vmem:[#allocation9 + $0x1a0] sm:$0xf] }
 0x153   :  { %1723 = vmatpush.bf16.msra.mxu0 %v3791_v9 }
 0x155   :  { %v1027_v48 = vpop.f32.mrf.mxu1 }
 0x15a   :  { %1195 = vmatmul.bf16.vlgmr.msrb.gmra.mxu0 %v4933_v32  ;;  %v3786_v32 = vld [vmem:[#allocation9 + $0xa0] sm:$0xf] }
 0x15d   :  { %3701 = vmatmul.msk.bf16.gmra.mxu2 %vm1000_vm3, %v4938_v57  ;;  %v4268_v57 = vld [vmem:[#allocation9 + $0xac] sm:$0xf0]  ;;  %v1051_v23 = vpop.f32.mrf.mxu3  ;;  %v4985_v51 = vpop.f32.mrf.mxu1 }
 0x15e   :  { %v3787_v7 = vor.u32 %v4268_v57, %v3786_v32  ;;  %v1052_v18 = vadd.f32 %v1051_v23, %v1023_v62  ;;  %v4300_v32 = vld [vmem:[#allocation9 + $0x1ac] sm:$0xf0] }
 0x15f   :  { %v3915_v4 = vor.u32 %v4300_v32, %v3914_v20  ;;  %v3778_v32 = vld [vmem:[#allocation9 + $0x88] sm:$0xf] }
 0x160   :  { %1665 = vmatpush.bf16.msra.mxu1 %v3787_v7  ;;  %v4302_v7 = vld [vmem:[#allocation9 + $0x1c4] sm:$0xf] }
 0x161   :  { %v3935_v10 = vor.u32 %v4302_v7, %v3932_v6  ;;  %v4263_v7 = vld [vmem:[#allocation9 + $0x8c] sm:$0xf] }
 0x164   :  { %1666 = vmatpush.bf16.msra.mxu1 %v3771_v17 }
 0x165   :  { %v1053_v40 = vpop.f32.mrf.mxu3  ;;  %v4993_v2 = vpop.f32.mrf.mxu1 }
 0x166   :  { %v1054_v9 = vadd.f32 %v1053_v40, %v1025_v27  ;;  %v3828_v40 = vld [vmem:[#allocation9 + $0xf8] sm:$0xf0] }
 0x168   :  { %1667 = vmatpush.bf16.msra.mxu1 %v3755_v29  ;;  %v4296_v29 = vld [vmem:[#allocation9 + $0x18c] sm:$0xf0] }
 0x16a   :  { %1200 = vmatmul.bf16.gmra.mxu0 %v684_v22  ;;  %v3775_v22 = vor.u32 %v4262_v13, %v3772_v21 }
 0x16c   :  { %1724 = vmatpush.bf16.msra.mxu0 %v3775_v22  ;;  %1668 = vmatpush.bf16.msra.mxu1 %v3739_v8  ;;  %v3826_v8 = vld [vmem:[#allocation9 + $0xe8] sm:$0xf] }
 0x16d   :  { %3702 = vmatmul.msk.bf16.gmra.mxu2 %vm1000_vm3, %v689_v30  ;;  %v3756_v30 = vld [vmem:[#allocation9 + $0x70] sm:$0xf0]  ;;  %v4977_v25 = vpop.f32.mrf.mxu3  ;;  %v4998_v26 = vpop.f32.mrf.mxu1  ;;  %v3827_v36 = vor.u32 %v4277_v5, %v3826_v8 }
 0x16e   :  { %v3759_v31 = vor.u32 %v4258_v16, %v3756_v30  ;;  %v3898_v16 = vld [vmem:[#allocation9 + $0x180] sm:$0xf]  ;;  %v4298_v30 = vld [vmem:[#allocation9 + $0x1a4] sm:$0xf] }
 0x16f   :  { %v3899_v50 = vor.u32 %v4296_v29, %v3898_v16  ;;  %v3919_v39 = vor.u32 %v4298_v30, %v3916_v33  ;;  %v3884_v29 = vld [vmem:[#allocation9 + $0x170] sm:$0xf0]  ;;  %v3762_v30 = vld [vmem:[#allocation9 + $0x68] sm:$0xf] }
 0x170   :  { %1725 = vmatpush.bf16.msra.mxu0 %v3759_v31  ;;  %1669 = vmatpush.bf16.msra.mxu1 %v3723_v41  ;;  %v3831_v41 = vor.u32 %v4275_v38, %v3828_v40  ;;  %v4286_v40 = vld [vmem:[#allocation9 + $0x144] sm:$0xf] }
 0x174   :  { %1726 = vmatpush.bf16.msra.mxu0 %v3743_v34  ;;  %1670 = vmatpush.bf16.msra.mxu1 %v3707_v46  ;;  %v1028_v34 = vadd.f32 %v1027_v48, %v4990_v49  ;;  %v3812_v46 = vld [vmem:[#allocation9 + $0xd8] sm:$0xf0]  ;;  %v3882_v48 = vld [vmem:[#allocation9 + $0x160] sm:$0xf] }
 0x175   :  { %v4987_v0 = vpop.f32.mrf.mxu3 }
 0x176   :  { %v1057_v42 = vadd.f32 %v4977_v25, %v1028_v34  ;;  %v4259_v34 = vld [vmem:[#allocation9 + $0x6c] sm:$0xf] }
 0x178   :  { %1727 = vmatpush.bf16.msra.mxu0 %v3727_v43  ;;  %1779 = vmatpush.bf16.msrb.mxu1 %v3827_v36  ;;  %v3810_v43 = vld [vmem:[#allocation9 + $0xc8] sm:$0xf] }
 0x17a   :  { %1205 = vmatmul.bf16.gmra.mxu0 %v4953_v47  ;;  %v3711_v47 = vor.u32 %v4246_v19, %v3708_v12  ;;  %v3811_v19 = vor.u32 %v4273_v45, %v3810_v43  ;;  %v1030_v12 = vadd.f32 %v4985_v51, %v4990_v49  ;;  %v4257_v45 = vld [vmem:[#allocation9 + $0x54] sm:$0xf0] }
 0x17c   :  { %1728 = vmatpush.bf16.msra.mxu0 %v3711_v47  ;;  %v1059_v25 = vadd.f32 %v4987_v0, %v1030_v12  ;;  %1780 = vmatpush.bf16.msrb.mxu1 %v3811_v19  ;;  %v3748_v19 = vld [vmem:[#allocation9 + $0x58] sm:$0xf0] }
 0x17d   :  { %3703 = vmatmul.msk.bf16.gmra.mxu2 %vm1000_vm3, %v4958_v52  ;;  %v3946_v52 = vld [vmem:[#allocation9 + $0x1e0] sm:$0xf]  ;;  %v4996_v57 = vpop.f32.mrf.mxu3 }
 0x17e   :  { %v3947_v54 = vor.u32 %v4308_v58, %v3946_v52  ;;  %v4292_v52 = vld [vmem:[#allocation9 + $0x16c] sm:$0xf0]  ;;  %v3815_v58 = vor.u32 %v4271_v37, %v3812_v46  ;;  %v4255_v37 = vld [vmem:[#allocation9 + $0x4c] sm:$0xf]  ;;  %v1035_v46 = vadd.f32 %v4998_v26, %v4990_v49  ;;  %v3732_v26 = vld [vmem:[#allocation9 + $0x38] sm:$0xf0] }
 0x180   :  { %1692 = vmatpush.bf16.msrb.mxu3 %v3947_v54  ;;  %1837 = vmatpush.bf16.msrb.mxu0 %v3831_v41  ;;  %v3883_v54 = vor.u32 %v4292_v52, %v3882_v48  ;;  %v3868_v41 = vld [vmem:[#allocation9 + $0x150] sm:$0xf0]  ;;  %v4284_v48 = vld [vmem:[#allocation9 + $0x12c] sm:$0xf0] }
 0x181   :  { %v3871_v43 = vor.u32 %v4286_v40, %v3868_v41 }
 0x184   :  { %1693 = vmatpush.bf16.msrb.mxu3 %v3931_v61  ;;  %v4267_v61 = vld [vmem:[#allocation9 + $0xac] sm:$0xf]  ;;  %1838 = vmatpush.bf16.msrb.mxu0 %v3815_v58 }
 0x185   :  { %v5002_v31 = vpop.f32.mrf.mxu3 }
 0x188   :  { %1694 = vmatpush.bf16.msrb.mxu3 %v3915_v4  ;;  %v4265_v4 = vld [vmem:[#allocation9 + $0x94] sm:$0xf0] }
 0x189   :  { %v3779_v6 = vor.u32 %v4265_v4, %v3778_v32  ;;  %v4278_v32 = vld [vmem:[#allocation9 + $0x104] sm:$0xf] }
 0x18a   :  { %1210 = vmatmul.bf16.gmra.mxu0 %v4964_v60  ;;  %v4306_v60 = vld [vmem:[#allocation9 + $0x1e4] sm:$0xf] }
 0x18b   :  { %v3951_v1 = vor.u32 %v4306_v60, %v3948_v15  ;;  %v3794_v60 = vld [vmem:[#allocation9 + $0xa8] sm:$0xf]  ;;  %v5011_v15 = vpop.f32.mrf.mxu1 }
 0x18c   :  { %1695 = vmatpush.bf16.msrb.mxu3 %v3899_v50  ;;  %v1033_v50 = vadd.f32 %v4993_v2, %v4990_v49  ;;  %v3746_v2 = vld [vmem:[#allocation9 + $0x48] sm:$0xf] }
 0x18d   :  { %1750 = vmatpush.bf16.msra.mxu2 %v3951_v1  ;;  %v5015_v20 = vpop.f32.mrf.mxu3  ;;  %v3747_v52 = vor.u32 %v4257_v45, %v3746_v2 }
 0x18e   :  { %v1062_v38 = vadd.f32 %v4996_v57, %v1033_v50  ;;  %v3751_v57 = vor.u32 %v4255_v37, %v3748_v19  ;;  %v5043_v19 = vperm.slane %v4983_v56, 1 }
 0x190   :  { %v1109_v55 = vpop.f32.mrf.mxu2  ;;  %1696 = vmatpush.bf16.msrb.mxu3 %v3883_v54  ;;  %v1064_v54 = vadd.f32 %v5002_v31, %v1035_v46  ;;  %v3834_v31 = vld [vmem:[#allocation9 + $0x100] sm:$0xf] }
 0x191   :  { %1751 = vmatpush.bf16.msra.mxu2 %v3935_v10 }
 0x195   :  { %1752 = vmatpush.bf16.msra.mxu2 %v3919_v39  ;;  %v5023_v39 = vpop.f32.mrf.mxu1 }
 0x197   :  { %v1080_v28 = vpop.f32.mrf.mxu0 }
 0x198   :  { %v1111_v63 = vpop.f32.mrf.mxu2  ;;  %v1081_v3 = vadd.f32 %v1080_v28, %v1052_v18  ;;  %v4269_v28 = vld [vmem:[#allocation9 + $0xb4] sm:$0xf0] }
 0x199   :  { %v3795_v51 = vor.u32 %v4269_v28, %v3794_v60  ;;  %v4253_v28 = vld [vmem:[#allocation9 + $0x34] sm:$0xf0] }
 0x19a   :  { %v1110_v13 = vadd.f32 %v1109_v55, %v1081_v3  ;;  %v4294_v55 = vld [vmem:[#allocation9 + $0x184] sm:$0xf] }
 0x19b   :  { %v3903_v53 = vor.u32 %v4294_v55, %v3900_v59  ;;  %1781 = vmatpush.bf16.msrb.mxu1 %v3795_v51  ;;  %v4282_v55 = vld [vmem:[#allocation9 + $0x124] sm:$0xf]  ;;  %v3852_v59 = vld [vmem:[#allocation9 + $0x130] sm:$0xf0] }
 0x19c   :  { %v1245_v22 = vmax.f32 %v1110_v13, 0.0  ;;  %v3855_v60 = vor.u32 %v4282_v55, %v3852_v59 }
 0x19d   :  { %1753 = vmatpush.bf16.msra.mxu2 %v3903_v53  ;;  %v1138_v4 = vpop.f32.mrf.mxu1 }
 0x19f   :  { %v1082_v11 = vpop.f32.mrf.mxu0  ;;  %1782 = vmatpush.bf16.msrb.mxu1 %v3779_v6  ;;  %v3836_v6 = vld [vmem:[#allocation9 + $0x110] sm:$0xf0] }
 0x1a0   :  { %v1083_v14 = vadd.f32 %v1082_v11, %v1054_v9  ;;  %v1114_v17 = vpop.f32.mrf.mxu2  ;;  %v3780_v9 = vld [vmem:[#allocation9 + $0x98] sm:$0xf0] }
 0x1a1   :  { %v3783_v13 = vor.u32 %v4263_v7, %v3780_v9  ;;  %v3714_v9 = vld [vmem:[#allocation9 + $0x8] sm:$0xf] }
 0x1a2   :  { %v1112_v21 = vadd.f32 %v1111_v63, %v1083_v14  ;;  %v3796_v63 = vld [vmem:[#allocation9 + $0xb8] sm:$0xf0] }
 0x1a3   :  { %v3799_v3 = vor.u32 %v4267_v61, %v3796_v63  ;;  %v4251_v61 = vld [vmem:[#allocation9 + $0x2c] sm:$0xf] }
 0x1a4   :  { %v1247_v23 = vmax.f32 %v1112_v21, 0.0  ;;  %v4288_v21 = vld [vmem:[#allocation9 + $0x14c] sm:$0xf0] }
 0x1a5   :  { %1839 = vmatpush.bf16.msrb.mxu0 %v3799_v3 }
 0x1a6   :  { %v5000_v44 = vpack.c.bf16 %v1247_v23, %v1245_v22  ;;  %v4290_v22 = vld [vmem:[#allocation9 + $0x164] sm:$0xf] }
 0x1a7   :  { %v1085_v24 = vpop.f32.mrf.mxu0  ;;  %v3887_v8 = vor.u32 %v4290_v22, %v3884_v29  ;;  %v3716_v22 = vld [vmem:[#allocation9 + $0x18] sm:$0xf0] }
 0x1a8   :  { %1671 = vmatmul.bf16.vlgmr.msra.gmra.mxu1 %v5000_v44  ;;  %1729 = vmatmul.bf16.vlgmr.msra.gmra.mxu0 %v5000_v44  ;;  %v1116_v35 = vpop.f32.mrf.mxu2  ;;  %v1086_v47 = vadd.f32 %v1085_v24, %v1057_v42  ;;  %v4261_v24 = vld [vmem:[#allocation9 + $0x74] sm:$0xf0]  ;;  %v5026_v42 = vpop.f32.mrf.mxu3 }
 0x1a9   :  { %1840 = vmatpush.bf16.msrb.mxu0 %v3783_v13  ;;  %v3763_v5 = vor.u32 %v4261_v24, %v3762_v30  ;;  %1754 = vmatpush.bf16.msra.mxu2 %v3887_v8  ;;  %v1038_v24 = vadd.f32 %v5011_v15, %v4990_v49  ;;  %v1040_v8 = vadd.f32 %v5023_v39, %v4990_v49  ;;  %v3938_v39 = vld [vmem:[#allocation9 + $0x1c8] sm:$0xf] }
 0x1aa   :  { %v1115_v1 = vadd.f32 %v1114_v17, %v1086_v47  ;;  %v3866_v17 = vld [vmem:[#allocation9 + $0x140] sm:$0xf] }
 0x1ab   :  { %v3867_v16 = vor.u32 %v4288_v21, %v3866_v17  ;;  %1783 = vmatpush.bf16.msrb.mxu1 %v3763_v5  ;;  %v3850_v47 = vld [vmem:[#allocation9 + $0x120] sm:$0xf]  ;;  %v3839_v17 = vor.u32 %v4278_v32, %v3836_v6  ;;  %v4247_v21 = vld [vmem:[#allocation9 + $0xc] sm:$0xf]  ;;  %v1069_v40 = vadd.f32 %v5026_v42, %v1040_v8 }
 0x1ac   :  { %v1249_v10 = vmax.f32 %v1115_v1, 0.0  ;;  %v3851_v58 = vor.u32 %v4284_v48, %v3850_v47  ;;  %v4307_v47 = vld [vmem:[#allocation9 + $0x1ec] sm:$0xf] }
 0x1ad   :  { %1697 = vmatpush.bf16.msrb.mxu3 %v3867_v16  ;;  %1755 = vmatpush.bf16.msra.mxu2 %v3871_v43  ;;  %v3719_v16 = vor.u32 %v4247_v21, %v3716_v22  ;;  %v3924_v21 = vld [vmem:[#allocation9 + $0x1b8] sm:$0xf0]  ;;  %v4074_v22 = vld [vmem:[#allocation11 + $0xe0] sm:$0xf] }
 0x1af   :  { %v1087_v62 = vpop.f32.mrf.mxu0  ;;  %1784 = vmatpush.bf16.msrb.mxu1 %v3747_v52 }
 0x1b0   :  { %v1088_v18 = vadd.f32 %v1087_v62, %v1059_v25  ;;  %v5013_v27 = vpop.f32.mrf.mxu2  ;;  %v3730_v25 = vld [vmem:[#allocation9 + $0x28] sm:$0xf] }
 0x1b1   :  { %1698 = vmatpush.bf16.msrb.mxu3 %v3851_v58  ;;  %v3731_v1 = vor.u32 %v4253_v28, %v3730_v25  ;;  %1756 = vmatpush.bf16.msra.mxu2 %v3855_v60  ;;  %v1139_v58 = vadd.f32 %v1138_v4, %v5043_v19  ;;  %v3922_v60 = vld [vmem:[#allocation9 + $0x1a8] sm:$0xf]  ;;  %v4301_v28 = vld [vmem:[#allocation9 + $0x1b4] sm:$0xf0] }
 0x1b2   :  { %v1117_v0 = vadd.f32 %v1116_v35, %v1088_v18  ;;  %v3764_v35 = vld [vmem:[#allocation9 + $0x78] sm:$0xf0]  ;;  %v3735_v18 = vor.u32 %v4251_v61, %v3732_v26  ;;  %v3923_v61 = vor.u32 %v4301_v28, %v3922_v60  ;;  %v4303_v26 = vld [vmem:[#allocation9 + $0x1cc] sm:$0xf]  ;;  %v4337_v28 = vld [vmem:[#allocation11 + $0xd4] sm:$0xf0] }
 0x1b3   :  { %v3767_v36 = vor.u32 %v4259_v34, %v3764_v35  ;;  %1785 = vmatpush.bf16.msrb.mxu1 %v3731_v1  ;;  %v3954_v34 = vld [vmem:[#allocation9 + $0x1e8] sm:$0xf]  ;;  %v4309_v35 = vld [vmem:[#allocation9 + $0x1f4] sm:$0xf0] }
 0x1b4   :  { %v1251_v11 = vmax.f32 %v1117_v0, 0.0  ;;  %v4280_v0 = vld [vmem:[#allocation9 + $0x10c] sm:$0xf0] }
 0x1b5   :  { %1841 = vmatpush.bf16.msrb.mxu0 %v3767_v36  ;;  %v3835_v7 = vor.u32 %v4280_v0, %v3834_v31  ;;  %1757 = vmatpush.bf16.msra.mxu2 %v3839_v17  ;;  %v1140_v36 = vpop.f32.mrf.mxu1 }
 0x1b6   :  { %v5017_v14 = vpack.c.bf16 %v1251_v11, %v1249_v10  ;;  %v4249_v10 = vld [vmem:[#allocation9 + $0x14] sm:$0xf0]  ;;  %v1141_v25 = vadd.f32 %v1140_v36, %v5043_v19 }
 0x1b7   :  { %v1090_v23 = vpop.f32.mrf.mxu0  ;;  %1699 = vmatpush.bf16.msrb.mxu3 %v3835_v7 }
 0x1b8   :  { %1676 = vmatmul.bf16.gmra.mxu1 %v5017_v14  ;;  %1734 = vmatmul.bf16.gmra.mxu0 %v5017_v14  ;;  %v1121_v33 = vpop.f32.mrf.mxu2  ;;  %v1091_v12 = vadd.f32 %v1090_v23, %v1062_v38  ;;  %v1167_v23 = vpop.f32.mrf.mxu3  ;;  %v3955_v38 = vor.u32 %v4309_v35, %v3954_v34  ;;  %v4336_v34 = vld [vmem:[#allocation11 + $0xcc] sm:$0xf0] }
 0x1b9   :  { %1842 = vmatpush.bf16.msrb.mxu0 %v3751_v57  ;;  %v3956_v57 = vld [vmem:[#allocation9 + $0x1f8] sm:$0xf0]  ;;  %v1168_v59 = vadd.f32 %v1167_v23, %v1139_v58  ;;  %v4340_v23 = vld [vmem:[#allocation11 + $0xec] sm:$0xf0] }
 0x1ba   :  { %v1120_v62 = vadd.f32 %v5013_v27, %v1091_v12  ;;  %v3715_v27 = vor.u32 %v4249_v10, %v3714_v9  ;;  %v4305_v12 = vld [vmem:[#allocation9 + $0x1d4] sm:$0xf0]  ;;  %v3959_v56 = vor.u32 %v4307_v47, %v3956_v57  ;;  %v3906_v10 = vld [vmem:[#allocation9 + $0x188] sm:$0xf] }
 0x1bb   :  { %1808 = vmatpush.bf16.msra.mxu3 %v3955_v38  ;;  %v3939_v42 = vor.u32 %v4305_v12, %v3938_v39  ;;  %v3890_v38 = vld [vmem:[#allocation9 + $0x168] sm:$0xf]  ;;  %v4332_v39 = vld [vmem:[#allocation11 + $0xac] sm:$0xf0] }
 0x1bc   :  { %v1253_v11 = vmax.f32 %v1120_v62, 0.0  ;;  %1786 = vmatpush.bf16.msrb.mxu1 %v3715_v27  ;;  %1866 = vmatpush.bf16.msrb.mxu2 %v3959_v56  ;;  %v3940_v62 = vld [vmem:[#allocation9 + $0x1d8] sm:$0xf0]  ;;  %v4082_v12 = vld [vmem:[#allocation11 + $0xe8] sm:$0xf] }
 0x1bd   :  { %1843 = vmatpush.bf16.msrb.mxu0 %v3735_v18  ;;  %v1143_v48 = vpop.f32.mrf.mxu1  ;;  %v4026_v56 = vld [vmem:[#allocation11 + $0x80] sm:$0xf] }
 0x1bf   :  { %v1092_v53 = vpop.f32.mrf.mxu0  ;;  %1809 = vmatpush.bf16.msra.mxu3 %v3939_v42  ;;  %v4341_v42 = vld [vmem:[#allocation11 + $0xf4] sm:$0xf0] }
 0x1c0   :  { %v1093_v51 = vadd.f32 %v1092_v53, %v1064_v54  ;;  %v1124_v63 = vpop.f32.mrf.mxu2  ;;  %v1169_v41 = vpop.f32.mrf.mxu3  ;;  %v5067_v57 = vor.u32 %v4341_v42, %v4082_v12  ;;  %v4018_v12 = vld [vmem:[#allocation11 + $0x68] sm:$0xf] }
 0x1c1   :  { %1844 = vmatpush.bf16.msrb.mxu0 %v3719_v16  ;;  %v1144_v16 = vadd.f32 %v1143_v48, %v5043_v19 }
 0x1c2   :  { %v1122_v3 = vadd.f32 %v1121_v33, %v1093_v51  ;;  %v1067_v33 = vadd.f32 %v5015_v20, %v1038_v24  ;;  %v1170_v51 = vadd.f32 %v1169_v41, %v1141_v25  ;;  %v5056_v24 = vor.u32 %v4340_v23, %v4074_v22  ;;  %v4287_v22 = vld [vmem:[#allocation9 + $0x14c] sm:$0xf] }
 0x1c3   :  { %1810 = vmatpush.bf16.msra.mxu3 %v3923_v61 }
 0x1c4   :  { %v1255_v13 = vmax.f32 %v1122_v3, 0.0  ;;  %2090 = vmatpush.bf16.msra.mxu1 %v5056_v24 }
 0x1c5   :  { %v1145_v0 = vpop.f32.mrf.mxu1  ;;  %2116 = vmatpush.bf16.msra.mxu0 %v5067_v57 }
 0x1c6   :  { %v5032_v29 = vpack.c.bf16 %v1255_v13, %v1253_v11  ;;  %v4297_v11 = vld [vmem:[#allocation9 + $0x194] sm:$0xf0]  ;;  %v4299_v13 = vld [vmem:[#allocation9 + $0x1ac] sm:$0xf]  ;;  %v1146_v35 = vadd.f32 %v1145_v0, %v5043_v19  ;;  %v3892_v0 = vld [vmem:[#allocation9 + $0x178] sm:$0xf0] }
 0x1c7   :  { %v1095_v30 = vpop.f32.mrf.mxu0  ;;  %v3907_v27 = vor.u32 %v4297_v11, %v3906_v10  ;;  %v4050_v11 = vld [vmem:[#allocation11 + $0xa8] sm:$0xf] }
 0x1c8   :  { %1681 = vmatmul.bf16.gmra.mxu1 %v5032_v29  ;;  %1739 = vmatmul.bf16.gmra.mxu0 %v5032_v29  ;;  %v1126_v50 = vpop.f32.mrf.mxu2  ;;  %v1096_v5 = vadd.f32 %v1095_v30, %v1067_v33  ;;  %v1172_v55 = vpop.f32.mrf.mxu3  ;;  %v3927_v30 = vor.u32 %v4299_v13, %v3924_v21  ;;  %v4333_v13 = vld [vmem:[#allocation11 + $0xb4] sm:$0xf0] }
 0x1c9   :  { %v1173_v33 = vadd.f32 %v1172_v55, %v1144_v16  ;;  %1811 = vmatpush.bf16.msra.mxu3 %v3907_v27  ;;  %v4328_v55 = vld [vmem:[#allocation11 + $0x8c] sm:$0xf0]  ;;  %v4285_v27 = vld [vmem:[#allocation9 + $0x134] sm:$0xf0]  ;;  %v5088_v21 = vor.u32 %v4333_v13, %v4050_v11  ;;  %v3986_v11 = vld [vmem:[#allocation11 + $0x28] sm:$0xf] }
 0x1ca   :  { %v1125_v15 = vadd.f32 %v1124_v63, %v1096_v5  ;;  %v3943_v63 = vor.u32 %v4303_v26, %v3940_v62  ;;  %v4058_v5 = vld [vmem:[#allocation11 + $0xc0] sm:$0xf]  ;;  %v5073_v60 = vor.u32 %v4328_v55, %v4026_v56  ;;  %v4317_v13 = vld [vmem:[#allocation11 + $0x34] sm:$0xf0] }
 0x1cb   :  { %v5062_v41 = vor.u32 %v4336_v34, %v4058_v5  ;;  %v4329_v34 = vld [vmem:[#allocation11 + $0x94] sm:$0xf0] }
 0x1cc   :  { %v1257_v20 = vmax.f32 %v1125_v15, 0.0  ;;  %1867 = vmatpush.bf16.msrb.mxu2 %v3943_v63  ;;  %v4289_v63 = vld [vmem:[#allocation9 + $0x154] sm:$0xf0] }
 0x1cd   :  { %v1148_v8 = vpop.f32.mrf.mxu1  ;;  %2091 = vmatpush.bf16.msra.mxu1 %v5062_v41 }
 0x1cf   :  { %v1097_v2 = vpop.f32.mrf.mxu0 }
 0x1d0   :  { %v1098_v43 = vadd.f32 %v1097_v2, %v1069_v40  ;;  %v1225_v45 = vpop.f32.mrf.mxu2  ;;  %v1174_v4 = vpop.f32.mrf.mxu3  ;;  %1868 = vmatpush.bf16.msrb.mxu2 %v3927_v30  ;;  %v4293_v40 = vld [vmem:[#allocation9 + $0x174] sm:$0xf0]  ;;  %v3876_v30 = vld [vmem:[#allocation9 + $0x158] sm:$0xf0] }
 0x1d1   :  { %v3891_v15 = vor.u32 %v4293_v40, %v3890_v38 }
 0x1d2   :  { %v1127_v37 = vadd.f32 %v1126_v50, %v1098_v43  ;;  %v4295_v43 = vld [vmem:[#allocation9 + $0x18c] sm:$0xf] }
 0x1d3   :  { %1812 = vmatpush.bf16.msra.mxu3 %v3891_v15  ;;  %v4283_v15 = vld [vmem:[#allocation9 + $0x12c] sm:$0xf] }
 0x1d4   :  { %v1259_v46 = vmax.f32 %v1127_v37, 0.0 }
 0x1d5   :  { %v1150_v61 = vpop.f32.mrf.mxu1 }
 0x1d6   :  { %v5045_v49 = vpack.c.bf16 %v1259_v46, %v1257_v20  ;;  %v4042_v46 = vld [vmem:[#allocation11 + $0xa0] sm:$0xf] }
 0x1d7   :  { %v1196_v52 = vpop.f32.mrf.mxu0 }
 0x1d8   :  { %1686 = vmatmul.bf16.gmra.mxu1 %v5045_v49  ;;  %1744 = vmatmul.bf16.gmra.mxu0 %v5045_v49  ;;  %v1227_v54 = vpop.f32.mrf.mxu2  ;;  %v1197_v53 = vadd.f32 %v1196_v52, %v1168_v59  ;;  %v1177_v2 = vpop.f32.mrf.mxu3  ;;  %v5065_v52 = vor.u32 %v4332_v39, %v4042_v46  ;;  %v4066_v59 = vld [vmem:[#allocation11 + $0xc8] sm:$0xf] }
 0x1d9   :  { %v5075_v26 = vor.u32 %v4337_v28, %v4066_v59  ;;  %v4279_v28 = vld [vmem:[#allocation9 + $0x10c] sm:$0xf] }
 0x1da   :  { %v1226_v18 = vadd.f32 %v1225_v45, %v1197_v53  ;;  %v1175_v45 = vadd.f32 %v1174_v4, %v1146_v35  ;;  %2092 = vmatpush.bf16.msra.mxu1 %v5065_v52  ;;  %v4324_v4 = vld [vmem:[#allocation11 + $0x6c] sm:$0xf0]  ;;  %v3842_v35 = vld [vmem:[#allocation9 + $0x108] sm:$0xf] }
 0x1db   :  { %2117 = vmatpush.bf16.msra.mxu0 %v5075_v26 }
 0x1dc   :  { %v1246_v7 = vmax.f32 %v1226_v18, 0.0 }
 0x1de   :  { %2093 = vmatpush.bf16.msra.mxu1 %v5073_v60 }
 0x1df   :  { %v1198_v1 = vpop.f32.mrf.mxu0  ;;  %2118 = vmatpush.bf16.msra.mxu0 %v5088_v21 }
 0x1e0   :  { %v1199_v3 = vadd.f32 %v1198_v1, %v1170_v51  ;;  %v1230_v31 = vpop.f32.mrf.mxu2  ;;  %v3874_v51 = vld [vmem:[#allocation9 + $0x148] sm:$0xf]  ;;  %v4291_v1 = vld [vmem:[#allocation9 + $0x16c] sm:$0xf]  ;;  %v1179_v18 = vpop.f32.mrf.mxu3 }
 0x1e2   :  { %v1228_v32 = vadd.f32 %v1227_v54, %v1199_v3 }
 0x1e4   :  { %v1248_v6 = vmax.f32 %v1228_v32, 0.0  ;;  %v4010_v32 = vld [vmem:[#allocation11 + $0x60] sm:$0xf] }
 0x1e5   :  { %v5084_v10 = vor.u32 %v4324_v4, %v4010_v32 }
 0x1e6   :  { %v5051_v9 = vpack.c.bf16 %v1248_v6, %v1246_v7  ;;  %v1149_v7 = vadd.f32 %v1148_v8, %v5043_v19  ;;  %v3895_v6 = vor.u32 %v4291_v1, %v3892_v0  ;;  %v3879_v8 = vor.u32 %v4287_v22, %v3876_v30  ;;  %v4338_v22 = vld [vmem:[#allocation11 + $0xe4] sm:$0xf] }
 0x1e7   :  { %v1201_v17 = vpop.f32.mrf.mxu0  ;;  %2094 = vmatpush.bf16.msra.mxu1 %v5084_v10 }
 0x1e8   :  { %1700 = vmatmul.bf16.vlgmr.msrb.gmra.mxu3 %v5051_v9  ;;  %1758 = vmatmul.bf16.vlgmr.msra.gmra.mxu2 %v5051_v9  ;;  %v1232_v50 = vpop.f32.mrf.mxu2  ;;  %v1202_v36 = vadd.f32 %v1201_v17, %v1173_v33  ;;  %v3858_v17 = vld [vmem:[#allocation9 + $0x128] sm:$0xf]  ;;  %v1178_v23 = vadd.f32 %v1177_v2, %v1149_v7  ;;  %v4320_v33 = vld [vmem:[#allocation11 + $0x4c] sm:$0xf0]  ;;  %v4281_v2 = vld [vmem:[#allocation9 + $0x114] sm:$0xf0] }
 0x1e9   :  { %1787 = vmatmul.bf16.vlgmr.msrb.gmra.mxu1 %v5000_v44  ;;  %1845 = vmatmul.bf16.vlgmr.msrb.gmra.mxu0 %v5000_v44  ;;  %v3908_v44 = vld [vmem:[#allocation9 + $0x198] sm:$0xf0]  ;;  %v3859_v16 = vor.u32 %v4285_v27, %v3858_v17  ;;  %v3843_v46 = vor.u32 %v4281_v2, %v3842_v35  ;;  %v4060_v2 = vld [vmem:[#allocation11 + $0xd0] sm:$0xf0] }
 0x1ea   :  { %v3911_v37 = vor.u32 %v4295_v43, %v3908_v44  ;;  %v1231_v47 = vadd.f32 %v1230_v31, %v1202_v36  ;;  %v3875_v31 = vor.u32 %v4289_v63, %v3874_v51  ;;  %v1151_v36 = vadd.f32 %v1150_v61, %v5043_v19  ;;  %v3860_v44 = vld [vmem:[#allocation9 + $0x138] sm:$0xf0]  ;;  %v3962_v51 = vld [vmem:[#allocation11] sm:$0xf] }
 0x1eb   :  { %v3863_v39 = vor.u32 %v4283_v15, %v3860_v44  ;;  %v3844_v61 = vld [vmem:[#allocation9 + $0x118] sm:$0xf0]  ;;  %v4339_v15 = vld [vmem:[#allocation11 + $0xec] sm:$0xf] }
 0x1ec   :  { %1869 = vmatpush.bf16.msrb.mxu2 %v3911_v37  ;;  %v1250_v25 = vmax.f32 %v1231_v47, 0.0  ;;  %1813 = vmatpush.bf16.msra.mxu3 %v3875_v31  ;;  %v4316_v37 = vld [vmem:[#allocation11 + $0x2c] sm:$0xf0]  ;;  %v4325_v47 = vld [vmem:[#allocation11 + $0x74] sm:$0xf0] }
 0x1ed   :  { %v5101_v56 = vor.u32 %v4325_v47, %v4018_v12  ;;  %v4002_v31 = vld [vmem:[#allocation11 + $0x48] sm:$0xf] }
 0x1ef   :  { %v1203_v20 = vpop.f32.mrf.mxu0 }
 0x1f0   :  { %v1204_v48 = vadd.f32 %v1203_v20, %v1175_v45  ;;  %v5069_v54 = vpop.f32.mrf.mxu2  ;;  %1870 = vmatpush.bf16.msrb.mxu2 %v3895_v6  ;;  %v3978_v45 = vld [vmem:[#allocation11 + $0x20] sm:$0xf]  ;;  %v1180_v20 = vadd.f32 %v1179_v18, %v1151_v36  ;;  %1814 = vmatpush.bf16.msra.mxu3 %v3859_v16  ;;  %v3847_v18 = vor.u32 %v4279_v28, %v3844_v61  ;;  %v4326_v61 = vld [vmem:[#allocation11 + $0x84] sm:$0xf] }
 0x1f2   :  { %v1233_v58 = vadd.f32 %v1232_v50, %v1204_v48  ;;  %v3994_v50 = vld [vmem:[#allocation11 + $0x40] sm:$0xf]  ;;  %v1153_v48 = vpop.f32.mrf.mxu1 }
 0x1f3   :  { %v5092_v5 = vor.u32 %v4320_v33, %v3994_v50  ;;  %v1154_v17 = vadd.f32 %v1153_v48, %v5043_v19  ;;  %v5121_v50 = vor.u32 %v4317_v13, %v3986_v11  ;;  %v4012_v11 = vld [vmem:[#allocation11 + $0x70] sm:$0xf0]  ;;  %v4327_v13 = vld [vmem:[#allocation11 + $0x8c] sm:$0xf] }
 0x1f4   :  { %v1252_v53 = vmax.f32 %v1233_v58, 0.0  ;;  %1871 = vmatpush.bf16.msrb.mxu2 %v3879_v8  ;;  %v5099_v58 = vor.u32 %v4316_v37, %v3978_v45  ;;  %1815 = vmatpush.bf16.msra.mxu3 %v3843_v46  ;;  %v3970_v8 = vld [vmem:[#allocation11 + $0x8] sm:$0xf]  ;;  %v4084_v45 = vld [vmem:[#allocation11 + $0xf8] sm:$0xf0] }
 0x1f5   :  { %2095 = vmatpush.bf16.msra.mxu1 %v5092_v5 }
 0x1f6   :  { %v5077_v62 = vpack.c.bf16 %v1252_v53, %v1250_v25  ;;  %v1182_v25 = vpop.f32.mrf.mxu3 }
 0x1f7   :  { %v1206_v3 = vpop.f32.mrf.mxu0  ;;  %v1183_v16 = vadd.f32 %v1182_v25, %v1154_v17 }
 0x1f8   :  { %1705 = vmatmul.bf16.gmra.mxu3 %v5077_v62  ;;  %1763 = vmatmul.bf16.gmra.mxu2 %v5077_v62  ;;  %v1207_v38 = vadd.f32 %v1206_v3, %v1178_v23  ;;  %v1237_v43 = vpop.f32.mrf.mxu2  ;;  %v4312_v3 = vld [vmem:[#allocation11 + $0xc] sm:$0xf0]  ;;  %v4076_v23 = vld [vmem:[#allocation11 + $0xf0] sm:$0xf0] }
 0x1f9   :  { %1792 = vmatmul.bf16.gmra.mxu1 %v5017_v14  ;;  %1850 = vmatmul.bf16.gmra.mxu0 %v5017_v14  ;;  %v4034_v14 = vld [vmem:[#allocation11 + $0x88] sm:$0xf]  ;;  %v5106_v0 = vor.u32 %v4312_v3, %v3962_v51  ;;  %v5119_v30 = vor.u32 %v4338_v22, %v4076_v23  ;;  %v4028_v51 = vld [vmem:[#allocation11 + $0x90] sm:$0xf0]  ;;  %v1927_v3 = vld [vmem:[%s5881_s8] sm:$0xff] }
 0x1fa   :  { %v5095_v40 = vor.u32 %v4329_v34, %v4034_v14  ;;  %v1236_v55 = vadd.f32 %v5069_v54, %v1207_v38  ;;  %1872 = vmatpush.bf16.msrb.mxu2 %v3863_v39  ;;  %2096 = vmatpush.bf16.msra.mxu1 %v5099_v58  ;;  %v4321_v54 = vld [vmem:[#allocation11 + $0x54] sm:$0xf0]  ;;  %v1155_v27 = vpop.f32.mrf.mxu1  ;;  %v4334_v38 = vld [vmem:[#allocation11 + $0xc4] sm:$0xf] }
 0x1fb   :  { %v5110_v4 = vor.u32 %v4321_v54, %v4002_v31  ;;  %v4313_v14 = vld [vmem:[#allocation11 + $0x14] sm:$0xf0]  ;;  %v1156_v34 = vadd.f32 %v1155_v27, %v5043_v19  ;;  %2103 = vmatpush.bf16.msrb.mxu3 %v5119_v30  ;;  %v5130_v44 = vor.u32 %v4334_v38, %v4060_v2  ;;  %v5132_v19 = vor.u32 %v4339_v15, %v4084_v45  ;;  %v4036_v27 = vld [vmem:[#allocation11 + $0x98] sm:$0xf0] }
 0x1fc   :  { %2119 = vmatpush.bf16.msra.mxu0 %v5095_v40  ;;  %v1254_v63 = vmax.f32 %v1236_v55, 0.0  ;;  %v5127_v36 = vor.u32 %v4313_v14, %v3970_v8  ;;  %v4044_v55 = vld [vmem:[#allocation11 + $0xb0] sm:$0xf0]  ;;  %v5181_v22 = vor.u32 %v4327_v13, %v4036_v27  ;;  %v4323_v8 = vld [vmem:[#allocation11 + $0x6c] sm:$0xf] }
 0x1fe   :  { %1873 = vmatpush.bf16.msrb.mxu2 %v3847_v18  ;;  %2097 = vmatpush.bf16.msra.mxu1 %v5106_v0  ;;  %v1184_v33 = vpop.f32.mrf.mxu3  ;;  %5897 = vst [vmem:[#allocation17_spill] sm:$0xff] %v5127_v36  ;;  %v4052_v18 = vld [vmem:[#allocation11 + $0xb8] sm:$0xf0] }
 0x1ff   :  { %v1208_v42 = vpop.f32.mrf.mxu0  ;;  %2104 = vmatpush.bf16.msrb.mxu3 %v5130_v44 }
 0x200   :  { %v1209_v59 = vadd.f32 %v1208_v42, %v1180_v20  ;;  %2120 = vmatpush.bf16.msra.mxu0 %v5101_v56  ;;  %v1240_v7 = vpop.f32.mrf.mxu2  ;;  %v4330_v42 = vld [vmem:[#allocation11 + $0xa4] sm:$0xf] }
 0x201   :  { %v5147_v25 = vor.u32 %v4330_v42, %v4044_v55 }
 0x202   :  { %v1238_v53 = vadd.f32 %v1237_v43, %v1209_v59  ;;  %2211 = vmatpush.bf16.msrb.mxu1 %v5056_v24  ;;  %2129 = vmatpush.bf16.msra.mxu2 %v5132_v19  ;;  %v4335_v59 = vld [vmem:[#allocation11 + $0xcc] sm:$0xf] }
 0x203   :  { %2105 = vmatpush.bf16.msrb.mxu3 %v5147_v25 }
 0x204   :  { %v1256_v1 = vmax.f32 %v1238_v53, 0.0  ;;  %2121 = vmatpush.bf16.msra.mxu0 %v5110_v4  ;;  %v4068_v53 = vld [vmem:[#allocation11 + $0xd8] sm:$0xf0] }
 0x205   :  { %v5149_v28 = vor.u32 %v4335_v59, %v4068_v53  ;;  %v3964_v53 = vld [vmem:[#allocation11 + $0x10] sm:$0xf0] }
 0x206   :  { %v5108_v32 = vpack.c.bf16 %v1256_v1, %v1254_v63  ;;  %2212 = vmatpush.bf16.msrb.mxu1 %v5062_v41  ;;  %v4331_v63 = vld [vmem:[#allocation11 + $0xac] sm:$0xf]  ;;  %v5155_v1 = vor.u32 %v4326_v61, %v4028_v51 }
 0x207   :  { %v1211_v6 = vpop.f32.mrf.mxu0  ;;  %2130 = vmatpush.bf16.msra.mxu2 %v5149_v28  ;;  %v4315_v61 = vld [vmem:[#allocation11 + $0x2c] sm:$0xf] }
 0x208   :  { %1710 = vmatmul.bf16.gmra.mxu3 %v5108_v32  ;;  %1768 = vmatmul.bf16.gmra.mxu2 %v5108_v32  ;;  %v1212_v35 = vadd.f32 %v1211_v6, %v1183_v16  ;;  %v1242_v46 = vpop.f32.mrf.mxu2  ;;  %v4322_v6 = vld [vmem:[#allocation11 + $0x64] sm:$0xf] }
 0x209   :  { %1797 = vmatmul.bf16.gmra.mxu1 %v5032_v29  ;;  %1855 = vmatmul.bf16.gmra.mxu0 %v5032_v29  ;;  %v1185_v29 = vadd.f32 %v1184_v33, %v1156_v34  ;;  %v5179_v17 = vor.u32 %v4322_v6, %v4012_v11  ;;  %v4318_v16 = vld [vmem:[#allocation11 + $0x44] sm:$0xf]  ;;  %v3996_v33 = vld [vmem:[#allocation11 + $0x50] sm:$0xf0]  ;;  %v4020_v34 = vld [vmem:[#allocation11 + $0x78] sm:$0xf0] }
 0x20a   :  { %2122 = vmatpush.bf16.msra.mxu0 %v5121_v50  ;;  %v1241_v37 = vadd.f32 %v1240_v7, %v1212_v35  ;;  %2213 = vmatpush.bf16.msrb.mxu1 %v5065_v52  ;;  %v5172_v7 = vpack.c.bf16 %v1927_v3, %v1927_v3  ;;  %v5192_v14 = vor.u32 %v4318_v16, %v3996_v33  ;;  %v4311_v3 = vld [vmem:[#allocation11 + $0xc] sm:$0xf]  ;;  %v3972_v6 = vld [vmem:[#allocation11 + $0x18] sm:$0xf0] }
 0x20b   :  { %2106 = vmatpush.bf16.msrb.mxu3 %v5155_v1  ;;  %v5195_v35 = vor.u32 %v4323_v8, %v4020_v34  ;;  %v5245_v11 = vor.u32 %v4311_v3, %v3972_v6 }
 0x20c   :  { %v1258_v12 = vmax.f32 %v1241_v37, 0.0 }
 0x20d   :  { %5905 = vst [vmem:[#allocation25_spill] sm:$0xff] %v5245_v11 }
 0x20e   :  { %2123 = vmatpush.bf16.msra.mxu0 %v5127_v36  ;;  %2214 = vmatpush.bf16.msrb.mxu1 %v5073_v60 }
 0x20f   :  { %v1213_v43 = vpop.f32.mrf.mxu0  ;;  %2107 = vmatpush.bf16.msrb.mxu3 %v5179_v17 }
 0x210   :  { %v1214_v20 = vadd.f32 %v1213_v43, %v1185_v29  ;;  %v5202_v29 = vld [vmem:[%s5880_s7] sm:$0xf]  ;;  %s4690_s7 = smov [#allocation12]  }
 0x211   :  { %v5207_v38 = vperm.slane %v5202_v29, 0  ;;  %v5210_v2 = vperm.slane %v5202_v29, 1  ;;  %s3320_s20 = sshll.u32 %s4690_s7, 4  ;;  %s3321_s20 = int_to_ptr.vmem [resolvable:$true] %s3320_s20 }
 0x212   :  { %v1243_v39 = vadd.f32 %v1242_v46, %v1214_v20  ;;  %2237 = vmatpush.bf16.msrb.mxu0 %v5067_v57  ;;  %2215 = vmatpush.bf16.msrb.mxu1 %v5084_v10  ;;  %v4314_v20 = vld [vmem:[#allocation11 + $0x24] sm:$0xf]  ;;  %v3980_v46 = vld [vmem:[#allocation11 + $0x30] sm:$0xf0] }
 0x213   :  { %2108 = vmatpush.bf16.msrb.mxu3 %v5192_v14  ;;  %5900 = vst [vmem:[#allocation20_spill] sm:$0xff] %v5207_v38 }
 0x214   :  { %v1260_v47 = vmax.f32 %v1243_v39, 0.0  ;;  %5901 = vst [vmem:[#allocation21_spill] sm:$0xff] %v5210_v2  ;;  %v4319_v39 = vld [vmem:[#allocation11 + $0x4c] sm:$0xf] }
 0x216   :  { %v5139_v48 = vpack.c.bf16 %v1260_v47, %v1258_v12  ;;  %2238 = vmatpush.bf16.msrb.mxu0 %v5075_v26  ;;  %2216 = vmatpush.bf16.msrb.mxu1 %v5092_v5  ;;  %v5222_v12 = vor.u32 %v4314_v20, %v3980_v46  ;;  %v4004_v47 = vld [vmem:[#allocation11 + $0x58] sm:$0xf0] }
 0x217   :  { %v5226_v42 = vor.u32 %v4319_v39, %v4004_v47 }
 0x218   :  { %1715 = vmatmul.bf16.gmra.mxu3 %v5139_v48  ;;  %1773 = vmatmul.bf16.gmra.mxu2 %v5139_v48 }
 0x219   :  { %1802 = vmatmul.bf16.gmra.mxu1 %v5045_v49  ;;  %1860 = vmatmul.bf16.gmra.mxu0 %v5045_v49  ;;  %v5158_v49 = vor.u32 %v4331_v63, %v4052_v18  ;;  %v3988_v63 = vld [vmem:[#allocation11 + $0x38] sm:$0xf0] }
 0x21a   :  { %2239 = vmatpush.bf16.msrb.mxu0 %v5088_v21  ;;  %2217 = vmatpush.bf16.msrb.mxu1 %v5099_v58  ;;  %v5238_v18 = vor.u32 %v4315_v61, %v3988_v63 }
 0x21b   :  { %2131 = vmatpush.bf16.msra.mxu2 %v5158_v49  ;;  %2109 = vmatpush.bf16.msrb.mxu3 %v5222_v12 }
 0x21e   :  { %2240 = vmatpush.bf16.msrb.mxu0 %v5095_v40  ;;  %2218 = vmatpush.bf16.msrb.mxu1 %v5106_v0 }
 0x21f   :  { %2132 = vmatpush.bf16.msra.mxu2 %v5181_v22 }
 0x222   :  { %2241 = vmatpush.bf16.msrb.mxu0 %v5101_v56 }
 0x223   :  { %2133 = vmatpush.bf16.msra.mxu2 %v5195_v35 }
 0x225   :  { %v5168_v31 = vpop.f32.mrf.mxu1  ;;  %v5170_v54 = vpop.f32.mrf.mxu0 }
 0x226   :  { %2242 = vmatpush.bf16.msrb.mxu0 %v5110_v4 }
 0x227   :  { %2134 = vmatpush.bf16.msra.mxu2 %v5226_v42 }
 0x228   :  { %1816 = vmatmul.bf16.vlgmr.msra.gmra.mxu3 %v5051_v9  ;;  %1874 = vmatmul.bf16.vlgmr.msrb.gmra.mxu2 %v5051_v9 }
 0x229   :  { %2098 = vmatmul.bf16.vlgmr.msra.gmra.mxu1 %v5172_v7  ;;  %2124 = vmatmul.bf16.vlgmr.msra.gmra.mxu0 %v5172_v7 }
 0x22a   :  { %2243 = vmatpush.bf16.msrb.mxu0 %v5121_v50  ;;  %2332 = vmatpush.bf16.msra.mxu1 %v5056_v24 }
 0x22b   :  { %2135 = vmatpush.bf16.msra.mxu2 %v5238_v18 }
 0x22d   :  { %v5188_v9 = vpop.f32.mrf.mxu1  ;;  %v5190_v23 = vpop.f32.mrf.mxu0 }
 0x22e   :  { %5898 = vst [vmem:[#allocation18_spill] sm:$0xff] %v5188_v9  ;;  %2244 = vmatpush.bf16.msrb.mxu0 %v5127_v36  ;;  %2333 = vmatpush.bf16.msra.mxu1 %v5062_v41 }
 0x22f   :  { %5899 = vst [vmem:[#allocation19_spill] sm:$0xff] %v5190_v23  ;;  %2136 = vmatpush.bf16.msra.mxu2 %v5245_v11 }
 0x232   :  { %2358 = vmatpush.bf16.msra.mxu0 %v5067_v57  ;;  %2334 = vmatpush.bf16.msra.mxu1 %v5065_v52 }
 0x233   :  { %2250 = vmatpush.bf16.msrb.mxu2 %v5132_v19 }
 0x235   :  { %v1677_v15 = vpop.f32.mrf.mxu1  ;;  %v1735_v43 = vpop.f32.mrf.mxu0 }
 0x236   :  { %2359 = vmatpush.bf16.msra.mxu0 %v5075_v26  ;;  %v5215_v45 = vadd.f32 %v1677_v15, %v5207_v38  ;;  %v5218_v37 = vadd.f32 %v1735_v43, %v5210_v2  ;;  %2335 = vmatpush.bf16.msra.mxu1 %v5073_v60 }
 0x237   :  { %2251 = vmatpush.bf16.msrb.mxu2 %v5149_v28 }
 0x238   :  { %1821 = vmatmul.bf16.gmra.mxu3 %v5077_v62  ;;  %1879 = vmatmul.bf16.gmra.mxu2 %v5077_v62  ;;  %v4310_v62 = vld [vmem:[#allocation11 + $0x4] sm:$0xf] }
 0x239   :  { %v5236_v51 = vor.u32 %v4310_v62, %v3964_v53  ;;  %v1731_v53 = vadd.f32 %v5170_v54, %v5210_v2 }
 0x23a   :  { %2360 = vmatpush.bf16.msra.mxu0 %v5088_v21  ;;  %2336 = vmatpush.bf16.msra.mxu1 %v5084_v10 }
 0x23b   :  { %5904 = vst [vmem:[#allocation24_spill] sm:$0xff] %v5236_v51  ;;  %2110 = vmatpush.bf16.msrb.mxu3 %v5236_v51  ;;  %2252 = vmatpush.bf16.msrb.mxu2 %v5158_v49 }
 0x23d   :  { %v5230_v55 = vpop.f32.mrf.mxu1  ;;  %v5232_v59 = vpop.f32.mrf.mxu0 }
 0x23e   :  { %5902 = vst [vmem:[#allocation22_spill] sm:$0xff] %v5230_v55  ;;  %2361 = vmatpush.bf16.msra.mxu0 %v5095_v40  ;;  %2337 = vmatpush.bf16.msra.mxu1 %v5092_v5 }
 0x23f   :  { %5903 = vst [vmem:[#allocation23_spill] sm:$0xff] %v5232_v59  ;;  %2224 = vmatpush.bf16.msra.mxu3 %v5119_v30  ;;  %2253 = vmatpush.bf16.msrb.mxu2 %v5181_v22 }
 0x242   :  { %2362 = vmatpush.bf16.msra.mxu0 %v5101_v56  ;;  %2338 = vmatpush.bf16.msra.mxu1 %v5099_v58 }
 0x243   :  { %2225 = vmatpush.bf16.msra.mxu3 %v5130_v44  ;;  %2254 = vmatpush.bf16.msrb.mxu2 %v5195_v35 }
 0x245   :  { %v1682_v13 = vpop.f32.mrf.mxu1  ;;  %v1740_v27 = vpop.f32.mrf.mxu0 }
 0x246   :  { %2363 = vmatpush.bf16.msra.mxu0 %v5110_v4  ;;  %v5249_v16 = vadd.f32 %v1682_v13, %v5207_v38  ;;  %v5252_v33 = vadd.f32 %v1740_v27, %v5210_v2  ;;  %2339 = vmatpush.bf16.msra.mxu1 %v5106_v0  ;;  %v5309_v13 = vperm.slane %v5202_v29, 3 }
 0x247   :  { %2226 = vmatpush.bf16.msra.mxu3 %v5147_v25  ;;  %2255 = vmatpush.bf16.msrb.mxu2 %v5226_v42 }
 0x248   :  { %1826 = vmatmul.bf16.gmra.mxu3 %v5108_v32  ;;  %1884 = vmatmul.bf16.gmra.mxu2 %v5108_v32 }
 0x24a   :  { %2364 = vmatpush.bf16.msra.mxu0 %v5121_v50 }
 0x24b   :  { %2227 = vmatpush.bf16.msra.mxu3 %v5155_v1  ;;  %2256 = vmatpush.bf16.msrb.mxu2 %v5238_v18 }
 0x24d   :  { %v5264_v8 = vpop.f32.mrf.mxu1  ;;  %v5266_v34 = vpop.f32.mrf.mxu0 }
 0x24e   :  { %5906 = vst [vmem:[#allocation26_spill] sm:$0xff] %v5264_v8  ;;  %2365 = vmatpush.bf16.msra.mxu0 %v5127_v36 }
 0x24f   :  { %5907 = vst [vmem:[#allocation27_spill] sm:$0xff] %v5266_v34  ;;  %2228 = vmatpush.bf16.msra.mxu3 %v5179_v17  ;;  %2257 = vmatpush.bf16.msrb.mxu2 %v5245_v11 }
 0x253   :  { %2229 = vmatpush.bf16.msra.mxu3 %v5192_v14 }
 0x255   :  { %v1687_v32 = vpop.f32.mrf.mxu1  ;;  %v1745_v15 = vpop.f32.mrf.mxu0 }
 0x256   :  { %v5274_v43 = vadd.f32 %v1687_v32, %v5207_v38  ;;  %v5277_v20 = vadd.f32 %v1745_v15, %v5210_v2  ;;  %v5325_v15 = vperm.slane %v5202_v29, 2 }
 0x257   :  { %2230 = vmatpush.bf16.msra.mxu3 %v5222_v12 }
 0x258   :  { %1831 = vmatmul.bf16.gmra.mxu3 %v5139_v48  ;;  %1889 = vmatmul.bf16.gmra.mxu2 %v5139_v48  ;;  %v1673_v48 = vadd.f32 %v5168_v31, %v5207_v38 }
 0x25b   :  { %2231 = vmatpush.bf16.msra.mxu3 %v5236_v51 }
 0x25d   :  { %v5285_v46 = vpop.f32.mrf.mxu1  ;;  %v5287_v39 = vpop.f32.mrf.mxu0 }
 0x25e   :  { %5908 = vst [vmem:[#allocation28_spill] sm:$0xff] %v5285_v46 }
 0x25f   :  { %5909 = vst [vmem:[#allocation29_spill] sm:$0xff] %v5287_v39 }
 0x266   :  { %v5292_v47 = vpop.f32.mrf.mxu1  ;;  %v5294_v62 = vpop.f32.mrf.mxu0 }
 0x268   :  { %2111 = vmatmul.bf16.vlgmr.msrb.gmra.mxu3 %v5172_v7  ;;  %2137 = vmatmul.bf16.vlgmr.msra.gmra.mxu2 %v5172_v7 }
 0x269   :  { %2345 = vmatpush.bf16.msrb.mxu3 %v5119_v30  ;;  %2371 = vmatpush.bf16.msra.mxu2 %v5132_v19 }
 0x26b   :  { %v1701_v61 = vpop.f32.mrf.mxu3  ;;  %v1759_v63 = vpop.f32.mrf.mxu2 }
 0x26c   :  { %v5304_v3 = vadd.f32 %v1701_v61, %v1673_v48  ;;  %v5306_v6 = vadd.f32 %v1759_v63, %v1731_v53 }
 0x26d   :  { %2346 = vmatpush.bf16.msrb.mxu3 %v5130_v44  ;;  %2372 = vmatpush.bf16.msra.mxu2 %v5149_v28 }
 0x26e   :  { %v5313_v7 = vpop.f32.mrf.mxu1  ;;  %v1848_v27 = vpop.f32.mrf.mxu0 }
 0x26f   :  { %v5316_v31 = vadd.f32 %v1848_v27, %v5309_v13 }
 0x271   :  { %2347 = vmatpush.bf16.msrb.mxu3 %v5147_v25  ;;  %2373 = vmatpush.bf16.msra.mxu2 %v5158_v49 }
 0x273   :  { %v5320_v54 = vpop.f32.mrf.mxu3  ;;  %v5322_v32 = vpop.f32.mrf.mxu2 }
 0x274   :  { %5910 = vst [vmem:[#allocation30_spill] sm:$0xff] %v5320_v54 }
 0x275   :  { %5911 = vst [vmem:[#allocation31_spill] sm:$0xff] %v5322_v32  ;;  %2348 = vmatpush.bf16.msrb.mxu3 %v5155_v1  ;;  %2374 = vmatpush.bf16.msra.mxu2 %v5181_v22 }
 0x276   :  { %v1793_v48 = vpop.f32.mrf.mxu1  ;;  %v1851_v53 = vpop.f32.mrf.mxu0 }
 0x277   :  { %v5330_v61 = vadd.f32 %v1793_v48, %v5325_v15  ;;  %v5333_v63 = vadd.f32 %v1851_v53, %v5309_v13 }
 0x279   :  { %2349 = vmatpush.bf16.msrb.mxu3 %v5179_v17  ;;  %2375 = vmatpush.bf16.msra.mxu2 %v5195_v35 }
 0x27b   :  { %v1706_v27 = vpop.f32.mrf.mxu3  ;;  %v1764_v39 = vpop.f32.mrf.mxu2 }
 0x27c   :  { %v5338_v29 = vadd.f32 %v1706_v27, %v5215_v45  ;;  %v5341_v46 = vadd.f32 %v1764_v39, %v5218_v37 }
 0x27d   :  { %2350 = vmatpush.bf16.msrb.mxu3 %v5192_v14  ;;  %2376 = vmatpush.bf16.msra.mxu2 %v5226_v42 }
 0x27e   :  { %5912 = vst [vmem:[#allocation32_spill] sm:$0xff] %v5338_v29  ;;  %v5345_v48 = vpop.f32.mrf.mxu1  ;;  %v1853_v53 = vpop.f32.mrf.mxu0 }
 0x27f   :  { %5913 = vst [vmem:[#allocation33_spill] sm:$0xff] %v5341_v46  ;;  %v5348_v34 = vadd.f32 %v1853_v53, %v5309_v13 }
 0x281   :  { %2351 = vmatpush.bf16.msrb.mxu3 %v5222_v12  ;;  %2377 = vmatpush.bf16.msra.mxu2 %v5238_v18 }
 0x283   :  { %v5352_v8 = vpop.f32.mrf.mxu3  ;;  %v5354_v45 = vpop.f32.mrf.mxu2 }
 0x284   :  { %5914 = vst [vmem:[#allocation34_spill] sm:$0xff] %v5352_v8 }
 0x285   :  { %5915 = vst [vmem:[#allocation35_spill] sm:$0xff] %v5354_v45  ;;  %2352 = vmatpush.bf16.msrb.mxu3 %v5236_v51  ;;  %2378 = vmatpush.bf16.msra.mxu2 %v5245_v11 }
 0x286   :  { %v1798_v37 = vpop.f32.mrf.mxu1  ;;  %v1856_v39 = vpop.f32.mrf.mxu0 }
 0x287   :  { %v5359_v27 = vadd.f32 %v1798_v37, %v5325_v15  ;;  %v5362_v53 = vadd.f32 %v1856_v39, %v5309_v13 }
 0x28b   :  { %v1711_v59 = vpop.f32.mrf.mxu3  ;;  %v1769_v55 = vpop.f32.mrf.mxu2 }
 0x28c   :  { %v5365_v46 = vadd.f32 %v1711_v59, %v5249_v16  ;;  %v5368_v8 = vadd.f32 %v1769_v55, %v5252_v33 }
 0x28e   :  { %5916 = vst [vmem:[#allocation36_spill] sm:$0xff] %v5365_v46  ;;  %v5370_v45 = vpop.f32.mrf.mxu1  ;;  %v1858_v29 = vpop.f32.mrf.mxu0 }
 0x28f   :  { %5917 = vst [vmem:[#allocation37_spill] sm:$0xff] %v5368_v8  ;;  %v5373_v32 = vadd.f32 %v1858_v29, %v5309_v13 }
 0x293   :  { %v5375_v23 = vpop.f32.mrf.mxu3  ;;  %v5377_v37 = vpop.f32.mrf.mxu2 }
 0x294   :  { %5918 = vst [vmem:[#allocation38_spill] sm:$0xff] %v5375_v23 }
 0x295   :  { %5919 = vst [vmem:[#allocation39_spill] sm:$0xff] %v5377_v37 }
 0x296   :  { %v1803_v39 = vpop.f32.mrf.mxu1  ;;  %v1861_v2 = vpop.f32.mrf.mxu0 }
 0x297   :  { %v5380_v54 = vadd.f32 %v1803_v39, %v5325_v15  ;;  %v5383_v59 = vadd.f32 %v1861_v2, %v5309_v13 }
 0x29b   :  { %v1716_v55 = vpop.f32.mrf.mxu3  ;;  %v1774_v16 = vpop.f32.mrf.mxu2 }
 0x29c   :  { %v5386_v33 = vadd.f32 %v1716_v55, %v5274_v43  ;;  %v5389_v29 = vadd.f32 %v1774_v16, %v5277_v20  ;;  %v1789_v43 = vadd.f32 %v5292_v47, %v5325_v15  ;;  %v1847_v20 = vadd.f32 %v5294_v62, %v5309_v13 }
 0x29e   :  { %5920 = vst [vmem:[#allocation40_spill] sm:$0xff] %v5386_v33  ;;  %v5391_v8 = vpop.f32.mrf.mxu1  ;;  %v1863_v23 = vpop.f32.mrf.mxu0 }
 0x29f   :  { %5921 = vst [vmem:[#allocation41_spill] sm:$0xff] %v5389_v29  ;;  %v5394_v37 = vadd.f32 %v1863_v23, %v5309_v13 }
 0x2a3   :  { %v5396_v46 = vpop.f32.mrf.mxu3  ;;  %v5398_v39 = vpop.f32.mrf.mxu2 }
 0x2a4   :  { %5922 = vst [vmem:[#allocation42_spill] sm:$0xff] %v5396_v46 }
 0x2a5   :  { %5923 = vst [vmem:[#allocation43_spill] sm:$0xff] %v5398_v39 }
 0x2a6   :  { %v2099_v2 = vpop.f32.mrf.mxu1  ;;  %v2125_v9 = vpop.f32.mrf.mxu0 }
 0x2a7   :  { %v2142_v38 = vadd.f32 %v2099_v2, %v5304_v3  ;;  %v1791_v3 = vadd.f32 %v5313_v7, %v5325_v15 }
 0x2a9   :  { %v4088_v11 = vmul.f32 -1.442695, %v2142_v38 }
 0x2ab   :  { %4368 = vpow2.f32 %v4088_v11  ;;  %v1817_v55 = vpop.f32.mrf.mxu3  ;;  %v1875_v16 = vpop.f32.mrf.mxu2 }
 0x2ac   :  { %v1818_v23 = vadd.f32 %v1817_v55, %v1789_v43  ;;  %v1876_v29 = vadd.f32 %v1875_v16, %v1847_v20 }
 0x2ae   :  { %v2144_v33 = vadd.f32 %v2125_v9, %v1818_v23  ;;  %v2101_v46 = vpop.f32.mrf.mxu1  ;;  %v2127_v36 = vpop.f32.mrf.mxu0 }
 0x2b1   :  { %v4369_v39 = vpop.eup %4368 }
 0x2b2   :  { %v2149_v51 = vadd.f32 1.0, %v4369_v39 }
 0x2b3   :  { %v1819_v38 = vpop.f32.mrf.mxu3  ;;  %v1877_v2 = vpop.f32.mrf.mxu2 }
 0x2b4   :  { %4370 = vrcp.f32 %v2149_v51  ;;  %v5407_v47 = vadd.f32 %v1819_v38, %v1791_v3  ;;  %v5410_v62 = vadd.f32 %v1877_v2, %v5316_v31  ;;  %v2161_v7 = vand.u32 2147483648, %v2149_v51 }
 0x2b5   :  { %4372 = vtanh.f32 %v2144_v33  ;;  %v2159_v55 = vand.u32 2147483647, %v2149_v51  ;;  %vm2155_vm5 = vweird.f32 %v2149_v51  ;;  %v1796_v31 = vadd.f32 %v5345_v48, %v5325_v15 }
 0x2b6   :  { %v2162_v23 = vor.u32 1.1754944e-38, %v2161_v7 }
 0x2b7   :  { %vm2160_vm7 = vcmp.eq.f32.partialorder %v2159_v55, 8.507059e+37 }
 0x2ba   :  { %v4371_v11 = vpop.eup %4370 }
 0x2bb   :  { %v2151_v13 = vmul.f32 %v4371_v11, %v2149_v51  ;;  %v1822_v43 = vpop.f32.mrf.mxu3  ;;  %v1880_v20 = vpop.f32.mrf.mxu2  ;;  %vm2156_vm4 = vweird.f32 %v4371_v11 }
 0x2bc   :  { %v5413_v9 = vadd.f32 %v1822_v43, %v5330_v61  ;;  %v5416_v36 = vadd.f32 %v1880_v20, %v5333_v63  ;;  %vm2157_vm6 = vmor %vm2155_vm5, %vm2156_vm4  ;;  %v4373_v2 = vpop.eup %4372 }
 0x2bd   :  { %v2152_v46 = vsub.f32 1.0, %v2151_v13 }
 0x2bf   :  { %v2153_v39 = vmul.f32 %v4371_v11, %v2152_v46 }
 0x2c1   :  { %v2154_v16 = vadd.f32 %v4371_v11, %v2153_v39 }
 0x2c3   :  { %v2158_v3 = vsel %vm2157_vm6, %v4371_v11, %v2154_v16  ;;  %v1824_v61 = vpop.f32.mrf.mxu3  ;;  %v1882_v38 = vpop.f32.mrf.mxu2  ;;  %v1801_v11 = vadd.f32 %v5370_v45, %v5325_v15 }
 0x2c4   :  { %v2163_v63 = vsel %vm2160_vm7, %v2162_v23, %v2158_v3  ;;  %v5420_v43 = vadd.f32 %v1824_v61, %v1796_v31  ;;  %v5423_v33 = vadd.f32 %v1882_v38, %v5348_v34 }
 0x2c5   :  { %v2205_v13 = vmul.f32 %v4373_v2, %v2163_v63 }
 0x2cb   :  { %v1827_v20 = vpop.f32.mrf.mxu3  ;;  %v1885_v46 = vpop.f32.mrf.mxu2 }
 0x2cc   :  { %v5426_v51 = vadd.f32 %v1827_v20, %v5359_v27  ;;  %v5429_v48 = vadd.f32 %v1885_v46, %v5362_v53  ;;  %v1806_v53 = vadd.f32 %v5391_v8, %v5325_v15 }
 0x2ce   :  { %5924 = vst [vmem:[#allocation44_spill] sm:$0xff] %v5426_v51 }
 0x2d3   :  { %v1829_v7 = vpop.f32.mrf.mxu3  ;;  %v1887_v39 = vpop.f32.mrf.mxu2 }
 0x2d4   :  { %v5433_v55 = vadd.f32 %v1829_v7, %v1801_v11  ;;  %v5436_v16 = vadd.f32 %v1887_v39, %v5373_v32 }
 0x2d6   :  { %5925 = vst [vmem:[#allocation45_spill] sm:$0xff] %v5433_v55 }
 0x2d7   :  { %5926 = vst [vmem:[#allocation46_spill] sm:$0xff] %v5436_v16 }
 0x2db   :  { %v1832_v34 = vpop.f32.mrf.mxu3  ;;  %v1890_v31 = vpop.f32.mrf.mxu2 }
 0x2dc   :  { %v5439_v23 = vadd.f32 %v1832_v34, %v5380_v54  ;;  %v5442_v27 = vadd.f32 %v1890_v31, %v5383_v59 }
 0x2de   :  { %5927 = vst [vmem:[#allocation47_spill] sm:$0xff] %v5439_v23 }
 0x2df   :  { %5928 = vst [vmem:[#allocation48_spill] sm:$0xff] %v5442_v27 }
 0x2e3   :  { %v1834_v3 = vpop.f32.mrf.mxu3  ;;  %v1892_v45 = vpop.f32.mrf.mxu2 }
 0x2e4   :  { %v5446_v61 = vadd.f32 %v1834_v3, %v1806_v53  ;;  %v5449_v38 = vadd.f32 %v1892_v45, %v5394_v37 }
 0x2e6   :  { %5929 = vst [vmem:[#allocation49_spill] sm:$0xff] %v5446_v61 }
 0x2e7   :  { %5930 = vst [vmem:[#allocation50_spill] sm:$0xff] %v5449_v38 }
 0x2eb   :  { %v2112_v32 = vpop.f32.mrf.mxu3  ;;  %v2138_v2 = vpop.f32.mrf.mxu2 }
 0x2ec   :  { %v2143_v63 = vadd.f32 %v2112_v32, %v5306_v6  ;;  %v2145_v20 = vadd.f32 %v2138_v2, %v1876_v29 }
 0x2ee   :  { %v4089_v54 = vmul.f32 -1.442695, %v2143_v63  ;;  %v4090_v46 = vmul.f32 -1.442695, %v2145_v20  ;;  %v1928_v63 = vld [vmem:[%s5882_s9] sm:$0xff] }
 0x2f0   :  { %4374 = vpow2.f32 %v4089_v54 }
 0x2f1   :  { %4376 = vpow2.f32 %v4090_v46 }
 0x2f3   :  { %v2114_v59 = vpop.f32.mrf.mxu3  ;;  %v2140_v11 = vpop.f32.mrf.mxu2 }
 0x2f6   :  { %v4375_v7 = vpop.eup %4374 }
 0x2f7   :  { %v4377_v8 = vpop.eup %4376  ;;  %v2168_v15 = vadd.f32 1.0, %v4375_v7 }
 0x2f8   :  { %v2188_v39 = vadd.f32 1.0, %v4377_v8 }
 0x2f9   :  { %4378 = vrcp.f32 %v2168_v15  ;;  %v2180_v45 = vand.u32 2147483648, %v2168_v15  ;;  %v2178_v29 = vand.u32 2147483647, %v2168_v15  ;;  %vm2174_vm9 = vweird.f32 %v2168_v15 }
 0x2fa   :  { %4380 = vrcp.f32 %v2188_v39  ;;  %vm2194_vm13 = vweird.f32 %v2188_v39 }
 0x2fb   :  { %v2181_v20 = vor.u32 1.1754944e-38, %v2180_v45  ;;  %vm2179_vm11 = vcmp.eq.f32.partialorder %v2178_v29, 8.507059e+37 }
 0x2ff   :  { %v4379_v34 = vpop.eup %4378 }
 0x300   :  { %v4381_v37 = vpop.eup %4380  ;;  %v2170_v31 = vmul.f32 %v4379_v34, %v2168_v15  ;;  %vm2175_vm8 = vweird.f32 %v4379_v34  ;;  %v2198_v15 = vand.u32 2147483647, %v2188_v39 }
 0x301   :  { %v2190_v53 = vmul.f32 %v4381_v37, %v2188_v39  ;;  %vm2176_vm10 = vmor %vm2174_vm9, %vm2175_vm8  ;;  %vm2195_vm12 = vweird.f32 %v4381_v37 }
 0x302   :  { %v2171_v3 = vsub.f32 1.0, %v2170_v31  ;;  %v2200_v31 = vand.u32 2147483648, %v2188_v39  ;;  %vm2196_vm14 = vmor %vm2194_vm13, %vm2195_vm12  ;;  %vm2199_vm15 = vcmp.eq.f32.partialorder %v2198_v15, 8.507059e+37  ;;  %v5932_v39 = vld [vmem:[#allocation17_spill] sm:$0xff] }
 0x303   :  { %v2191_v32 = vsub.f32 1.0, %v2190_v53 }
 0x304   :  { %v2172_v6 = vmul.f32 %v4379_v34, %v2171_v3  ;;  %v2201_v3 = vor.u32 1.1754944e-38, %v2200_v31  ;;  %v5938_v31 = vld [vmem:[#allocation19_spill] sm:$0xff] }
 0x305   :  { %v2192_v59 = vmul.f32 %v4381_v37, %v2191_v32  ;;  %v5934_v32 = vld [vmem:[#allocation20_spill] sm:$0xff] }
 0x306   :  { %v2173_v2 = vadd.f32 %v4379_v34, %v2172_v6 }
 0x307   :  { %v2193_v8 = vadd.f32 %v4381_v37, %v2192_v59 }
 0x308   :  { %v2177_v54 = vsel %vm2176_vm10, %v4379_v34, %v2173_v2  ;;  %v5935_v2 = vld [vmem:[#allocation18_spill] sm:$0xff] }
 0x309   :  { %v2182_v46 = vsel %vm2179_vm11, %v2181_v20, %v2177_v54  ;;  %v2197_v53 = vsel %vm2196_vm14, %v4381_v37, %v2193_v8  ;;  %v5933_v37 = vld [vmem:[#allocation25_spill] sm:$0xff]  ;;  %v5936_v20 = vld [vmem:[#allocation30_spill] sm:$0xff] }
 0x30a   :  { %v2204_v11 = vmul.f32 %v2182_v46, %v1928_v63  ;;  %v2202_v45 = vsel %vm2199_vm15, %v2201_v3, %v2197_v53  ;;  %v1675_v63 = vadd.f32 %v5935_v2, %v5934_v32  ;;  %v5937_v8 = vld [vmem:[#allocation21_spill] sm:$0xff]  ;;  %v5939_v3 = vld [vmem:[#allocation31_spill] sm:$0xff] }
 0x30b   :  { %v1733_v15 = vadd.f32 %v5938_v31, %v5937_v8 }
 0x30c   :  { %v5455_v7 = vadd.f32 %v2205_v13, %v2204_v11  ;;  %v5931_v13 = vld [vmem:[#allocation24_spill] sm:$0xff]  ;;  %v1704_v54 = vadd.f32 %v5936_v20, %v1675_v63 }
 0x30e   :  { %4382 = vtanh.f32 %v5455_v7 }
 0x314   :  { %v4383_v6 = vpop.eup %4382 }
 0x315   :  { %v2208_v34 = vmul.f32 %v4383_v6, %v2202_v45  ;;  %v1762_v6 = vadd.f32 %v5939_v3, %v1733_v15 }
 0x317   :  { %v2209_v29 = vpack.c.bf16 %v2208_v34, %v2208_v34 }
 0x319   :  { %2210 = vst [vmem:[#allocation2] sm:$0xf] %v2209_v29  ;;  %2219 = vmatmul.bf16.vlgmr.msrb.gmra.mxu1 %v2209_v29  ;;  %2232 = vmatmul.bf16.vlgmr.msra.gmra.mxu3 %v2209_v29 }
 0x31a   :  { %2245 = vmatmul.bf16.vlgmr.msrb.gmra.mxu0 %v2209_v29  ;;  %2258 = vmatmul.bf16.vlgmr.msrb.gmra.mxu2 %v2209_v29 }
 0x31b   :  { %2453 = vmatpush.bf16.msrb.mxu1 %v5056_v24  ;;  %2466 = vmatpush.bf16.msra.mxu3 %v5119_v30 }
 0x31c   :  { %2479 = vmatpush.bf16.msrb.mxu0 %v5067_v57  ;;  %2492 = vmatpush.bf16.msrb.mxu2 %v5132_v19 }
 0x31f   :  { %2454 = vmatpush.bf16.msrb.mxu1 %v5062_v41  ;;  %2467 = vmatpush.bf16.msra.mxu3 %v5130_v44 }
 0x320   :  { %2480 = vmatpush.bf16.msrb.mxu0 %v5075_v26  ;;  %2493 = vmatpush.bf16.msrb.mxu2 %v5149_v28 }
 0x323   :  { %2455 = vmatpush.bf16.msrb.mxu1 %v5065_v52  ;;  %2468 = vmatpush.bf16.msra.mxu3 %v5147_v25 }
 0x324   :  { %2481 = vmatpush.bf16.msrb.mxu0 %v5088_v21  ;;  %2494 = vmatpush.bf16.msrb.mxu2 %v5158_v49 }
 0x327   :  { %2456 = vmatpush.bf16.msrb.mxu1 %v5073_v60  ;;  %2469 = vmatpush.bf16.msra.mxu3 %v5155_v1 }
 0x328   :  { %2482 = vmatpush.bf16.msrb.mxu0 %v5095_v40  ;;  %2495 = vmatpush.bf16.msrb.mxu2 %v5181_v22 }
 0x32b   :  { %2457 = vmatpush.bf16.msrb.mxu1 %v5084_v10  ;;  %2470 = vmatpush.bf16.msra.mxu3 %v5179_v17 }
 0x32c   :  { %2483 = vmatpush.bf16.msrb.mxu0 %v5101_v56  ;;  %2496 = vmatpush.bf16.msrb.mxu2 %v5195_v35 }
 0x32f   :  { %2458 = vmatpush.bf16.msrb.mxu1 %v5092_v5  ;;  %2471 = vmatpush.bf16.msra.mxu3 %v5192_v14 }
 0x330   :  { %2484 = vmatpush.bf16.msrb.mxu0 %v5110_v4  ;;  %2497 = vmatpush.bf16.msrb.mxu2 %v5226_v42 }
 0x333   :  { %2459 = vmatpush.bf16.msrb.mxu1 %v5099_v58  ;;  %2472 = vmatpush.bf16.msra.mxu3 %v5222_v12 }
 0x334   :  { %2485 = vmatpush.bf16.msrb.mxu0 %v5121_v50  ;;  %2498 = vmatpush.bf16.msrb.mxu2 %v5238_v18 }
 0x337   :  { %2460 = vmatpush.bf16.msrb.mxu1 %v5106_v0  ;;  %2473 = vmatpush.bf16.msra.mxu3 %v5931_v13 }
 0x338   :  { %2486 = vmatpush.bf16.msrb.mxu0 %v5932_v39  ;;  %2499 = vmatpush.bf16.msrb.mxu2 %v5933_v37 }
 0x396   :  { %v2220_v46 = vpop.f32.mrf.mxu1 }
 0x397   :  { %v2263_v59 = vadd.f32 %v2220_v46, %v1704_v54  ;;  %v2246_v11 = vpop.f32.mrf.mxu0 }
 0x399   :  { %v4091_v53 = vmul.f32 -1.442695, %v2263_v59 }
 0x39b   :  { %4384 = vpow2.f32 %v4091_v53 }
 0x39c   :  { %v2233_v45 = vpop.f32.mrf.mxu3 }
 0x39d   :  { %v2264_v34 = vadd.f32 %v2233_v45, %v1762_v6  ;;  %v2259_v29 = vpop.f32.mrf.mxu2  ;;  %v2265_v6 = vadd.f32 %v2246_v11, %v5407_v47 }
 0x39e   :  { %v2266_v61 = vadd.f32 %v2259_v29, %v5410_v62  ;;  %v2222_v38 = vpop.f32.mrf.mxu1 }
 0x39f   :  { %v4092_v23 = vmul.f32 -1.442695, %v2264_v34  ;;  %v2248_v2 = vpop.f32.mrf.mxu0 }
 0x3a0   :  { %v4093_v27 = vmul.f32 -1.442695, %v2266_v61 }
 0x3a1   :  { %v4385_v63 = vpop.eup %4384  ;;  %4386 = vpow2.f32 %v4092_v23 }
 0x3a2   :  { %v2270_v20 = vadd.f32 1.0, %v4385_v63  ;;  %4388 = vpow2.f32 %v4093_v27 }
 0x3a4   :  { %4390 = vrcp.f32 %v2270_v20  ;;  %v2235_v54 = vpop.f32.mrf.mxu3  ;;  %v2282_v45 = vand.u32 2147483648, %v2270_v20  ;;  %v2280_v23 = vand.u32 2147483647, %v2270_v20  ;;  %vm2276_vm1 = vweird.f32 %v2270_v20 }
 0x3a5   :  { %v2261_v46 = vpop.f32.mrf.mxu2 }
 0x3a6   :  { %v2283_v63 = vor.u32 1.1754944e-38, %v2282_v45  ;;  %vm2281_vm3 = vcmp.eq.f32.partialorder %v2280_v23, 8.507059e+37 }
 0x3a7   :  { %v4387_v59 = vpop.eup %4386 }
 0x3a8   :  { %v4389_v31 = vpop.eup %4388  ;;  %v2289_v15 = vadd.f32 1.0, %v4387_v59 }
 0x3a9   :  { %v2309_v53 = vadd.f32 1.0, %v4389_v31 }
 0x3aa   :  { %v4391_v3 = vpop.eup %4390  ;;  %4392 = vrcp.f32 %v2289_v15  ;;  %v2301_v31 = vand.u32 2147483648, %v2289_v15  ;;  %vm2295_vm5 = vweird.f32 %v2289_v15 }
 0x3ab   :  { %v2272_v62 = vmul.f32 %v4391_v3, %v2270_v20  ;;  %4394 = vrcp.f32 %v2309_v53  ;;  %vm2277_vm0 = vweird.f32 %v4391_v3  ;;  %vm2315_vm9 = vweird.f32 %v2309_v53 }
 0x3ac   :  { %4396 = vtanh.f32 %v2265_v6  ;;  %vm2278_vm2 = vmor %vm2276_vm1, %vm2277_vm0  ;;  %v2299_v6 = vand.u32 2147483647, %v2289_v15 }
 0x3ad   :  { %v2273_v38 = vsub.f32 1.0, %v2272_v62 }
 0x3ae   :  { %vm2300_vm7 = vcmp.eq.f32.partialorder %v2299_v6, 8.507059e+37 }
 0x3af   :  { %v2274_v61 = vmul.f32 %v4391_v3, %v2273_v38 }
 0x3b0   :  { %v4393_v27 = vpop.eup %4392 }
 0x3b1   :  { %v4395_v34 = vpop.eup %4394  ;;  %v2275_v29 = vadd.f32 %v4391_v3, %v2274_v61  ;;  %v2291_v2 = vmul.f32 %v4393_v27, %v2289_v15  ;;  %vm2296_vm4 = vweird.f32 %v4393_v27  ;;  %v2302_v61 = vor.u32 1.1754944e-38, %v2301_v31 }
 0x3b2   :  { %v2311_v54 = vmul.f32 %v4395_v34, %v2309_v53  ;;  %v4397_v11 = vpop.eup %4396  ;;  %vm2297_vm6 = vmor %vm2295_vm5, %vm2296_vm4  ;;  %vm2316_vm8 = vweird.f32 %v4395_v34 }
 0x3b3   :  { %v2279_v46 = vsel %vm2278_vm2, %v4391_v3, %v2275_v29  ;;  %v2292_v47 = vsub.f32 1.0, %v2291_v2  ;;  %v2321_v2 = vand.u32 2147483648, %v2309_v53  ;;  %vm2317_vm10 = vmor %vm2315_vm9, %vm2316_vm8 }
 0x3b4   :  { %v2284_v59 = vsel %vm2281_vm3, %v2283_v63, %v2279_v46  ;;  %v2312_v38 = vsub.f32 1.0, %v2311_v54  ;;  %v2319_v63 = vand.u32 2147483647, %v2309_v53 }
 0x3b5   :  { %v2326_v62 = vmul.f32 %v4397_v11, %v2284_v59  ;;  %v2293_v55 = vmul.f32 %v4393_v27, %v2292_v47  ;;  %v2322_v15 = vor.u32 1.1754944e-38, %v2321_v2  ;;  %v5941_v59 = vld [vmem:[#allocation33_spill] sm:$0xff] }
 0x3b6   :  { %v2313_v45 = vmul.f32 %v4395_v34, %v2312_v38  ;;  %vm2320_vm11 = vcmp.eq.f32.partialorder %v2319_v63, 8.507059e+37 }
 0x3b7   :  { %v2294_v16 = vadd.f32 %v4393_v27, %v2293_v55 }
 0x3b8   :  { %v2314_v29 = vadd.f32 %v4395_v34, %v2313_v45 }
 0x3b9   :  { %v2298_v20 = vsel %vm2297_vm6, %v4393_v27, %v2294_v16 }
 0x3ba   :  { %v2303_v51 = vsel %vm2300_vm7, %v2302_v61, %v2298_v20  ;;  %v2318_v55 = vsel %vm2317_vm10, %v4395_v34, %v2314_v29 }
 0x3bb   :  { %v2325_v3 = vmul.f32 %v2303_v51, %v5455_v7  ;;  %v2323_v16 = vsel %vm2320_vm11, %v2322_v15, %v2318_v55  ;;  %v5940_v7 = vld [vmem:[#allocation32_spill] sm:$0xff] }
 0x3bd   :  { %v5499_v23 = vadd.f32 %v2326_v62, %v2325_v3 }
 0x3bf   :  { %4398 = vtanh.f32 %v5499_v23 }
 0x3c5   :  { %v4399_v54 = vpop.eup %4398 }
 0x3c6   :  { %v2329_v27 = vmul.f32 %v4399_v54, %v2323_v16 }
 0x3c8   :  { %v2330_v46 = vpack.c.bf16 %v2329_v27, %v2329_v27 }
 0x3ca   :  { %2331 = vst [vmem:[#allocation2 + $0x4] sm:$0xf] %v2330_v46  ;;  %2340 = vmatmul.bf16.vlgmr.msra.gmra.mxu1 %v2330_v46  ;;  %2353 = vmatmul.bf16.vlgmr.msrb.gmra.mxu3 %v2330_v46 }
 0x3cb   :  { %2366 = vmatmul.bf16.vlgmr.msra.gmra.mxu0 %v2330_v46  ;;  %2379 = vmatmul.bf16.vlgmr.msra.gmra.mxu2 %v2330_v46 }
 0x3cc   :  { %2574 = vmatpush.bf16.msra.mxu1 %v5056_v24  ;;  %2587 = vmatpush.bf16.msrb.mxu3 %v5119_v30 }
 0x3cd   :  { %2600 = vmatpush.bf16.msra.mxu0 %v5067_v57  ;;  %2613 = vmatpush.bf16.msra.mxu2 %v5132_v19 }
 0x3d0   :  { %2575 = vmatpush.bf16.msra.mxu1 %v5062_v41  ;;  %2588 = vmatpush.bf16.msrb.mxu3 %v5130_v44 }
 0x3d1   :  { %2601 = vmatpush.bf16.msra.mxu0 %v5075_v26  ;;  %2614 = vmatpush.bf16.msra.mxu2 %v5149_v28 }
 0x3d4   :  { %2576 = vmatpush.bf16.msra.mxu1 %v5065_v52  ;;  %2589 = vmatpush.bf16.msrb.mxu3 %v5147_v25 }
 0x3d5   :  { %2602 = vmatpush.bf16.msra.mxu0 %v5088_v21  ;;  %2615 = vmatpush.bf16.msra.mxu2 %v5158_v49 }
 0x3d8   :  { %2577 = vmatpush.bf16.msra.mxu1 %v5073_v60  ;;  %2590 = vmatpush.bf16.msrb.mxu3 %v5155_v1 }
 0x3d9   :  { %2603 = vmatpush.bf16.msra.mxu0 %v5095_v40  ;;  %2616 = vmatpush.bf16.msra.mxu2 %v5181_v22 }
 0x3dc   :  { %2578 = vmatpush.bf16.msra.mxu1 %v5084_v10  ;;  %2591 = vmatpush.bf16.msrb.mxu3 %v5179_v17 }
 0x3dd   :  { %2604 = vmatpush.bf16.msra.mxu0 %v5101_v56  ;;  %2617 = vmatpush.bf16.msra.mxu2 %v5195_v35 }
 0x3e0   :  { %2579 = vmatpush.bf16.msra.mxu1 %v5092_v5  ;;  %2592 = vmatpush.bf16.msrb.mxu3 %v5192_v14 }
 0x3e1   :  { %2605 = vmatpush.bf16.msra.mxu0 %v5110_v4  ;;  %2618 = vmatpush.bf16.msra.mxu2 %v5226_v42 }
 0x3e4   :  { %2580 = vmatpush.bf16.msra.mxu1 %v5099_v58  ;;  %2593 = vmatpush.bf16.msrb.mxu3 %v5222_v12 }
 0x3e5   :  { %2606 = vmatpush.bf16.msra.mxu0 %v5121_v50  ;;  %2619 = vmatpush.bf16.msra.mxu2 %v5238_v18 }
 0x3e8   :  { %2581 = vmatpush.bf16.msra.mxu1 %v5106_v0  ;;  %2594 = vmatpush.bf16.msrb.mxu3 %v5931_v13 }
 0x3e9   :  { %2607 = vmatpush.bf16.msra.mxu0 %v5932_v39  ;;  %2620 = vmatpush.bf16.msra.mxu2 %v5933_v37 }
 0x447   :  { %v2341_v51 = vpop.f32.mrf.mxu1 }
 0x448   :  { %v2384_v53 = vadd.f32 %v2341_v51, %v5940_v7  ;;  %v2367_v34 = vpop.f32.mrf.mxu0 }
 0x449   :  { %v2386_v46 = vadd.f32 %v2367_v34, %v5413_v9 }
 0x44a   :  { %v4094_v47 = vmul.f32 -1.442695, %v2384_v53 }
 0x44c   :  { %4400 = vpow2.f32 %v4094_v47 }
 0x44d   :  { %v2354_v11 = vpop.f32.mrf.mxu3 }
 0x44e   :  { %v2385_v31 = vadd.f32 %v2354_v11, %v5941_v59  ;;  %v2380_v62 = vpop.f32.mrf.mxu2 }
 0x44f   :  { %v2387_v6 = vadd.f32 %v2380_v62, %v5416_v36  ;;  %v2343_v38 = vpop.f32.mrf.mxu1 }
 0x450   :  { %v4095_v61 = vmul.f32 -1.442695, %v2385_v31  ;;  %v2369_v20 = vpop.f32.mrf.mxu0 }
 0x451   :  { %v4096_v45 = vmul.f32 -1.442695, %v2387_v6 }
 0x452   :  { %v4401_v3 = vpop.eup %4400  ;;  %4402 = vpow2.f32 %v4095_v61 }
 0x453   :  { %v2391_v29 = vadd.f32 1.0, %v4401_v3  ;;  %4404 = vpow2.f32 %v4096_v45 }
 0x455   :  { %4406 = vrcp.f32 %v2391_v29  ;;  %v2356_v2 = vpop.f32.mrf.mxu3  ;;  %v2403_v7 = vand.u32 2147483648, %v2391_v29  ;;  %v2401_v47 = vand.u32 2147483647, %v2391_v29  ;;  %vm2397_vm13 = vweird.f32 %v2391_v29 }
 0x456   :  { %v2382_v63 = vpop.f32.mrf.mxu2 }
 0x457   :  { %v2404_v6 = vor.u32 1.1754944e-38, %v2403_v7  ;;  %vm2402_vm15 = vcmp.eq.f32.partialorder %v2401_v47, 8.507059e+37 }
 0x458   :  { %v4403_v55 = vpop.eup %4402 }
 0x459   :  { %v4405_v15 = vpop.eup %4404  ;;  %v2410_v54 = vadd.f32 1.0, %v4403_v55 }
 0x45a   :  { %v2430_v16 = vadd.f32 1.0, %v4405_v15 }
 0x45b   :  { %v4407_v27 = vpop.eup %4406  ;;  %4408 = vrcp.f32 %v2410_v54  ;;  %v2422_v45 = vand.u32 2147483648, %v2410_v54  ;;  %v2420_v63 = vand.u32 2147483647, %v2410_v54  ;;  %vm2416_vm1 = vweird.f32 %v2410_v54 }
 0x45c   :  { %v2393_v36 = vmul.f32 %v4407_v27, %v2391_v29  ;;  %4410 = vrcp.f32 %v2430_v16  ;;  %vm2398_vm12 = vweird.f32 %v4407_v27  ;;  %v2442_v47 = vand.u32 2147483648, %v2430_v16 }
 0x45d   :  { %4412 = vtanh.f32 %v2386_v46  ;;  %vm2399_vm14 = vmor %vm2397_vm13, %vm2398_vm12  ;;  %v2423_v46 = vor.u32 1.1754944e-38, %v2422_v45  ;;  %vm2421_vm3 = vcmp.eq.f32.partialorder %v2420_v63, 8.507059e+37  ;;  %vm2436_vm5 = vweird.f32 %v2430_v16 }
 0x45e   :  { %v2394_v51 = vsub.f32 1.0, %v2393_v36 }
 0x460   :  { %v2395_v53 = vmul.f32 %v4407_v27, %v2394_v51 }
 0x461   :  { %v4409_v11 = vpop.eup %4408 }
 0x462   :  { %v4411_v59 = vpop.eup %4410  ;;  %v2396_v31 = vadd.f32 %v4407_v27, %v2395_v53  ;;  %v2412_v62 = vmul.f32 %v4409_v11, %v2410_v54  ;;  %vm2417_vm0 = vweird.f32 %v4409_v11  ;;  %v2443_v54 = vor.u32 1.1754944e-38, %v2442_v47 }
 0x463   :  { %v2432_v38 = vmul.f32 %v4411_v59, %v2430_v16  ;;  %v4413_v34 = vpop.eup %4412  ;;  %vm2418_vm2 = vmor %vm2416_vm1, %vm2417_vm0  ;;  %vm2437_vm4 = vweird.f32 %v4411_v59 }
 0x464   :  { %v2400_v61 = vsel %vm2399_vm14, %v4407_v27, %v2396_v31  ;;  %v2413_v9 = vsub.f32 1.0, %v2412_v62  ;;  %v2440_v31 = vand.u32 2147483647, %v2430_v16  ;;  %vm2438_vm6 = vmor %vm2436_vm5, %vm2437_vm4 }
 0x465   :  { %v2405_v20 = vsel %vm2402_vm15, %v2404_v6, %v2400_v61  ;;  %v2433_v55 = vsub.f32 1.0, %v2432_v38 }
 0x466   :  { %v2447_v3 = vmul.f32 %v4413_v34, %v2405_v20  ;;  %v2414_v2 = vmul.f32 %v4409_v11, %v2413_v9  ;;  %vm2441_vm7 = vcmp.eq.f32.partialorder %v2440_v31, 8.507059e+37 }
 0x467   :  { %v2434_v51 = vmul.f32 %v4411_v59, %v2433_v55  ;;  %v5945_v55 = vld [vmem:[#allocation35_spill] sm:$0xff] }
 0x468   :  { %v2415_v15 = vadd.f32 %v4409_v11, %v2414_v2 }
 0x469   :  { %v2435_v53 = vadd.f32 %v4411_v59, %v2434_v51 }
 0x46a   :  { %v2419_v29 = vsel %vm2418_vm2, %v4409_v11, %v2415_v15 }
 0x46b   :  { %v2424_v36 = vsel %vm2421_vm3, %v2423_v46, %v2419_v29  ;;  %v2439_v62 = vsel %vm2438_vm6, %v4411_v59, %v2435_v53  ;;  %v5943_v59 = vld [vmem:[#allocation34_spill] sm:$0xff] }
 0x46c   :  { %v2446_v27 = vmul.f32 %v2424_v36, %v5499_v23  ;;  %v2444_v11 = vsel %vm2441_vm7, %v2443_v54, %v2439_v62  ;;  %v5942_v23 = vld [vmem:[#allocation22_spill] sm:$0xff] }
 0x46d   :  { %v1680_v16 = vadd.f32 %v5942_v23, %v5934_v32 }
 0x46e   :  { %v5539_v7 = vadd.f32 %v2447_v3, %v2446_v27  ;;  %v5944_v3 = vld [vmem:[#allocation23_spill] sm:$0xff] }
 0x46f   :  { %v1709_v9 = vadd.f32 %v5943_v59, %v1680_v16  ;;  %v1738_v2 = vadd.f32 %v5944_v3, %v5937_v8 }
 0x470   :  { %4414 = vtanh.f32 %v5539_v7 }
 0x471   :  { %v1767_v15 = vadd.f32 %v5945_v55, %v1738_v2 }
 0x476   :  { %v4415_v6 = vpop.eup %4414 }
 0x477   :  { %v2450_v38 = vmul.f32 %v4415_v6, %v2444_v11 }
 0x479   :  { %v2451_v61 = vpack.c.bf16 %v2450_v38, %v2450_v38 }
 0x47b   :  { %2452 = vst [vmem:[#allocation2 + $0x8] sm:$0xf] %v2451_v61  ;;  %2461 = vmatmul.bf16.vlgmr.msrb.gmra.mxu1 %v2451_v61  ;;  %2474 = vmatmul.bf16.vlgmr.msra.gmra.mxu3 %v2451_v61 }
 0x47c   :  { %2487 = vmatmul.bf16.vlgmr.msrb.gmra.mxu0 %v2451_v61  ;;  %2500 = vmatmul.bf16.vlgmr.msrb.gmra.mxu2 %v2451_v61 }
 0x47d   :  { %2695 = vmatpush.bf16.msrb.mxu1 %v5056_v24  ;;  %2708 = vmatpush.bf16.msra.mxu3 %v5119_v30 }
 0x47e   :  { %2721 = vmatpush.bf16.msrb.mxu0 %v5067_v57  ;;  %2734 = vmatpush.bf16.msrb.mxu2 %v5132_v19 }
 0x481   :  { %2696 = vmatpush.bf16.msrb.mxu1 %v5062_v41  ;;  %2709 = vmatpush.bf16.msra.mxu3 %v5130_v44 }
 0x482   :  { %2722 = vmatpush.bf16.msrb.mxu0 %v5075_v26  ;;  %2735 = vmatpush.bf16.msrb.mxu2 %v5149_v28 }
 0x485   :  { %2697 = vmatpush.bf16.msrb.mxu1 %v5065_v52  ;;  %2710 = vmatpush.bf16.msra.mxu3 %v5147_v25 }
 0x486   :  { %2723 = vmatpush.bf16.msrb.mxu0 %v5088_v21  ;;  %2736 = vmatpush.bf16.msrb.mxu2 %v5158_v49 }
 0x489   :  { %2698 = vmatpush.bf16.msrb.mxu1 %v5073_v60  ;;  %2711 = vmatpush.bf16.msra.mxu3 %v5155_v1 }
 0x48a   :  { %2724 = vmatpush.bf16.msrb.mxu0 %v5095_v40  ;;  %2737 = vmatpush.bf16.msrb.mxu2 %v5181_v22 }
 0x48d   :  { %2699 = vmatpush.bf16.msrb.mxu1 %v5084_v10  ;;  %2712 = vmatpush.bf16.msra.mxu3 %v5179_v17 }
 0x48e   :  { %2725 = vmatpush.bf16.msrb.mxu0 %v5101_v56  ;;  %2738 = vmatpush.bf16.msrb.mxu2 %v5195_v35 }
 0x491   :  { %2700 = vmatpush.bf16.msrb.mxu1 %v5092_v5  ;;  %2713 = vmatpush.bf16.msra.mxu3 %v5192_v14 }
 0x492   :  { %2726 = vmatpush.bf16.msrb.mxu0 %v5110_v4  ;;  %2739 = vmatpush.bf16.msrb.mxu2 %v5226_v42 }
 0x495   :  { %2701 = vmatpush.bf16.msrb.mxu1 %v5099_v58  ;;  %2714 = vmatpush.bf16.msra.mxu3 %v5222_v12 }
 0x496   :  { %2727 = vmatpush.bf16.msrb.mxu0 %v5121_v50  ;;  %2740 = vmatpush.bf16.msrb.mxu2 %v5238_v18 }
 0x499   :  { %2702 = vmatpush.bf16.msrb.mxu1 %v5106_v0  ;;  %2715 = vmatpush.bf16.msra.mxu3 %v5931_v13 }
 0x49a   :  { %2728 = vmatpush.bf16.msrb.mxu0 %v5932_v39  ;;  %2741 = vmatpush.bf16.msrb.mxu2 %v5933_v37 }
 0x4f8   :  { %v2462_v34 = vpop.f32.mrf.mxu1 }
 0x4f9   :  { %v2505_v20 = vadd.f32 %v2462_v34, %v1709_v9  ;;  %v2488_v45 = vpop.f32.mrf.mxu0 }
 0x4fa   :  { %v2507_v9 = vadd.f32 %v2488_v45, %v5420_v43 }
 0x4fb   :  { %v4097_v63 = vmul.f32 -1.442695, %v2505_v20 }
 0x4fd   :  { %4416 = vpow2.f32 %v4097_v63 }
 0x4fe   :  { %v2475_v46 = vpop.f32.mrf.mxu3 }
 0x4ff   :  { %v2506_v29 = vadd.f32 %v2475_v46, %v1767_v15  ;;  %v2501_v36 = vpop.f32.mrf.mxu2 }
 0x500   :  { %v2508_v51 = vadd.f32 %v2501_v36, %v5423_v33  ;;  %v2464_v27 = vpop.f32.mrf.mxu1 }
 0x501   :  { %v4098_v53 = vmul.f32 -1.442695, %v2506_v29  ;;  %v2490_v47 = vpop.f32.mrf.mxu0 }
 0x502   :  { %v4099_v31 = vmul.f32 -1.442695, %v2508_v51 }
 0x503   :  { %v4417_v62 = vpop.eup %4416  ;;  %4418 = vpow2.f32 %v4098_v53 }
 0x504   :  { %v2512_v54 = vadd.f32 1.0, %v4417_v62  ;;  %4420 = vpow2.f32 %v4099_v31 }
 0x506   :  { %4422 = vrcp.f32 %v2512_v54  ;;  %v2477_v6 = vpop.f32.mrf.mxu3  ;;  %v2524_v20 = vand.u32 2147483648, %v2512_v54  ;;  %v2522_v2 = vand.u32 2147483647, %v2512_v54  ;;  %vm2518_vm9 = vweird.f32 %v2512_v54 }
 0x507   :  { %v2503_v11 = vpop.f32.mrf.mxu2 }
 0x508   :  { %v2525_v29 = vor.u32 1.1754944e-38, %v2524_v20  ;;  %vm2523_vm11 = vcmp.eq.f32.partialorder %v2522_v2, 8.507059e+37 }
 0x509   :  { %v4419_v38 = vpop.eup %4418 }
 0x50a   :  { %v4421_v61 = vpop.eup %4420  ;;  %v2531_v23 = vadd.f32 1.0, %v4419_v38 }
 0x50b   :  { %v2551_v16 = vadd.f32 1.0, %v4421_v61 }
 0x50c   :  { %v4423_v59 = vpop.eup %4422  ;;  %4424 = vrcp.f32 %v2531_v23  ;;  %v2543_v53 = vand.u32 2147483648, %v2531_v23  ;;  %v2541_v62 = vand.u32 2147483647, %v2531_v23  ;;  %vm2537_vm13 = vweird.f32 %v2531_v23 }
 0x50d   :  { %v2514_v33 = vmul.f32 %v4423_v59, %v2512_v54  ;;  %4426 = vrcp.f32 %v2551_v16  ;;  %vm2519_vm8 = vweird.f32 %v4423_v59  ;;  %v2563_v20 = vand.u32 2147483648, %v2551_v16 }
 0x50e   :  { %4428 = vtanh.f32 %v2507_v9  ;;  %vm2520_vm10 = vmor %vm2518_vm9, %vm2519_vm8  ;;  %v2544_v38 = vor.u32 1.1754944e-38, %v2543_v53  ;;  %vm2542_vm15 = vcmp.eq.f32.partialorder %v2541_v62, 8.507059e+37  ;;  %vm2557_vm1 = vweird.f32 %v2551_v16 }
 0x50f   :  { %v2515_v34 = vsub.f32 1.0, %v2514_v33 }
 0x511   :  { %v2516_v3 = vmul.f32 %v4423_v59, %v2515_v34 }
 0x512   :  { %v4425_v63 = vpop.eup %4424 }
 0x513   :  { %v4427_v55 = vpop.eup %4426  ;;  %v2517_v15 = vadd.f32 %v4423_v59, %v2516_v3  ;;  %v2533_v46 = vmul.f32 %v4425_v63, %v2531_v23  ;;  %vm2538_vm12 = vweird.f32 %v4425_v63  ;;  %v2561_v3 = vand.u32 2147483647, %v2551_v16 }
 0x514   :  { %v2553_v36 = vmul.f32 %v4427_v55, %v2551_v16  ;;  %v4429_v45 = vpop.eup %4428  ;;  %vm2539_vm14 = vmor %vm2537_vm13, %vm2538_vm12  ;;  %vm2558_vm0 = vweird.f32 %v4427_v55  ;;  %v2564_v23 = vor.u32 1.1754944e-38, %v2563_v20  ;;  %v5946_v16 = vld [vmem:[#allocation36_spill] sm:$0xff] }
 0x515   :  { %v2521_v51 = vsel %vm2520_vm10, %v4423_v59, %v2517_v15  ;;  %v2534_v43 = vsub.f32 1.0, %v2533_v46  ;;  %vm2559_vm2 = vmor %vm2557_vm1, %vm2558_vm0  ;;  %vm2562_vm3 = vcmp.eq.f32.partialorder %v2561_v3, 8.507059e+37 }
 0x516   :  { %v2526_v27 = vsel %vm2523_vm11, %v2525_v29, %v2521_v51  ;;  %v2554_v6 = vsub.f32 1.0, %v2553_v36 }
 0x517   :  { %v2568_v47 = vmul.f32 %v4429_v45, %v2526_v27  ;;  %v2535_v31 = vmul.f32 %v4425_v63, %v2534_v43  ;;  %v5947_v45 = vld [vmem:[#allocation37_spill] sm:$0xff] }
 0x518   :  { %v2555_v9 = vmul.f32 %v4427_v55, %v2554_v6 }
 0x519   :  { %v2536_v11 = vadd.f32 %v4425_v63, %v2535_v31 }
 0x51a   :  { %v2556_v34 = vadd.f32 %v4427_v55, %v2555_v9 }
 0x51b   :  { %v2540_v54 = vsel %vm2539_vm14, %v4425_v63, %v2536_v11 }
 0x51c   :  { %v2545_v61 = vsel %vm2542_vm15, %v2544_v38, %v2540_v54  ;;  %v2560_v2 = vsel %vm2559_vm2, %v4427_v55, %v2556_v34 }
 0x51d   :  { %v2567_v59 = vmul.f32 %v2545_v61, %v5539_v7  ;;  %v2565_v63 = vsel %vm2562_vm3, %v2564_v23, %v2560_v2  ;;  %v5948_v23 = vld [vmem:[#allocation44_spill] sm:$0xff] }
 0x51f   :  { %v5583_v33 = vadd.f32 %v2568_v47, %v2567_v59 }
 0x521   :  { %4430 = vtanh.f32 %v5583_v33 }
 0x527   :  { %v4431_v15 = vpop.eup %4430 }
 0x528   :  { %v2571_v46 = vmul.f32 %v4431_v15, %v2565_v63 }
 0x52a   :  { %v2572_v29 = vpack.c.bf16 %v2571_v46, %v2571_v46 }
 0x52c   :  { %2573 = vst [vmem:[#allocation2 + $0xc] sm:$0xf] %v2572_v29  ;;  %2582 = vmatmul.bf16.vlgmr.msra.gmra.mxu1 %v2572_v29  ;;  %2595 = vmatmul.bf16.vlgmr.msrb.gmra.mxu3 %v2572_v29 }
 0x52d   :  { %2608 = vmatmul.bf16.vlgmr.msra.gmra.mxu0 %v2572_v29  ;;  %2621 = vmatmul.bf16.vlgmr.msra.gmra.mxu2 %v2572_v29 }
 0x52e   :  { %2816 = vmatpush.bf16.msra.mxu1 %v5056_v24  ;;  %2829 = vmatpush.bf16.msrb.mxu3 %v5119_v30 }
 0x52f   :  { %2842 = vmatpush.bf16.msra.mxu0 %v5067_v57  ;;  %2855 = vmatpush.bf16.msra.mxu2 %v5132_v19 }
 0x532   :  { %2817 = vmatpush.bf16.msra.mxu1 %v5062_v41  ;;  %2830 = vmatpush.bf16.msrb.mxu3 %v5130_v44 }
 0x533   :  { %2843 = vmatpush.bf16.msra.mxu0 %v5075_v26  ;;  %2856 = vmatpush.bf16.msra.mxu2 %v5149_v28 }
 0x536   :  { %2818 = vmatpush.bf16.msra.mxu1 %v5065_v52  ;;  %2831 = vmatpush.bf16.msrb.mxu3 %v5147_v25 }
 0x537   :  { %2844 = vmatpush.bf16.msra.mxu0 %v5088_v21  ;;  %2857 = vmatpush.bf16.msra.mxu2 %v5158_v49 }
 0x53a   :  { %2819 = vmatpush.bf16.msra.mxu1 %v5073_v60  ;;  %2832 = vmatpush.bf16.msrb.mxu3 %v5155_v1 }
 0x53b   :  { %2845 = vmatpush.bf16.msra.mxu0 %v5095_v40  ;;  %2858 = vmatpush.bf16.msra.mxu2 %v5181_v22 }
 0x53e   :  { %2820 = vmatpush.bf16.msra.mxu1 %v5084_v10  ;;  %2833 = vmatpush.bf16.msrb.mxu3 %v5179_v17 }
 0x53f   :  { %2846 = vmatpush.bf16.msra.mxu0 %v5101_v56  ;;  %2859 = vmatpush.bf16.msra.mxu2 %v5195_v35 }
 0x542   :  { %2821 = vmatpush.bf16.msra.mxu1 %v5092_v5  ;;  %2834 = vmatpush.bf16.msrb.mxu3 %v5192_v14 }
 0x543   :  { %2847 = vmatpush.bf16.msra.mxu0 %v5110_v4  ;;  %2860 = vmatpush.bf16.msra.mxu2 %v5226_v42 }
 0x546   :  { %2822 = vmatpush.bf16.msra.mxu1 %v5099_v58  ;;  %2835 = vmatpush.bf16.msrb.mxu3 %v5222_v12 }
 0x547   :  { %2848 = vmatpush.bf16.msra.mxu0 %v5121_v50  ;;  %2861 = vmatpush.bf16.msra.mxu2 %v5238_v18 }
 0x54a   :  { %2823 = vmatpush.bf16.msra.mxu1 %v5106_v0  ;;  %2836 = vmatpush.bf16.msrb.mxu3 %v5931_v13 }
 0x54b   :  { %2849 = vmatpush.bf16.msra.mxu0 %v5932_v39  ;;  %2862 = vmatpush.bf16.msra.mxu2 %v5933_v37 }
 0x5a9   :  { %v2583_v7 = vpop.f32.mrf.mxu1 }
 0x5aa   :  { %v2626_v55 = vadd.f32 %v2583_v7, %v5946_v16  ;;  %v2609_v36 = vpop.f32.mrf.mxu0 }
 0x5ab   :  { %v2628_v15 = vadd.f32 %v2609_v36, %v5948_v23 }
 0x5ac   :  { %v4100_v51 = vmul.f32 -1.442695, %v2626_v55 }
 0x5ae   :  { %4432 = vpow2.f32 %v4100_v51 }
 0x5af   :  { %v2596_v43 = vpop.f32.mrf.mxu3 }
 0x5b0   :  { %v2627_v27 = vadd.f32 %v2596_v43, %v5947_v45  ;;  %v2622_v53 = vpop.f32.mrf.mxu2 }
 0x5b1   :  { %v2629_v47 = vadd.f32 %v2622_v53, %v5429_v48  ;;  %v2585_v31 = vpop.f32.mrf.mxu1 }
 0x5b2   :  { %v4101_v62 = vmul.f32 -1.442695, %v2627_v27  ;;  %v2611_v6 = vpop.f32.mrf.mxu0 }
 0x5b3   :  { %v4102_v11 = vmul.f32 -1.442695, %v2629_v47 }
 0x5b4   :  { %v4433_v38 = vpop.eup %4432  ;;  %4434 = vpow2.f32 %v4101_v62 }
 0x5b5   :  { %v2633_v54 = vadd.f32 1.0, %v4433_v38  ;;  %4436 = vpow2.f32 %v4102_v11 }
 0x5b7   :  { %4438 = vrcp.f32 %v2633_v54  ;;  %v2598_v61 = vpop.f32.mrf.mxu3  ;;  %v2645_v46 = vand.u32 2147483648, %v2633_v54  ;;  %v2643_v7 = vand.u32 2147483647, %v2633_v54  ;;  %vm2639_vm5 = vweird.f32 %v2633_v54 }
 0x5b8   :  { %v2624_v9 = vpop.f32.mrf.mxu2 }
 0x5b9   :  { %v2646_v45 = vor.u32 1.1754944e-38, %v2645_v46  ;;  %vm2644_vm7 = vcmp.eq.f32.partialorder %v2643_v7, 8.507059e+37 }
 0x5ba   :  { %v4435_v59 = vpop.eup %4434 }
 0x5bb   :  { %v4437_v34 = vpop.eup %4436  ;;  %v2652_v20 = vadd.f32 1.0, %v4435_v59 }
 0x5bc   :  { %v2672_v3 = vadd.f32 1.0, %v4437_v34 }
 0x5bd   :  { %v4439_v2 = vpop.eup %4438  ;;  %4440 = vrcp.f32 %v2652_v20  ;;  %v2664_v62 = vand.u32 2147483648, %v2652_v20  ;;  %v2662_v38 = vand.u32 2147483647, %v2652_v20  ;;  %vm2658_vm9 = vweird.f32 %v2652_v20 }
 0x5be   :  { %v2635_v48 = vmul.f32 %v4439_v2, %v2633_v54  ;;  %4442 = vrcp.f32 %v2672_v3  ;;  %vm2640_vm4 = vweird.f32 %v4439_v2  ;;  %vm2678_vm13 = vweird.f32 %v2672_v3 }
 0x5bf   :  { %4444 = vtanh.f32 %v2628_v15  ;;  %vm2641_vm6 = vmor %vm2639_vm5, %vm2640_vm4  ;;  %v2665_v59 = vor.u32 1.1754944e-38, %v2664_v62  ;;  %vm2663_vm11 = vcmp.eq.f32.partialorder %v2662_v38, 8.507059e+37  ;;  %v2682_v46 = vand.u32 2147483647, %v2672_v3 }
 0x5c0   :  { %v2636_v63 = vsub.f32 1.0, %v2635_v48 }
 0x5c1   :  { %vm2683_vm15 = vcmp.eq.f32.partialorder %v2682_v46, 8.507059e+37 }
 0x5c2   :  { %v2637_v29 = vmul.f32 %v4439_v2, %v2636_v63  ;;  %v2684_v63 = vand.u32 2147483648, %v2672_v3 }
 0x5c3   :  { %v4441_v16 = vpop.eup %4440 }
 0x5c4   :  { %v4443_v55 = vpop.eup %4442  ;;  %v2638_v51 = vadd.f32 %v4439_v2, %v2637_v29  ;;  %v2654_v43 = vmul.f32 %v4441_v16, %v2652_v20  ;;  %vm2659_vm8 = vweird.f32 %v4441_v16  ;;  %v2685_v20 = vor.u32 1.1754944e-38, %v2684_v63 }
 0x5c5   :  { %v2674_v27 = vmul.f32 %v4443_v55, %v2672_v3  ;;  %v4445_v47 = vpop.eup %4444  ;;  %vm2660_vm10 = vmor %vm2658_vm9, %vm2659_vm8  ;;  %vm2679_vm12 = vweird.f32 %v4443_v55 }
 0x5c6   :  { %v2642_v53 = vsel %vm2641_vm6, %v4439_v2, %v2638_v51  ;;  %v2655_v36 = vsub.f32 1.0, %v2654_v43  ;;  %vm2680_vm14 = vmor %vm2678_vm13, %vm2679_vm12 }
 0x5c7   :  { %v2647_v31 = vsel %vm2644_vm7, %v2646_v45, %v2642_v53  ;;  %v2675_v61 = vsub.f32 1.0, %v2674_v27 }
 0x5c8   :  { %v2689_v6 = vmul.f32 %v4445_v47, %v2647_v31  ;;  %v2656_v11 = vmul.f32 %v4441_v16, %v2655_v36 }
 0x5c9   :  { %v2676_v23 = vmul.f32 %v4443_v55, %v2675_v61 }
 0x5ca   :  { %v2657_v9 = vadd.f32 %v4441_v16, %v2656_v11 }
 0x5cb   :  { %v2677_v48 = vadd.f32 %v4443_v55, %v2676_v23 }
 0x5cc   :  { %v2661_v54 = vsel %vm2660_vm10, %v4441_v16, %v2657_v9 }
 0x5cd   :  { %v2666_v34 = vsel %vm2663_vm11, %v2665_v59, %v2661_v54  ;;  %v2681_v29 = vsel %vm2680_vm14, %v4443_v55, %v2677_v48 }
 0x5ce   :  { %v2688_v2 = vmul.f32 %v2666_v34, %v5583_v33  ;;  %v2686_v16 = vsel %vm2683_vm15, %v2685_v20, %v2681_v29 }
 0x5d0   :  { %v5623_v15 = vadd.f32 %v2689_v6, %v2688_v2 }
 0x5d2   :  { %4446 = vtanh.f32 %v5623_v15 }
 0x5d8   :  { %v4447_v7 = vpop.eup %4446 }
 0x5d9   :  { %v2692_v51 = vmul.f32 %v4447_v7, %v2686_v16 }
 0x5db   :  { %v2693_v43 = vpack.c.bf16 %v2692_v51, %v2692_v51 }
 0x5dd   :  { %2694 = vst [vmem:[#allocation2 + $0x10] sm:$0xf] %v2693_v43  ;;  %2703 = vmatmul.bf16.vlgmr.msrb.gmra.mxu1 %v2693_v43  ;;  %2716 = vmatmul.bf16.vlgmr.msra.gmra.mxu3 %v2693_v43 }
 0x5de   :  { %2729 = vmatmul.bf16.vlgmr.msrb.gmra.mxu0 %v2693_v43  ;;  %2742 = vmatmul.bf16.vlgmr.msrb.gmra.mxu2 %v2693_v43 }
 0x5df   :  { %2937 = vmatpush.bf16.msrb.mxu1 %v5056_v24  ;;  %2950 = vmatpush.bf16.msra.mxu3 %v5119_v30  ;;  %v5949_v24 = vld [vmem:[#allocation26_spill] sm:$0xff] }
 0x5e0   :  { %2963 = vmatpush.bf16.msrb.mxu0 %v5067_v57  ;;  %2976 = vmatpush.bf16.msrb.mxu2 %v5132_v19 }
 0x5e3   :  { %2938 = vmatpush.bf16.msrb.mxu1 %v5062_v41  ;;  %2951 = vmatpush.bf16.msra.mxu3 %v5130_v44  ;;  %v1685_v41 = vadd.f32 %v5949_v24, %v5934_v32 }
 0x5e4   :  { %2964 = vmatpush.bf16.msrb.mxu0 %v5075_v26  ;;  %2977 = vmatpush.bf16.msrb.mxu2 %v5149_v28 }
 0x5e7   :  { %2939 = vmatpush.bf16.msrb.mxu1 %v5065_v52  ;;  %2952 = vmatpush.bf16.msra.mxu3 %v5147_v25  ;;  %v5950_v52 = vld [vmem:[#allocation38_spill] sm:$0xff] }
 0x5e8   :  { %2965 = vmatpush.bf16.msrb.mxu0 %v5088_v21  ;;  %2978 = vmatpush.bf16.msrb.mxu2 %v5158_v49  ;;  %v1714_v57 = vadd.f32 %v5950_v52, %v1685_v41  ;;  %v5951_v21 = vld [vmem:[#allocation27_spill] sm:$0xff] }
 0x5eb   :  { %2940 = vmatpush.bf16.msrb.mxu1 %v5073_v60  ;;  %2953 = vmatpush.bf16.msra.mxu3 %v5155_v1 }
 0x5ec   :  { %2966 = vmatpush.bf16.msrb.mxu0 %v5095_v40  ;;  %2979 = vmatpush.bf16.msrb.mxu2 %v5181_v22 }
 0x5ef   :  { %2941 = vmatpush.bf16.msrb.mxu1 %v5084_v10  ;;  %2954 = vmatpush.bf16.msra.mxu3 %v5179_v17 }
 0x5f0   :  { %2967 = vmatpush.bf16.msrb.mxu0 %v5101_v56  ;;  %2980 = vmatpush.bf16.msrb.mxu2 %v5195_v35 }
 0x5f3   :  { %2942 = vmatpush.bf16.msrb.mxu1 %v5092_v5  ;;  %2955 = vmatpush.bf16.msra.mxu3 %v5192_v14  ;;  %v1743_v5 = vadd.f32 %v5951_v21, %v5937_v8  ;;  %v5955_v21 = vld [vmem:[#allocation40_spill] sm:$0xff] }
 0x5f4   :  { %2968 = vmatpush.bf16.msrb.mxu0 %v5110_v4  ;;  %2981 = vmatpush.bf16.msrb.mxu2 %v5226_v42 }
 0x5f7   :  { %2943 = vmatpush.bf16.msrb.mxu1 %v5099_v58  ;;  %2956 = vmatpush.bf16.msra.mxu3 %v5222_v12  ;;  %v5952_v58 = vld [vmem:[#allocation39_spill] sm:$0xff] }
 0x5f8   :  { %2969 = vmatpush.bf16.msrb.mxu0 %v5121_v50  ;;  %2982 = vmatpush.bf16.msrb.mxu2 %v5238_v18  ;;  %v1772_v56 = vadd.f32 %v5952_v58, %v1743_v5  ;;  %v5953_v50 = vld [vmem:[#allocation46_spill] sm:$0xff] }
 0x5fb   :  { %2944 = vmatpush.bf16.msrb.mxu1 %v5106_v0  ;;  %2957 = vmatpush.bf16.msra.mxu3 %v5931_v13 }
 0x5fc   :  { %2970 = vmatpush.bf16.msrb.mxu0 %v5932_v39  ;;  %2983 = vmatpush.bf16.msrb.mxu2 %v5933_v37  ;;  %v5954_v39 = vld [vmem:[#allocation45_spill] sm:$0xff] }
 0x65a   :  { %v2704_v60 = vpop.f32.mrf.mxu1 }
 0x65b   :  { %v2747_v26 = vadd.f32 %v2704_v60, %v1714_v57  ;;  %v2730_v10 = vpop.f32.mrf.mxu0 }
 0x65c   :  { %v2749_v37 = vadd.f32 %v2730_v10, %v5954_v39 }
 0x65d   :  { %v4103_v40 = vmul.f32 -1.442695, %v2747_v26 }
 0x65f   :  { %4448 = vpow2.f32 %v4103_v40 }
 0x660   :  { %v2717_v0 = vpop.f32.mrf.mxu3 }
 0x661   :  { %v2748_v4 = vadd.f32 %v2717_v0, %v1772_v56  ;;  %v2743_v30 = vpop.f32.mrf.mxu2  ;;  %v4353_v56 = vld [vmem:[%s5883_s10 + $0x38] sm:$0xff] }
 0x662   :  { %v2750_v44 = vadd.f32 %v2743_v30, %v5953_v50  ;;  %v2706_v19 = vpop.f32.mrf.mxu1 }
 0x663   :  { %v4104_v25 = vmul.f32 -1.442695, %v2748_v4  ;;  %v2732_v28 = vpop.f32.mrf.mxu0  ;;  %v5956_v4 = vld [vmem:[#allocation41_spill] sm:$0xff]  ;;  %v5957_v19 = vld [vmem:[#allocation48_spill] sm:$0xff] }
 0x664   :  { %v4105_v1 = vmul.f32 -1.442695, %v2750_v44  ;;  %v4352_v44 = vld [vmem:[%s5883_s10 + $0x30] sm:$0xff] }
 0x665   :  { %v4449_v49 = vpop.eup %4448  ;;  %4450 = vpow2.f32 %v4104_v25 }
 0x666   :  { %v2754_v17 = vadd.f32 1.0, %v4449_v49  ;;  %4452 = vpow2.f32 %v4105_v1 }
 0x668   :  { %4454 = vrcp.f32 %v2754_v17  ;;  %v2719_v22 = vpop.f32.mrf.mxu3  ;;  %v2766_v55 = vand.u32 2147483648, %v2754_v17  ;;  %v2764_v27 = vand.u32 2147483647, %v2754_v17  ;;  %vm2760_vm1 = vweird.f32 %v2754_v17 }
 0x669   :  { %v2745_v14 = vpop.f32.mrf.mxu2 }
 0x66a   :  { %v2767_v62 = vor.u32 1.1754944e-38, %v2766_v55  ;;  %vm2765_vm3 = vcmp.eq.f32.partialorder %v2764_v27, 8.507059e+37  ;;  %v4351_v14 = vld [vmem:[%s5883_s10 + $0x28] sm:$0xff]  ;;  %v5958_v55 = vld [vmem:[#allocation47_spill] sm:$0xff] }
 0x66b   :  { %v4451_v35 = vpop.eup %4450 }
 0x66c   :  { %v4453_v12 = vpop.eup %4452  ;;  %v2773_v42 = vadd.f32 1.0, %v4451_v35 }
 0x66d   :  { %v2793_v18 = vadd.f32 1.0, %v4453_v12 }
 0x66e   :  { %v4455_v13 = vpop.eup %4454  ;;  %4456 = vrcp.f32 %v2773_v42  ;;  %v2785_v59 = vand.u32 2147483648, %v2773_v42  ;;  %v2783_v23 = vand.u32 2147483647, %v2773_v42  ;;  %vm2779_vm5 = vweird.f32 %v2773_v42 }
 0x66f   :  { %v2756_v33 = vmul.f32 %v4455_v13, %v2754_v17  ;;  %4458 = vrcp.f32 %v2793_v18  ;;  %vm2761_vm0 = vweird.f32 %v4455_v13  ;;  %v2805_v43 = vand.u32 2147483648, %v2793_v18 }
 0x670   :  { %4460 = vtanh.f32 %v2749_v37  ;;  %vm2762_vm2 = vmor %vm2760_vm1, %vm2761_vm0  ;;  %v2786_v63 = vor.u32 1.1754944e-38, %v2785_v59  ;;  %vm2784_vm7 = vcmp.eq.f32.partialorder %v2783_v23, 8.507059e+37  ;;  %vm2799_vm9 = vweird.f32 %v2793_v18  ;;  %v4347_v59 = vld [vmem:[%s5883_s10 + $0x8] sm:$0xff] }
 0x671   :  { %v2757_v3 = vsub.f32 1.0, %v2756_v33  ;;  %v2803_v24 = vand.u32 2147483647, %v2793_v18  ;;  %v2806_v52 = vor.u32 1.1754944e-38, %v2805_v43 }
 0x673   :  { %v2758_v45 = vmul.f32 %v4455_v13, %v2757_v3  ;;  %vm2804_vm11 = vcmp.eq.f32.partialorder %v2803_v24, 8.507059e+37 }
 0x674   :  { %v4457_v53 = vpop.eup %4456 }
 0x675   :  { %v4459_v36 = vpop.eup %4458  ;;  %v2759_v47 = vadd.f32 %v4455_v13, %v2758_v45  ;;  %v2775_v31 = vmul.f32 %v4457_v53, %v2773_v42  ;;  %vm2780_vm4 = vweird.f32 %v4457_v53 }
 0x676   :  { %v2795_v6 = vmul.f32 %v4459_v36, %v2793_v18  ;;  %v4461_v61 = vpop.eup %4460  ;;  %vm2781_vm6 = vmor %vm2779_vm5, %vm2780_vm4  ;;  %vm2800_vm8 = vweird.f32 %v4459_v36  ;;  %v4350_v18 = vld [vmem:[%s5883_s10 + $0x20] sm:$0xff] }
 0x677   :  { %v2763_v11 = vsel %vm2762_vm2, %v4455_v13, %v2759_v47  ;;  %v2776_v38 = vsub.f32 1.0, %v2775_v31  ;;  %vm2801_vm10 = vmor %vm2799_vm9, %vm2800_vm8  ;;  %v4348_v47 = vld [vmem:[%s5883_s10 + $0x10] sm:$0xff]  ;;  %vm3198_vm9 = vcmask 64512  }
 0x678   :  { %v2768_v9 = vsel %vm2765_vm3, %v2767_v62, %v2763_v11  ;;  %v2796_v2 = vsub.f32 1.0, %v2795_v6 }
 0x679   :  { %v2810_v54 = vmul.f32 %v4461_v61, %v2768_v9  ;;  %v2777_v34 = vmul.f32 %v4457_v53, %v2776_v38 }
 0x67a   :  { %v2797_v20 = vmul.f32 %v4459_v36, %v2796_v2 }
 0x67b   :  { %v2778_v48 = vadd.f32 %v4457_v53, %v2777_v34 }
 0x67c   :  { %v2798_v51 = vadd.f32 %v4459_v36, %v2797_v20 }
 0x67d   :  { %v2782_v46 = vsel %vm2781_vm6, %v4457_v53, %v2778_v48  ;;  %v4349_v53 = vld [vmem:[%s5883_s10 + $0x18] sm:$0xff] }
 0x67e   :  { %v2787_v29 = vsel %vm2784_vm7, %v2786_v63, %v2782_v46  ;;  %v2802_v41 = vsel %vm2801_vm10, %v4459_v36, %v2798_v51  ;;  %v4346_v51 = vld [vmem:[%s5883_s10] sm:$0xff] }
 0x67f   :  { %v2809_v7 = vmul.f32 %v2787_v29, %v5623_v15  ;;  %v2807_v60 = vsel %vm2804_vm11, %v2806_v52, %v2802_v41 }
 0x681   :  { %v5667_v16 = vadd.f32 %v2810_v54, %v2809_v7 }
 0x683   :  { %4462 = vtanh.f32 %v5667_v16 }
 0x689   :  { %v4463_v57 = vpop.eup %4462 }
 0x68a   :  { %v2813_v26 = vmul.f32 %v4463_v57, %v2807_v60 }
 0x68c   :  { %v2814_v10 = vpack.c.bf16 %v2813_v26, %v2813_v26 }
 0x68e   :  { %2815 = vst [vmem:[#allocation2 + $0x14] sm:$0xf] %v2814_v10  ;;  %2824 = vmatmul.bf16.vlgmr.msra.gmra.mxu1 %v2814_v10  ;;  %2837 = vmatmul.bf16.vlgmr.msrb.gmra.mxu3 %v2814_v10 }
 0x68f   :  { %2850 = vmatmul.bf16.vlgmr.msra.gmra.mxu0 %v2814_v10  ;;  %2863 = vmatmul.bf16.vlgmr.msra.gmra.mxu2 %v2814_v10 }
 0x690   :  { %3158 = vmatpush.bf16.msra.mxu1 %v4353_v56 }
 0x694   :  { %3159 = vmatpush.bf16.msra.mxu1 %v4352_v44 }
 0x695   :  { %v4344_v44 = vld [vmem:[#allocation2 + $0x10] sm:$0xff] }
 0x698   :  { %3160 = vmatpush.bf16.msra.mxu1 %v4351_v14  ;;  %v5961_v14 = vld [vmem:[#allocation29_spill] sm:$0xff] }
 0x69c   :  { %3161 = vmatpush.bf16.msra.mxu1 %v4350_v18 }
 0x6a0   :  { %3162 = vmatpush.bf16.msra.mxu1 %v4349_v53 }
 0x6a4   :  { %3163 = vmatpush.bf16.msra.mxu1 %v4348_v47 }
 0x6a8   :  { %3164 = vmatpush.bf16.msra.mxu1 %v4347_v59 }
 0x6ac   :  { %3165 = vmatpush.bf16.msra.mxu1 %v4346_v51 }
 0x70b   :  { %v2825_v15 = vpop.f32.mrf.mxu1 }
 0x70c   :  { %v2868_v5 = vadd.f32 %v2825_v15, %v5955_v21  ;;  %v2851_v40 = vpop.f32.mrf.mxu0 }
 0x70d   :  { %v2870_v45 = vadd.f32 %v2851_v40, %v5958_v55 }
 0x70e   :  { %v4106_v58 = vmul.f32 -1.442695, %v2868_v5 }
 0x710   :  { %4464 = vpow2.f32 %v4106_v58 }
 0x711   :  { %v2838_v0 = vpop.f32.mrf.mxu3 }
 0x712   :  { %v2869_v30 = vadd.f32 %v2838_v0, %v5956_v4  ;;  %v2864_v50 = vpop.f32.mrf.mxu2 }
 0x713   :  { %v2871_v25 = vadd.f32 %v2864_v50, %v5957_v19  ;;  %v2827_v28 = vpop.f32.mrf.mxu1  ;;  %v4343_v50 = vld [vmem:[#allocation2 + $0x8] sm:$0xff] }
 0x714   :  { %v4107_v1 = vmul.f32 -1.442695, %v2869_v30  ;;  %v2853_v49 = vpop.f32.mrf.mxu0  ;;  %v5959_v19 = vld [vmem:[#allocation28_spill] sm:$0xff]  ;;  %v5960_v28 = vld [vmem:[#allocation42_spill] sm:$0xff] }
 0x715   :  { %v4108_v17 = vmul.f32 -1.442695, %v2871_v25  ;;  %v1690_v25 = vadd.f32 %v5959_v19, %v5934_v32 }
 0x716   :  { %v4465_v22 = vpop.eup %4464  ;;  %4466 = vpow2.f32 %v4107_v1 }
 0x717   :  { %v2875_v35 = vadd.f32 1.0, %v4465_v22  ;;  %4468 = vpow2.f32 %v4108_v17  ;;  %v1719_v1 = vadd.f32 %v5960_v28, %v1690_v25 }
 0x719   :  { %4470 = vrcp.f32 %v2875_v35  ;;  %v2840_v12 = vpop.f32.mrf.mxu3  ;;  %v2887_v31 = vand.u32 2147483648, %v2875_v35  ;;  %v2885_v6 = vand.u32 2147483647, %v2875_v35  ;;  %vm2881_vm13 = vweird.f32 %v2875_v35 }
 0x71a   :  { %v2866_v42 = vpop.f32.mrf.mxu2 }
 0x71b   :  { %v2888_v54 = vor.u32 1.1754944e-38, %v2887_v31  ;;  %vm2886_vm15 = vcmp.eq.f32.partialorder %v2885_v6, 8.507059e+37  ;;  %v5962_v42 = vld [vmem:[#allocation43_spill] sm:$0xff] }
 0x71c   :  { %v4467_v13 = vpop.eup %4466 }
 0x71d   :  { %v4469_v39 = vpop.eup %4468  ;;  %v2894_v37 = vadd.f32 1.0, %v4467_v13 }
 0x71e   :  { %v2914_v33 = vadd.f32 1.0, %v4469_v39 }
 0x71f   :  { %v4471_v3 = vpop.eup %4470  ;;  %4472 = vrcp.f32 %v2894_v37  ;;  %v2906_v46 = vand.u32 2147483648, %v2894_v37  ;;  %v2904_v7 = vand.u32 2147483647, %v2894_v37  ;;  %vm2900_vm1 = vweird.f32 %v2894_v37 }
 0x720   :  { %v2877_v27 = vmul.f32 %v4471_v3, %v2875_v35  ;;  %4474 = vrcp.f32 %v2914_v33  ;;  %vm2882_vm12 = vweird.f32 %v4471_v3  ;;  %v2926_v21 = vand.u32 2147483648, %v2914_v33 }
 0x721   :  { %4476 = vtanh.f32 %v2870_v45  ;;  %vm2883_vm14 = vmor %vm2881_vm13, %vm2882_vm12  ;;  %v2907_v41 = vor.u32 1.1754944e-38, %v2906_v46  ;;  %vm2905_vm3 = vcmp.eq.f32.partialorder %v2904_v7, 8.507059e+37  ;;  %vm2920_vm5 = vweird.f32 %v2914_v33 }
 0x722   :  { %v2878_v36 = vsub.f32 1.0, %v2877_v27  ;;  %v2924_v5 = vand.u32 2147483647, %v2914_v33  ;;  %v2927_v58 = vor.u32 1.1754944e-38, %v2926_v21  ;;  %v1748_v35 = vadd.f32 %v5961_v14, %v5937_v8  ;;  %v5712_v8 = vld [vmem:[%s5884_s11] ss:$0 sm:$0xff] }
 0x723   :  { %v3187_v27 = vlaneseq }
 0x724   :  { %v2879_v62 = vmul.f32 %v4471_v3, %v2878_v36  ;;  %vm2925_vm7 = vcmp.eq.f32.partialorder %v2924_v5, 8.507059e+37  ;;  %v1777_v18 = vadd.f32 %v5962_v42, %v1748_v35 }
 0x725   :  { %v4473_v11 = vpop.eup %4472  ;;  %v5714_v31 = vand.u32 127, %v3187_v27 }
 0x726   :  { %v4475_v38 = vpop.eup %4474  ;;  %v2880_v61 = vadd.f32 %v4471_v3, %v2879_v62  ;;  %v2896_v9 = vmul.f32 %v4473_v11, %v2894_v37  ;;  %vm2901_vm0 = vweird.f32 %v4473_v11 }
 0x727   :  { %v2916_v34 = vmul.f32 %v4475_v38, %v2914_v33  ;;  %v4477_v48 = vpop.eup %4476  ;;  %vm2902_vm2 = vmor %vm2900_vm1, %vm2901_vm0  ;;  %vm2921_vm4 = vweird.f32 %v4475_v38  ;;  %v5963_v33 = vld [vmem:[#allocation50_spill] sm:$0xff]  ;;  %vm3189_vm8 = vcmp.lt.s32.totalorder %v5714_v31, 7 }
 0x728   :  { %v2884_v23 = vsel %vm2883_vm14, %v4471_v3, %v2880_v61  ;;  %v2897_v2 = vsub.f32 1.0, %v2896_v9  ;;  %vm2922_vm6 = vmor %vm2920_vm5, %vm2921_vm4 }
 0x729   :  { %v2889_v63 = vsel %vm2886_vm15, %v2888_v54, %v2884_v23  ;;  %v2917_v43 = vsub.f32 1.0, %v2916_v34  ;;  %v5964_v23 = vld [vmem:[#allocation49_spill] sm:$0xff] }
 0x72a   :  { %v2931_v29 = vmul.f32 %v4477_v48, %v2889_v63  ;;  %v2898_v20 = vmul.f32 %v4473_v11, %v2897_v2 }
 0x72b   :  { %v2918_v60 = vmul.f32 %v4475_v38, %v2917_v43 }
 0x72c   :  { %v2899_v24 = vadd.f32 %v4473_v11, %v2898_v20 }
 0x72d   :  { %v2919_v15 = vadd.f32 %v4475_v38, %v2918_v60 }
 0x72e   :  { %v2903_v52 = vsel %vm2902_vm2, %v4473_v11, %v2899_v24 }
 0x72f   :  { %v2908_v57 = vsel %vm2905_vm3, %v2907_v41, %v2903_v52  ;;  %v2923_v40 = vsel %vm2922_vm6, %v4475_v38, %v2919_v15 }
 0x730   :  { %v2930_v26 = vmul.f32 %v2908_v57, %v5667_v16  ;;  %v2928_v0 = vsel %vm2925_vm7, %v2927_v58, %v2923_v40  ;;  %v4342_v16 = vld [vmem:[#allocation2] sm:$0xff] }
 0x732   :  { %v5699_v10 = vadd.f32 %v2931_v29, %v2930_v26 }
 0x734   :  { %4478 = vtanh.f32 %v5699_v10 }
 0x73a   :  { %v4479_v56 = vpop.eup %4478 }
 0x73b   :  { %v2934_v4 = vmul.f32 %v4479_v56, %v2928_v0 }
 0x73d   :  { %v2935_v30 = vpack.c.bf16 %v2934_v4, %v2934_v4 }
 0x73f   :  { %2936 = vst [vmem:[#allocation2 + $0x18] sm:$0xf] %v2935_v30  ;;  %2945 = vmatmul.bf16.vlgmr.msrb.gmra.mxu1 %v2935_v30  ;;  %2958 = vmatmul.bf16.vlgmr.msra.gmra.mxu3 %v2935_v30 }
 0x740   :  { %2971 = vmatmul.bf16.vlgmr.msrb.gmra.mxu0 %v2935_v30  ;;  %2984 = vmatmul.bf16.vlgmr.msrb.gmra.mxu2 %v2935_v30 }
 0x74f   :  { %3166 = vmatmul.bf16.vlgmr.msra.gmra.mxu1 %v4342_v16 }
 0x75f   :  { %3171 = vmatmul.bf16.gmra.mxu1 %v4343_v50 }
 0x76f   :  { %3176 = vmatmul.bf16.gmra.mxu1 %v4344_v44 }
 0x7bc   :  { %v2946_v49 = vpop.f32.mrf.mxu1 }
 0x7bd   :  { %v2989_v17 = vadd.f32 %v2946_v49, %v1719_v1  ;;  %v2972_v22 = vpop.f32.mrf.mxu0 }
 0x7be   :  { %v2991_v2 = vadd.f32 %v2972_v22, %v5964_v23 }
 0x7bf   :  { %v4109_v12 = vmul.f32 -1.442695, %v2989_v17 }
 0x7c1   :  { %4480 = vpow2.f32 %v4109_v12 }
 0x7c2   :  { %v2959_v13 = vpop.f32.mrf.mxu3 }
 0x7c3   :  { %v2990_v39 = vadd.f32 %v2959_v13, %v1777_v18  ;;  %v2985_v37 = vpop.f32.mrf.mxu2 }
 0x7c4   :  { %v2992_v3 = vadd.f32 %v2985_v37, %v5963_v33  ;;  %v2948_v55 = vpop.f32.mrf.mxu1 }
 0x7c5   :  { %v4110_v45 = vmul.f32 -1.442695, %v2990_v39  ;;  %v2974_v32 = vpop.f32.mrf.mxu0 }
 0x7c6   :  { %v4111_v53 = vmul.f32 -1.442695, %v2992_v3 }
 0x7c7   :  { %v4481_v36 = vpop.eup %4480  ;;  %4482 = vpow2.f32 %v4110_v45 }
 0x7c8   :  { %v2996_v47 = vadd.f32 1.0, %v4481_v36  ;;  %4484 = vpow2.f32 %v4111_v53 }
 0x7ca   :  { %4486 = vrcp.f32 %v2996_v47  ;;  %v2961_v62 = vpop.f32.mrf.mxu3  ;;  %v3008_v20 = vand.u32 2147483648, %v2996_v47  ;;  %v3006_v43 = vand.u32 2147483647, %v2996_v47  ;;  %vm3002_vm11 = vweird.f32 %v2996_v47 }
 0x7cb   :  { %v2987_v6 = vpop.f32.mrf.mxu2 }
 0x7cc   :  { %v3167_v11 = vpop.f32.mrf.mxu1  ;;  %v3009_v15 = vor.u32 1.1754944e-38, %v3008_v20  ;;  %vm3007_vm13 = vcmp.eq.f32.partialorder %v3006_v43, 8.507059e+37 }
 0x7cd   :  { %v4483_v38 = vpop.eup %4482  ;;  %v5717_v61 = vadd.f32 %v5712_v8, %v3167_v11 }
 0x7ce   :  { %v4485_v9 = vpop.eup %4484  ;;  %v3015_v59 = vadd.f32 1.0, %v4483_v38 }
 0x7cf   :  { %v5720_v54 = vadd.f32 1.0, %v4485_v9  ;;  %v3190_v48 = vsel %vm3189_vm8, %v5717_v61, -1e+30 }
 0x7d0   :  { %v4487_v34 = vpop.eup %4486  ;;  %4488 = vrcp.f32 %v3015_v59  ;;  %v3199_v29 = vsel %vm3198_vm9, %v3190_v48, -inf  ;;  %v3027_v4 = vand.u32 2147483648, %v3015_v59  ;;  %v3025_v50 = vand.u32 2147483647, %v3015_v59 }
 0x7d1   :  { %v2998_v63 = vmul.f32 %v4487_v34, %v2996_v47  ;;  %4490 = vrcp.f32 %v5720_v54  ;;  %3200 = vmax.xlane.f32.xlu0 %v3199_v29  ;;  %vm3003_vm10 = vweird.f32 %v4487_v34  ;;  %vm3021_vm15 = vweird.f32 %v3015_v59 }
 0x7d2   :  { %4492 = vtanh.f32 %v2991_v2  ;;  %vm3004_vm12 = vmor %vm3002_vm11, %vm3003_vm10  ;;  %v3028_v1 = vor.u32 1.1754944e-38, %v3027_v4  ;;  %vm3026_vm1 = vcmp.eq.f32.partialorder %v3025_v50, 8.507059e+37  ;;  %v3047_v39 = vand.u32 2147483648, %v5720_v54 }
 0x7d3   :  { %v2999_v46 = vsub.f32 1.0, %v2998_v63  ;;  %vm3041_vm3 = vweird.f32 %v5720_v54  ;;  %v3045_v33 = vand.u32 2147483647, %v5720_v54 }
 0x7d4   :  { %v3169_v7 = vpop.f32.mrf.mxu1  ;;  %v3048_v45 = vor.u32 1.1754944e-38, %v3047_v39 }
 0x7d5   :  { %v3000_v51 = vmul.f32 %v4487_v34, %v2999_v46  ;;  %v5729_v24 = vadd.f32 %v5712_v8, %v3169_v7  ;;  %vm3046_vm5 = vcmp.eq.f32.partialorder %v3045_v33, 8.507059e+37 }
 0x7d6   :  { %v4489_v41 = vpop.eup %4488 }
 0x7d7   :  { %v4491_v52 = vpop.eup %4490  ;;  %v3001_v57 = vadd.f32 %v4487_v34, %v3000_v51  ;;  %v3017_v60 = vmul.f32 %v4489_v41, %v3015_v59  ;;  %v3191_v26 = vsel %vm3189_vm8, %v5729_v24, -1e+30  ;;  %vm3022_vm14 = vweird.f32 %v4489_v41 }
 0x7d8   :  { %v3037_v21 = vmul.f32 %v4491_v52, %v5720_v54  ;;  %v3202_v58 = vsel %vm3198_vm9, %v3191_v26, -inf  ;;  %v4493_v56 = vpop.eup %4492  ;;  %vm3023_vm0 = vmor %vm3021_vm15, %vm3022_vm14  ;;  %vm3042_vm2 = vweird.f32 %v4491_v52 }
 0x7d9   :  { %v3005_v5 = vsel %vm3004_vm12, %v4487_v34, %v3001_v57  ;;  %v3018_v40 = vsub.f32 1.0, %v3017_v60  ;;  %3203 = vmax.xlane.f32.xlu0 %v3202_v58  ;;  %vm3043_vm4 = vmor %vm3041_vm3, %vm3042_vm2 }
 0x7da   :  { %v3010_v0 = vsel %vm3007_vm13, %v3009_v15, %v3005_v5  ;;  %v3038_v44 = vsub.f32 1.0, %v3037_v21 }
 0x7db   :  { %v3052_v30 = vmul.f32 %v4493_v56, %v3010_v0  ;;  %v3019_v16 = vmul.f32 %v4489_v41, %v3018_v40 }
 0x7dc   :  { %v3172_v19 = vpop.f32.mrf.mxu1  ;;  %v3039_v14 = vmul.f32 %v4491_v52, %v3038_v44 }
 0x7dd   :  { %v3020_v25 = vadd.f32 %v4489_v41, %v3019_v16  ;;  %v5737_v28 = vadd.f32 %v5712_v8, %v3172_v19 }
 0x7de   :  { %v3040_v18 = vadd.f32 %v4491_v52, %v3039_v14 }
 0x7df   :  { %v3024_v49 = vsel %vm3023_vm0, %v4489_v41, %v3020_v25  ;;  %v3192_v17 = vsel %vm3189_vm8, %v5737_v28, -1e+30 }
 0x7e0   :  { %v3029_v22 = vsel %vm3026_vm1, %v3028_v1, %v3024_v49  ;;  %v3205_v35 = vsel %vm3198_vm9, %v3192_v17, -inf  ;;  %v3044_v3 = vsel %vm3043_vm4, %v4491_v52, %v3040_v18 }
 0x7e1   :  { %v3051_v12 = vmul.f32 %v3029_v22, %v5699_v10  ;;  %3206 = vmax.xlane.f32.xlu1 %v3205_v35  ;;  %v3049_v27 = vsel %vm3046_vm5, %v3048_v45, %v3044_v3 }
 0x7e3   :  { %v3053_v42 = vadd.f32 %v3052_v30, %v3051_v12 }
 0x7e4   :  { %v3174_v13 = vpop.f32.mrf.mxu1 }
 0x7e5   :  { %4494 = vtanh.f32 %v3053_v42  ;;  %3312 = vst [vmem:[#allocation12 + $0x8] sm:$0xff] %v3053_v42  ;;  %v5746_v37 = vadd.f32 %v5712_v8, %v3174_v13 }
 0x7e7   :  { %v3193_v10 = vsel %vm3189_vm8, %v5746_v37, -1e+30 }
 0x7e8   :  { %v3208_v55 = vsel %vm3198_vm9, %v3193_v10, -inf }
 0x7e9   :  { %3209 = vmax.xlane.f32.xlu1 %v3208_v55 }
 0x7eb   :  { %v4495_v32 = vpop.eup %4494 }
 0x7ec   :  { %v3055_v53 = vmul.f32 %v4495_v32, %v3049_v27  ;;  %v3177_v36 = vpop.f32.mrf.mxu1 }
 0x7ed   :  { %v5755_v47 = vadd.f32 %v5712_v8, %v3177_v36 }
 0x7ee   :  { %v3056_v62 = vpack.c.bf16 %v3055_v53, %v3055_v53  ;;  %3311 = vst [vmem:[#allocation12] sm:$0xff] %v3055_v53 }
 0x7ef   :  { %v3194_v6 = vsel %vm3189_vm8, %v5755_v47, -1e+30  ;;  %3325 = dma.vmem_to_hbm [thread:$0]  %s3321_s20, 256, %s3323_s19, [#allocation5]  }
 0x7f0   :  { %3057 = vst [vmem:[#allocation2 + $0x1c] sm:$0xf] %v3056_v62  ;;  %v3211_v11 = vsel %vm3198_vm9, %v3194_v6, -inf }
 0x7f1   :  { %3212 = vmax.xlane.f32.xlu2 %v3211_v11 }
 0x7f4   :  { %v3179_v38 = vpop.f32.mrf.mxu1 }
 0x7f5   :  { %v5762_v9 = vadd.f32 %v5712_v8, %v3179_v38 }
 0x7f7   :  { %v3195_v59 = vsel %vm3189_vm8, %v5762_v9, -1e+30  ;;  %v4345_v54 = vld [vmem:[#allocation2 + $0x18] sm:$0xff] }
 0x7f8   :  { %v3214_v34 = vsel %vm3198_vm9, %v3195_v59, -inf  ;;  %3181 = vmatmul.bf16.gmra.mxu1 %v4345_v54 }
 0x7f9   :  { %3215 = vmax.xlane.f32.xlu2 %v3214_v34 }
 0x844   :  { %v3201_v23 = vpop.xlane.xlu0 %3200 }
 0x845   :  { %v3223_v2 = vsub.f32 %v5717_v61, %v3201_v23 }
 0x847   :  { %v3231_v48 = vmul.f32 1.442695, %v3223_v2 }
 0x849   :  { %4496 = vpow2.f32 %v3231_v48 }
 0x84c   :  { %v3204_v60 = vpop.xlane.xlu0 %3203 }
 0x84d   :  { %v3224_v26 = vsub.f32 %v5729_v24, %v3204_v60 }
 0x84f   :  { %v4497_v63 = vpop.eup %4496  ;;  %v3233_v21 = vmul.f32 1.442695, %v3224_v26 }
 0x850   :  { %v3247_v46 = vsel %vm3189_vm8, %v4497_v63, 0.0 }
 0x851   :  { %v3255_v29 = vsel %vm3198_vm9, %v3247_v46, 0.0 }
 0x852   :  { %3256 = vadd.xlane.f32.xlu2 %v3255_v29 }
 0x854   :  { %v3207_v20 = vpop.xlane.xlu1 %3206 }
 0x855   :  { %v3225_v5 = vsub.f32 %v5737_v28, %v3207_v20 }
 0x857   :  { %v3235_v0 = vmul.f32 1.442695, %v3225_v5 }
 0x85c   :  { %v3210_v7 = vpop.xlane.xlu1 %3209 }
 0x85d   :  { %v3226_v51 = vsub.f32 %v5746_v37, %v3210_v7 }
 0x85f   :  { %v3237_v43 = vmul.f32 1.442695, %v3226_v51 }
 0x861   :  { %4498 = vpow2.f32 %v3237_v43 }
 0x862   :  { %4500 = vpow2.f32 %v3233_v21 }
 0x863   :  { %4502 = vpow2.f32 %v3235_v0 }
 0x864   :  { %v3213_v15 = vpop.xlane.xlu2 %3212 }
 0x865   :  { %v3227_v40 = vsub.f32 %v5755_v47, %v3213_v15 }
 0x867   :  { %v4499_v41 = vpop.eup %4498  ;;  %v3239_v30 = vmul.f32 1.442695, %v3227_v40 }
 0x868   :  { %v3250_v52 = vsel %vm3189_vm8, %v4499_v41, 0.0  ;;  %v4501_v44 = vpop.eup %4500 }
 0x869   :  { %v3264_v57 = vsel %vm3198_vm9, %v3250_v52, 0.0  ;;  %4504 = vpow2.f32 %v3239_v30  ;;  %v3248_v49 = vsel %vm3189_vm8, %v4501_v44, 0.0  ;;  %v4503_v12 = vpop.eup %4502 }
 0x86a   :  { %3265 = vadd.xlane.f32.xlu2 %v3264_v57  ;;  %v3258_v35 = vsel %vm3198_vm9, %v3248_v49, 0.0 }
 0x86c   :  { %v3216_v50 = vpop.xlane.xlu2 %3215 }
 0x86d   :  { %v3228_v19 = vsub.f32 %v5762_v9, %v3216_v50 }
 0x86f   :  { %v3241_v22 = vmul.f32 1.442695, %v3228_v19  ;;  %v4505_v42 = vpop.eup %4504 }
 0x870   :  { %v3251_v18 = vsel %vm3189_vm8, %v4505_v42, 0.0 }
 0x871   :  { %4506 = vpow2.f32 %v3241_v22  ;;  %v3267_v39 = vsel %vm3198_vm9, %v3251_v18, 0.0 }
 0x875   :  { %v3182_v58 = vpop.f32.mrf.mxu1 }
 0x876   :  { %v5780_v56 = vadd.f32 %v5712_v8, %v3182_v58 }
 0x877   :  { %v4507_v33 = vpop.eup %4506 }
 0x878   :  { %v3196_v4 = vsel %vm3189_vm8, %v5780_v56, -1e+30  ;;  %v3252_v10 = vsel %vm3189_vm8, %v4507_v33, 0.0 }
 0x879   :  { %v3217_v16 = vsel %vm3198_vm9, %v3196_v4, -inf  ;;  %v3270_v3 = vsel %vm3198_vm9, %v3252_v10, 0.0 }
 0x87a   :  { %3218 = vmax.xlane.f32.xlu0 %v3217_v16 }
 0x87d   :  { %v3184_v25 = vpop.f32.mrf.mxu1 }
 0x87e   :  { %v5788_v1 = vadd.f32 %v5712_v8, %v3184_v25  ;;  %v3249_v8 = vsel %vm3189_vm8, %v4503_v12, 0.0 }
 0x87f   :  { %v3261_v13 = vsel %vm3198_vm9, %v3249_v8, 0.0 }
 0x880   :  { %v3197_v17 = vsel %vm3189_vm8, %v5788_v1, -1e+30 }
 0x881   :  { %v3220_v14 = vsel %vm3198_vm9, %v3197_v17, -inf }
 0x882   :  { %3221 = vmax.xlane.f32.xlu1 %v3220_v14  ;;  %3259 = vadd.xlane.f32.xlu0 %v3258_v35 }
 0x88a   :  { %3262 = vadd.xlane.f32.xlu1 %v3261_v13  ;;  %3268 = vadd.xlane.f32.xlu0 %v3267_v39 }
 0x892   :  { %3271 = vadd.xlane.f32.xlu1 %v3270_v3 }
 0x8c5   :  { %v3257_v55 = vpop.xlane.xlu2 %3256 }
 0x8c6   :  { %4508 = vrcp.f32 %v3257_v55 }
 0x8cc   :  { %v4509_v45 = vpop.eup %4508 }
 0x8cd   :  { %v3287_v32 = vmul.f32 %v4509_v45, %v3247_v46 }
 0x8cf   :  { %v3295_v27 = vsel %vm3189_vm8, %v3287_v32, %v5717_v61 }
 0x8d0   :  { %3303 = vst.msk [vmem:[%s5885_s12] sm:$0xff] %vm3198_vm9, %v3295_v27 }
 0x8dd   :  { %v3266_v53 = vpop.xlane.xlu2 %3265 }
 0x8de   :  { %4510 = vrcp.f32 %v3266_v53 }
 0x8e4   :  { %v4511_v36 = vpop.eup %4510 }
 0x8e5   :  { %v3290_v62 = vmul.f32 %v4511_v36, %v3250_v52 }
 0x8e7   :  { %v3298_v6 = vsel %vm3189_vm8, %v3290_v62, %v5746_v37 }
 0x8e8   :  { %3306 = vst.msk [vmem:[%s5885_s12 + $0x18] sm:$0xff] %vm3198_vm9, %v3298_v6 }
 0x8ed   :  { %v3219_v11 = vpop.xlane.xlu0 %3218 }
 0x8ee   :  { %v3229_v61 = vsub.f32 %v5780_v56, %v3219_v11 }
 0x8f0   :  { %v3243_v38 = vmul.f32 1.442695, %v3229_v61 }
 0x8f2   :  { %4512 = vpow2.f32 %v3243_v38 }
 0x8f5   :  { %v3222_v59 = vpop.xlane.xlu1 %3221  ;;  %v3260_v54 = vpop.xlane.xlu0 %3259 }
 0x8f6   :  { %v3230_v34 = vsub.f32 %v5788_v1, %v3222_v59  ;;  %4514 = vrcp.f32 %v3260_v54 }
 0x8f8   :  { %v4513_v23 = vpop.eup %4512  ;;  %v3245_v2 = vmul.f32 1.442695, %v3230_v34 }
 0x8f9   :  { %v3253_v37 = vsel %vm3189_vm8, %v4513_v23, 0.0 }
 0x8fa   :  { %4516 = vpow2.f32 %v3245_v2  ;;  %v3273_v48 = vsel %vm3198_vm9, %v3253_v37, 0.0 }
 0x8fb   :  { %3274 = vadd.xlane.f32.xlu2 %v3273_v48 }
 0x8fc   :  { %v4515_v63 = vpop.eup %4514 }
 0x8fd   :  { %v3288_v46 = vmul.f32 %v4515_v63, %v3248_v49  ;;  %v3263_v29 = vpop.xlane.xlu1 %3262  ;;  %v3269_v20 = vpop.xlane.xlu0 %3268 }
 0x8fe   :  { %4518 = vrcp.f32 %v3263_v29 }
 0x8ff   :  { %v3296_v7 = vsel %vm3189_vm8, %v3288_v46, %v5729_v24  ;;  %4520 = vrcp.f32 %v3269_v20 }
 0x900   :  { %v4517_v51 = vpop.eup %4516  ;;  %3304 = vst.msk [vmem:[%s5885_s12 + $0x8] sm:$0xff] %vm3198_vm9, %v3296_v7 }
 0x901   :  { %v3254_v43 = vsel %vm3189_vm8, %v4517_v51, 0.0 }
 0x902   :  { %v3276_v41 = vsel %vm3198_vm9, %v3254_v43, 0.0 }
 0x903   :  { %3277 = vadd.xlane.f32.xlu0 %v3276_v41 }
 0x904   :  { %v4519_v24 = vpop.eup %4518 }
 0x905   :  { %v4521_v52 = vpop.eup %4520  ;;  %v3289_v57 = vmul.f32 %v4519_v24, %v3249_v8  ;;  %v3272_v60 = vpop.xlane.xlu1 %3271 }
 0x906   :  { %v3291_v26 = vmul.f32 %v4521_v52, %v3251_v18  ;;  %4522 = vrcp.f32 %v3272_v60 }
 0x907   :  { %v3297_v15 = vsel %vm3189_vm8, %v3289_v57, %v5737_v28 }
 0x908   :  { %3305 = vst.msk [vmem:[%s5885_s12 + $0x10] sm:$0xff] %vm3198_vm9, %v3297_v15  ;;  %v3299_v21 = vsel %vm3189_vm8, %v3291_v26, %v5755_v47 }
 0x909   :  { %3307 = vst.msk [vmem:[%s5885_s12 + $0x20] sm:$0xff] %vm3198_vm9, %v3299_v21 }
 0x90c   :  { %v4523_v5 = vpop.eup %4522 }
 0x90d   :  { %v3292_v40 = vmul.f32 %v4523_v5, %v3252_v10 }
 0x90f   :  { %v3300_v28 = vsel %vm3189_vm8, %v3292_v40, %v5762_v9 }
 0x910   :  { %3308 = vst.msk [vmem:[%s5885_s12 + $0x28] sm:$0xff] %vm3198_vm9, %v3300_v28 }
 0x96e   :  { %v3275_v58 = vpop.xlane.xlu2 %3274 }
 0x96f   :  { %4524 = vrcp.f32 %v3275_v58 }
 0x975   :  { %v4525_v0 = vpop.eup %4524 }
 0x976   :  { %v3293_v47 = vmul.f32 %v4525_v0, %v3253_v37  ;;  %v3278_v4 = vpop.xlane.xlu0 %3277 }
 0x977   :  { %4526 = vrcp.f32 %v3278_v4 }
 0x978   :  { %v3301_v30 = vsel %vm3189_vm8, %v3293_v47, %v5780_v56 }
 0x979   :  { %3309 = vst.msk [vmem:[%s5885_s12 + $0x30] sm:$0xff] %vm3198_vm9, %v3301_v30 }
 0x97d   :  { %v4527_v9 = vpop.eup %4526 }
 0x97e   :  { %v3294_v16 = vmul.f32 %v4527_v9, %v3254_v43 }
 0x980   :  { %v3302_v50 = vsel %vm3189_vm8, %v3294_v16, %v5788_v1 }
 0x981   :  { %3310 = vst.msk [vmem:[%s5885_s12 + $0x38] sm:$0xff] %vm3198_vm9, %v3302_v50 }
 0x982   :  { %4678 = dma.done.wait [#allocation5], 256  }
 0x983   :  { %4679 = vsyncadd [#allocation5], 4294967040 }
 0x984   :  { %3332 = vsyncpa [#allocation4], 1 }
 0x985   :  { %3333 = vsyncpa [#allocation7], 1 }
 0x986   :  { %3334 = vsyncpa [#allocation10], 1 }
 0x987   :  { %3335 = vsyncpa [#allocation5], 1 }

</bundles_post_ra>
